<compile_context>
chip_gen: v7x
topology: tpu7x:2x2x1
jax: 0.10.0
libtpu: 0.0.40
codegen_flags: <defaults>
</compile_context>

<pallas_src>
import functools

import jax
import jax.numpy as jnp
from jax.experimental import pallas as pl
from jax.experimental.pallas import tpu as pltpu

# Lane-padded sizes (real sizes: 25 / 10 / 20 / 50 / 1).
K1P = 32     # conv1 patch length (1*5*5 = 25, padded to 32)
C1P = 128    # conv1 out channels (10)
C2P = 128    # conv2 out channels (20)
F1P = 128    # fc1 out features  (50)
F2P = 128    # fc2 out features  (1)

TILE_BATCH = 8   # images per grid step (clamped to the batch size)


# ------------------------------ fused kernel -------------------------------

def _disc_kernel(p1_ref, w1_ref, b1_ref, w2_ref, b2_ref,
                 wf1_ref, bf1_ref, wf2_ref, bf2_ref, o_ref, *, tb):
    f32 = jnp.float32
    bf16 = jnp.bfloat16

    # ---- conv1 (im2col matmul) + 2x2 max-pool + ReLU -----------------------
    # p1_ref: (4, tb*192, 32); leading 4 = position inside each 2x2 pooling
    # window, so the pool is just a max over that leading axis.  Bias is added
    # after the max (valid: same constant per channel inside the window).
    w1 = w1_ref[...]
    acc1 = jnp.dot(p1_ref[0], w1, preferred_element_type=f32)
    for q in range(1, 4):
        acc1 = jnp.maximum(acc1, jnp.dot(p1_ref[q], w1,
                                         preferred_element_type=f32))
    x1 = jnp.maximum(acc1 + b1_ref[...], 0.0)         # (tb*192, 128) f32
    # Rows are ordered (n, h, w_pad): h in [0,12), w_pad in [0,16); columns
    # w_pad >= 12 are padding and are never read by conv2 (j + ow <= 11).
    # Cast to bf16 once here so the 25 conv2 slices feed the MXU directly.
    x1 = x1.astype(bf16).reshape(tb, 12, 16, C1P)

    # ---- conv2 as 25 shifted matmuls (channels on lanes); Dropout2d = id ---
    acc2 = None
    for i in range(5):
        xh = x1[:, i:i + 8, :, :]                      # hoist h-slice per kh
        for j in range(5):
            xs = xh[:, :, j:j + 8, :].reshape(tb * 64, C1P)
            part = jnp.dot(xs, w2_ref[i * 5 + j], preferred_element_type=f32)
            acc2 = part if acc2 is None else acc2 + part
    y2 = (acc2 + b2_ref[...]).reshape(tb, 8, 8, C2P)   # (tb, 8, 8, 128) f32

    # ---- 2x2 max-pool + ReLU + flatten (matches torch .view(-1, 320)) ------
    pieces = []
    for hh in range(4):
        for ww in range(4):
            m = jnp.maximum(y2[:, 2 * hh, 2 * ww, :],
                            y2[:, 2 * hh, 2 * ww + 1, :])
            m = jnp.maximum(m, y2[:, 2 * hh + 1, 2 * ww, :])
            m = jnp.maximum(m, y2[:, 2 * hh + 1, 2 * ww + 1, :])
            pieces.append(m)
    flat = jnp.maximum(jnp.concatenate(pieces, axis=-1), 0.0)  # (tb, 2048) f32

    # ---- fc1 (ReLU) + fc2, fused ------------------------------------------
    h = jnp.dot(flat.astype(bf16), wf1_ref[...], preferred_element_type=f32)
    h = jnp.maximum(h + bf1_ref[...], 0.0)             # (tb, 128)
    out = jnp.dot(h.astype(bf16), wf2_ref[...], preferred_element_type=f32)
    o_ref[...] = (out + bf2_ref[...]).astype(o_ref.dtype)   # col 0 = logit


# ------------------------------- JAX wrapper --------------------------------

def _prep_params(params):
    """Lane-pad / permute weights once into the layouts the kernel expects."""
    f32, bf16 = jnp.float32, jnp.bfloat16

    # conv1: (10,1,5,5) -> (K=32, C1P) matrix, rows ordered k = i*5+j.
    w1 = jnp.zeros((K1P, C1P), f32).at[:25, :10].set(
        params["conv1_w"].reshape(10, 25).T).astype(bf16)
    b1 = jnp.zeros((1, C1P), f32).at[0, :10].set(params["conv1_b"])

    # conv2: (20,10,5,5) -> 25 per-shift (Cin_pad, Cout_pad) matrices.
    w2 = jnp.zeros((25, C1P, C2P), f32).at[:, :10, :20].set(
        params["conv2_w"].transpose(2, 3, 1, 0).reshape(25, 10, 20)).astype(bf16)
    b2 = jnp.zeros((1, C2P), f32).at[0, :20].set(params["conv2_b"])

    # fc1: torch feature index = c*16 + h*4 + w ; kernel column = p*128 + c,
    # with p = h*4 + w  ->  weight[(p*128 + c), f] = fc1_w[f, c*16 + p].
    wf1 = jnp.zeros((16, C2P, F1P), f32).at[:, :20, :50].set(
        params["fc1_w"].reshape(50, 20, 16).transpose(2, 1, 0)
    ).reshape(16 * C2P, F1P).astype(bf16)
    bf1 = jnp.zeros((1, F1P), f32).at[0, :50].set(params["fc1_b"])

    # fc2: (1,50) -> (F1P, F2P) with the real column at lane 0.
    wf2 = jnp.zeros((F1P, F2P), f32).at[:50, :1].set(params["fc2_w"].T).astype(bf16)
    bf2 = jnp.zeros((1, F2P), f32).at[0, :1].set(params["fc2_b"])
    return w1, b1, w2, b2, wf1, bf1, wf2, bf2


def _conv1_patches(x, npad):
    """x: (N,1,28,28) -> (4, npad*192, 32) bf16 im2col patches.

    Row order is (dh, dw, n, h_pooled, w_pooled_pad16), column k = i*5+j, so
    the in-kernel 2x2 pool is a max over the leading axis and the pooled W
    axis is already padded 12 -> 16 for sublane alignment.
    """
    n = x.shape[0]
    xp = jnp.pad(x[:, 0], ((0, npad - n), (0, 0), (0, 8)))        # (npad,28,36)
    cols = [xp[:, i:i + 24, j:j + 32] for i in range(5) for j in range(5)]
    stk = jnp.stack(cols, axis=-1)                                # (npad,24,32,25)
    stk = jnp.pad(stk, ((0, 0), (0, 0), (0, 0), (0, K1P - 25)))   # (npad,24,32,32)
    p1 = stk.reshape(npad, 12, 2, 16, 2, K1P).transpose(2, 4, 0, 1, 3, 5)
    return p1.reshape(4, npad * 192, K1P).astype(jnp.bfloat16)


@jax.jit
def discriminator_forward(params, x):
    # x: (N, 1, 28, 28) float32 (NCHW, like the PyTorch module)
    n = x.shape[0]
    tb = min(TILE_BATCH, n)
    npad = pl.cdiv(n, tb) * tb

    p1 = _conv1_patches(x.astype(jnp.float32), npad)
    w1, b1, w2, b2, wf1, bf1, wf2, bf2 = _prep_params(params)

    out = pl.pallas_call(
        functools.partial(_disc_kernel, tb=tb),
        out_shape=jax.ShapeDtypeStruct((npad, F2P), jnp.float32),
        grid=(npad // tb,),
        in_specs=[
            pl.BlockSpec((4, tb * 192, K1P), lambda b: (0, b, 0)),   # conv1 patches
            pl.BlockSpec((K1P, C1P), lambda b: (0, 0)),              # w1
            pl.BlockSpec((1, C1P), lambda b: (0, 0)),                # b1
            pl.BlockSpec((25, C1P, C2P), lambda b: (0, 0, 0)),       # w2
            pl.BlockSpec((1, C2P), lambda b: (0, 0)),                # b2
            pl.BlockSpec((16 * C2P, F1P), lambda b: (0, 0)),         # fc1 w
            pl.BlockSpec((1, F1P), lambda b: (0, 0)),                # fc1 b
            pl.BlockSpec((F1P, F2P), lambda b: (0, 0)),              # fc2 w
            pl.BlockSpec((1, F2P), lambda b: (0, 0)),                # fc2 b
        ],
        out_specs=pl.BlockSpec((tb, F2P), lambda b: (b, 0)),
        compiler_params=pltpu.CompilerParams(
            dimension_semantics=("parallel",),
            vmem_limit_bytes=48 * 1024 * 1024),
    )(p1, w1, b1, w2, b2, wf1, bf1, wf2, bf2)

    return out[:n, :1]   # lane 0 of the padded fc2 output is the real logit


def init_params(key):
    ks = jax.random.split(key, 8)
    s = 0.05
    return {
        "conv1_w": s * jax.random.normal(ks[0], (10, 1, 5, 5), jnp.float32),
        "conv1_b": s * jax.random.normal(ks[1], (10,), jnp.float32),
        "conv2_w": s * jax.random.normal(ks[2], (20, 10, 5, 5), jnp.float32),
        "conv2_b": s * jax.random.normal(ks[3], (20,), jnp.float32),
        "fc1_w": s * jax.random.normal(ks[4], (50, 320), jnp.float32),
        "fc1_b": s * jax.random.normal(ks[5], (50,), jnp.float32),
        "fc2_w": s * jax.random.normal(ks[6], (1, 50), jnp.float32),
        "fc2_b": s * jax.random.normal(ks[7], (1,), jnp.float32),
    }


if __name__ == "__main__":
    key = jax.random.PRNGKey(0)
    k_param, k_x = jax.random.split(key)
    params = init_params(k_param)
    x = jax.random.normal(k_x, (2, 1, 28, 28), jnp.float32)

    out = discriminator_forward(params, x)
    jax.block_until_ready(out)
    assert out.shape == (2, 1) and out.dtype == jnp.float32
    print("KERNEL_OK")
</pallas_src>

<mosaic_0001>
module attributes {stable_mosaic.version = 11 : i64} {
  func.func @_disc_kernel(%arg0: i32, %arg1: memref<4x384x32xbf16, #tpu.memory_space<vmem>>, %arg2: memref<32x128xbf16, #tpu.memory_space<vmem>>, %arg3: memref<1x128xf32, #tpu.memory_space<vmem>>, %arg4: memref<25x128x128xbf16, #tpu.memory_space<vmem>>, %arg5: memref<1x128xf32, #tpu.memory_space<vmem>>, %arg6: memref<2048x128xbf16, #tpu.memory_space<vmem>>, %arg7: memref<1x128xf32, #tpu.memory_space<vmem>>, %arg8: memref<128x128xbf16, #tpu.memory_space<vmem>>, %arg9: memref<1x128xf32, #tpu.memory_space<vmem>>, %arg10: memref<2x128xf32, #tpu.memory_space<vmem>>) attributes {dimension_semantics = [#tpu.dimension_semantics<parallel>], iteration_bounds = array<i64: 1>, scalar_prefetch = 0 : i64, scratch_operands = 0 : i64, tpu.core_type = #tpu.core_type<tc>, window_params = [{transform_indices = @transform_0, window_bounds = array<i64: 4, 384, 32>}, {pipeline_mode = #tpu.pipeline_mode<synchronous>, transform_indices = @transform_1, window_bounds = array<i64: 32, 128>}, {pipeline_mode = #tpu.pipeline_mode<synchronous>, transform_indices = @transform_2, window_bounds = array<i64: 1, 128>}, {pipeline_mode = #tpu.pipeline_mode<synchronous>, transform_indices = @transform_3, window_bounds = array<i64: 25, 128, 128>}, {pipeline_mode = #tpu.pipeline_mode<synchronous>, transform_indices = @transform_4, window_bounds = array<i64: 1, 128>}, {pipeline_mode = #tpu.pipeline_mode<synchronous>, transform_indices = @transform_5, window_bounds = array<i64: 2048, 128>}, {pipeline_mode = #tpu.pipeline_mode<synchronous>, transform_indices = @transform_6, window_bounds = array<i64: 1, 128>}, {pipeline_mode = #tpu.pipeline_mode<synchronous>, transform_indices = @transform_7, window_bounds = array<i64: 128, 128>}, {pipeline_mode = #tpu.pipeline_mode<synchronous>, transform_indices = @transform_8, window_bounds = array<i64: 1, 128>}, {transform_indices = @transform_9, window_bounds = array<i64: 2, 128>}]} {
    %c0 = arith.constant 0 : index
    %c0_0 = arith.constant 0 : index
    %0 = vector.load %arg2[%c0, %c0_0] : memref<32x128xbf16, #tpu.memory_space<vmem>>, vector<32x128xbf16>
    %c0_1 = arith.constant 0 : index
    %c0_2 = arith.constant 0 : index
    %c0_3 = arith.constant 0 : index
    %1 = vector.load %arg1[%c0_1, %c0_2, %c0_3] : memref<4x384x32xbf16, #tpu.memory_space<vmem>>, vector<1x384x32xbf16>
    %2 = vector.shape_cast %1 : vector<1x384x32xbf16> to vector<384x32xbf16>
    %cst = arith.constant dense<0.000000e+00> : vector<384x128xf32>
    %3 = tpu.matmul %2, %0, %cst {dimension_numbers = #tpu.dot_dimension_numbers<[1], [0], [0], [1], [0, 0, 1, 1], [], []>} : vector<384x32xbf16>, vector<32x128xbf16>, vector<384x128xf32> -> vector<384x128xf32>
    %c1 = arith.constant 1 : index
    %c0_4 = arith.constant 0 : index
    %c0_5 = arith.constant 0 : index
    %4 = vector.load %arg1[%c1, %c0_4, %c0_5] : memref<4x384x32xbf16, #tpu.memory_space<vmem>>, vector<1x384x32xbf16>
    %5 = vector.shape_cast %4 : vector<1x384x32xbf16> to vector<384x32xbf16>
    %cst_6 = arith.constant dense<0.000000e+00> : vector<384x128xf32>
    %6 = tpu.matmul %5, %0, %cst_6 {dimension_numbers = #tpu.dot_dimension_numbers<[1], [0], [0], [1], [0, 0, 1, 1], [], []>} : vector<384x32xbf16>, vector<32x128xbf16>, vector<384x128xf32> -> vector<384x128xf32>
    %7 = arith.maximumf %3, %6 : vector<384x128xf32>
    %c2 = arith.constant 2 : index
    %c0_7 = arith.constant 0 : index
    %c0_8 = arith.constant 0 : index
    %8 = vector.load %arg1[%c2, %c0_7, %c0_8] : memref<4x384x32xbf16, #tpu.memory_space<vmem>>, vector<1x384x32xbf16>
    %9 = vector.shape_cast %8 : vector<1x384x32xbf16> to vector<384x32xbf16>
    %cst_9 = arith.constant dense<0.000000e+00> : vector<384x128xf32>
    %10 = tpu.matmul %9, %0, %cst_9 {dimension_numbers = #tpu.dot_dimension_numbers<[1], [0], [0], [1], [0, 0, 1, 1], [], []>} : vector<384x32xbf16>, vector<32x128xbf16>, vector<384x128xf32> -> vector<384x128xf32>
    %11 = arith.maximumf %7, %10 : vector<384x128xf32>
    %c3 = arith.constant 3 : index
    %c0_10 = arith.constant 0 : index
    %c0_11 = arith.constant 0 : index
    %12 = vector.load %arg1[%c3, %c0_10, %c0_11] : memref<4x384x32xbf16, #tpu.memory_space<vmem>>, vector<1x384x32xbf16>
    %13 = vector.shape_cast %12 : vector<1x384x32xbf16> to vector<384x32xbf16>
    %cst_12 = arith.constant dense<0.000000e+00> : vector<384x128xf32>
    %14 = tpu.matmul %13, %0, %cst_12 {dimension_numbers = #tpu.dot_dimension_numbers<[1], [0], [0], [1], [0, 0, 1, 1], [], []>} : vector<384x32xbf16>, vector<32x128xbf16>, vector<384x128xf32> -> vector<384x128xf32>
    %15 = arith.maximumf %11, %14 : vector<384x128xf32>
    %c0_13 = arith.constant 0 : index
    %c0_14 = arith.constant 0 : index
    %16 = vector.load %arg3[%c0_13, %c0_14] : memref<1x128xf32, #tpu.memory_space<vmem>>, vector<1x128xf32>
    %17 = vector.broadcast %16 : vector<1x128xf32> to vector<384x128xf32>
    %18 = arith.addf %15, %17 : vector<384x128xf32>
    %cst_15 = arith.constant 0.000000e+00 : f32
    %19 = vector.broadcast %cst_15 : f32 to vector<384x128xf32>
    %20 = arith.maximumf %18, %19 : vector<384x128xf32>
    %21 = arith.truncf %20 : vector<384x128xf32> to vector<384x128xbf16>
    %22 = vector.shape_cast %21 : vector<384x128xbf16> to vector<2x12x16x128xbf16>
    %23 = vector.extract_strided_slice %22 {offsets = [0, 0, 0, 0], sizes = [2, 8, 16, 128], strides = [1, 1, 1, 1]} : vector<2x12x16x128xbf16> to vector<2x8x16x128xbf16>
    %24 = vector.extract_strided_slice %23 {offsets = [0, 0, 0, 0], sizes = [2, 8, 8, 128], strides = [1, 1, 1, 1]} : vector<2x8x16x128xbf16> to vector<2x8x8x128xbf16>
    %25 = vector.shape_cast %24 : vector<2x8x8x128xbf16> to vector<128x128xbf16>
    %c0_16 = arith.constant 0 : index
    %c0_17 = arith.constant 0 : index
    %c0_18 = arith.constant 0 : index
    %26 = vector.load %arg4[%c0_16, %c0_17, %c0_18] : memref<25x128x128xbf16, #tpu.memory_space<vmem>>, vector<1x128x128xbf16>
    %27 = vector.shape_cast %26 : vector<1x128x128xbf16> to vector<128x128xbf16>
    %cst_19 = arith.constant dense<0.000000e+00> : vector<128x128xf32>
    %28 = tpu.matmul %25, %27, %cst_19 {dimension_numbers = #tpu.dot_dimension_numbers<[1], [0], [0], [1], [0, 0, 1, 1], [], []>} : vector<128x128xbf16>, vector<128x128xbf16>, vector<128x128xf32> -> vector<128x128xf32>
    %29 = vector.extract_strided_slice %23 {offsets = [0, 0, 1, 0], sizes = [2, 8, 8, 128], strides = [1, 1, 1, 1]} : vector<2x8x16x128xbf16> to vector<2x8x8x128xbf16>
    %30 = vector.shape_cast %29 : vector<2x8x8x128xbf16> to vector<128x128xbf16>
    %c1_20 = arith.constant 1 : index
    %c0_21 = arith.constant 0 : index
    %c0_22 = arith.constant 0 : index
    %31 = vector.load %arg4[%c1_20, %c0_21, %c0_22] : memref<25x128x128xbf16, #tpu.memory_space<vmem>>, vector<1x128x128xbf16>
    %32 = vector.shape_cast %31 : vector<1x128x128xbf16> to vector<128x128xbf16>
    %cst_23 = arith.constant dense<0.000000e+00> : vector<128x128xf32>
    %33 = tpu.matmul %30, %32, %cst_23 {dimension_numbers = #tpu.dot_dimension_numbers<[1], [0], [0], [1], [0, 0, 1, 1], [], []>} : vector<128x128xbf16>, vector<128x128xbf16>, vector<128x128xf32> -> vector<128x128xf32>
    %34 = arith.addf %28, %33 : vector<128x128xf32>
    %35 = vector.extract_strided_slice %23 {offsets = [0, 0, 2, 0], sizes = [2, 8, 8, 128], strides = [1, 1, 1, 1]} : vector<2x8x16x128xbf16> to vector<2x8x8x128xbf16>
    %36 = vector.shape_cast %35 : vector<2x8x8x128xbf16> to vector<128x128xbf16>
    %c2_24 = arith.constant 2 : index
    %c0_25 = arith.constant 0 : index
    %c0_26 = arith.constant 0 : index
    %37 = vector.load %arg4[%c2_24, %c0_25, %c0_26] : memref<25x128x128xbf16, #tpu.memory_space<vmem>>, vector<1x128x128xbf16>
    %38 = vector.shape_cast %37 : vector<1x128x128xbf16> to vector<128x128xbf16>
    %cst_27 = arith.constant dense<0.000000e+00> : vector<128x128xf32>
    %39 = tpu.matmul %36, %38, %cst_27 {dimension_numbers = #tpu.dot_dimension_numbers<[1], [0], [0], [1], [0, 0, 1, 1], [], []>} : vector<128x128xbf16>, vector<128x128xbf16>, vector<128x128xf32> -> vector<128x128xf32>
    %40 = arith.addf %34, %39 : vector<128x128xf32>
    %41 = vector.extract_strided_slice %23 {offsets = [0, 0, 3, 0], sizes = [2, 8, 8, 128], strides = [1, 1, 1, 1]} : vector<2x8x16x128xbf16> to vector<2x8x8x128xbf16>
    %42 = vector.shape_cast %41 : vector<2x8x8x128xbf16> to vector<128x128xbf16>
    %c3_28 = arith.constant 3 : index
    %c0_29 = arith.constant 0 : index
    %c0_30 = arith.constant 0 : index
    %43 = vector.load %arg4[%c3_28, %c0_29, %c0_30] : memref<25x128x128xbf16, #tpu.memory_space<vmem>>, vector<1x128x128xbf16>
    %44 = vector.shape_cast %43 : vector<1x128x128xbf16> to vector<128x128xbf16>
    %cst_31 = arith.constant dense<0.000000e+00> : vector<128x128xf32>
    %45 = tpu.matmul %42, %44, %cst_31 {dimension_numbers = #tpu.dot_dimension_numbers<[1], [0], [0], [1], [0, 0, 1, 1], [], []>} : vector<128x128xbf16>, vector<128x128xbf16>, vector<128x128xf32> -> vector<128x128xf32>
    %46 = arith.addf %40, %45 : vector<128x128xf32>
    %47 = vector.extract_strided_slice %23 {offsets = [0, 0, 4, 0], sizes = [2, 8, 8, 128], strides = [1, 1, 1, 1]} : vector<2x8x16x128xbf16> to vector<2x8x8x128xbf16>
    %48 = vector.shape_cast %47 : vector<2x8x8x128xbf16> to vector<128x128xbf16>
    %c4 = arith.constant 4 : index
    %c0_32 = arith.constant 0 : index
    %c0_33 = arith.constant 0 : index
    %49 = vector.load %arg4[%c4, %c0_32, %c0_33] : memref<25x128x128xbf16, #tpu.memory_space<vmem>>, vector<1x128x128xbf16>
    %50 = vector.shape_cast %49 : vector<1x128x128xbf16> to vector<128x128xbf16>
    %cst_34 = arith.constant dense<0.000000e+00> : vector<128x128xf32>
    %51 = tpu.matmul %48, %50, %cst_34 {dimension_numbers = #tpu.dot_dimension_numbers<[1], [0], [0], [1], [0, 0, 1, 1], [], []>} : vector<128x128xbf16>, vector<128x128xbf16>, vector<128x128xf32> -> vector<128x128xf32>
    %52 = arith.addf %46, %51 : vector<128x128xf32>
    %53 = vector.extract_strided_slice %22 {offsets = [0, 1, 0, 0], sizes = [2, 8, 16, 128], strides = [1, 1, 1, 1]} : vector<2x12x16x128xbf16> to vector<2x8x16x128xbf16>
    %54 = vector.extract_strided_slice %53 {offsets = [0, 0, 0, 0], sizes = [2, 8, 8, 128], strides = [1, 1, 1, 1]} : vector<2x8x16x128xbf16> to vector<2x8x8x128xbf16>
    %55 = vector.shape_cast %54 : vector<2x8x8x128xbf16> to vector<128x128xbf16>
    %c5 = arith.constant 5 : index
    %c0_35 = arith.constant 0 : index
    %c0_36 = arith.constant 0 : index
    %56 = vector.load %arg4[%c5, %c0_35, %c0_36] : memref<25x128x128xbf16, #tpu.memory_space<vmem>>, vector<1x128x128xbf16>
    %57 = vector.shape_cast %56 : vector<1x128x128xbf16> to vector<128x128xbf16>
    %cst_37 = arith.constant dense<0.000000e+00> : vector<128x128xf32>
    %58 = tpu.matmul %55, %57, %cst_37 {dimension_numbers = #tpu.dot_dimension_numbers<[1], [0], [0], [1], [0, 0, 1, 1], [], []>} : vector<128x128xbf16>, vector<128x128xbf16>, vector<128x128xf32> -> vector<128x128xf32>
    %59 = arith.addf %52, %58 : vector<128x128xf32>
    %60 = vector.extract_strided_slice %53 {offsets = [0, 0, 1, 0], sizes = [2, 8, 8, 128], strides = [1, 1, 1, 1]} : vector<2x8x16x128xbf16> to vector<2x8x8x128xbf16>
    %61 = vector.shape_cast %60 : vector<2x8x8x128xbf16> to vector<128x128xbf16>
    %c6 = arith.constant 6 : index
    %c0_38 = arith.constant 0 : index
    %c0_39 = arith.constant 0 : index
    %62 = vector.load %arg4[%c6, %c0_38, %c0_39] : memref<25x128x128xbf16, #tpu.memory_space<vmem>>, vector<1x128x128xbf16>
    %63 = vector.shape_cast %62 : vector<1x128x128xbf16> to vector<128x128xbf16>
    %cst_40 = arith.constant dense<0.000000e+00> : vector<128x128xf32>
    %64 = tpu.matmul %61, %63, %cst_40 {dimension_numbers = #tpu.dot_dimension_numbers<[1], [0], [0], [1], [0, 0, 1, 1], [], []>} : vector<128x128xbf16>, vector<128x128xbf16>, vector<128x128xf32> -> vector<128x128xf32>
    %65 = arith.addf %59, %64 : vector<128x128xf32>
    %66 = vector.extract_strided_slice %53 {offsets = [0, 0, 2, 0], sizes = [2, 8, 8, 128], strides = [1, 1, 1, 1]} : vector<2x8x16x128xbf16> to vector<2x8x8x128xbf16>
    %67 = vector.shape_cast %66 : vector<2x8x8x128xbf16> to vector<128x128xbf16>
    %c7 = arith.constant 7 : index
    %c0_41 = arith.constant 0 : index
    %c0_42 = arith.constant 0 : index
    %68 = vector.load %arg4[%c7, %c0_41, %c0_42] : memref<25x128x128xbf16, #tpu.memory_space<vmem>>, vector<1x128x128xbf16>
    %69 = vector.shape_cast %68 : vector<1x128x128xbf16> to vector<128x128xbf16>
    %cst_43 = arith.constant dense<0.000000e+00> : vector<128x128xf32>
    %70 = tpu.matmul %67, %69, %cst_43 {dimension_numbers = #tpu.dot_dimension_numbers<[1], [0], [0], [1], [0, 0, 1, 1], [], []>} : vector<128x128xbf16>, vector<128x128xbf16>, vector<128x128xf32> -> vector<128x128xf32>
    %71 = arith.addf %65, %70 : vector<128x128xf32>
    %72 = vector.extract_strided_slice %53 {offsets = [0, 0, 3, 0], sizes = [2, 8, 8, 128], strides = [1, 1, 1, 1]} : vector<2x8x16x128xbf16> to vector<2x8x8x128xbf16>
    %73 = vector.shape_cast %72 : vector<2x8x8x128xbf16> to vector<128x128xbf16>
    %c8 = arith.constant 8 : index
    %c0_44 = arith.constant 0 : index
    %c0_45 = arith.constant 0 : index
    %74 = vector.load %arg4[%c8, %c0_44, %c0_45] : memref<25x128x128xbf16, #tpu.memory_space<vmem>>, vector<1x128x128xbf16>
    %75 = vector.shape_cast %74 : vector<1x128x128xbf16> to vector<128x128xbf16>
    %cst_46 = arith.constant dense<0.000000e+00> : vector<128x128xf32>
    %76 = tpu.matmul %73, %75, %cst_46 {dimension_numbers = #tpu.dot_dimension_numbers<[1], [0], [0], [1], [0, 0, 1, 1], [], []>} : vector<128x128xbf16>, vector<128x128xbf16>, vector<128x128xf32> -> vector<128x128xf32>
    %77 = arith.addf %71, %76 : vector<128x128xf32>
    %78 = vector.extract_strided_slice %53 {offsets = [0, 0, 4, 0], sizes = [2, 8, 8, 128], strides = [1, 1, 1, 1]} : vector<2x8x16x128xbf16> to vector<2x8x8x128xbf16>
    %79 = vector.shape_cast %78 : vector<2x8x8x128xbf16> to vector<128x128xbf16>
    %c9 = arith.constant 9 : index
    %c0_47 = arith.constant 0 : index
    %c0_48 = arith.constant 0 : index
    %80 = vector.load %arg4[%c9, %c0_47, %c0_48] : memref<25x128x128xbf16, #tpu.memory_space<vmem>>, vector<1x128x128xbf16>
    %81 = vector.shape_cast %80 : vector<1x128x128xbf16> to vector<128x128xbf16>
    %cst_49 = arith.constant dense<0.000000e+00> : vector<128x128xf32>
    %82 = tpu.matmul %79, %81, %cst_49 {dimension_numbers = #tpu.dot_dimension_numbers<[1], [0], [0], [1], [0, 0, 1, 1], [], []>} : vector<128x128xbf16>, vector<128x128xbf16>, vector<128x128xf32> -> vector<128x128xf32>
    %83 = arith.addf %77, %82 : vector<128x128xf32>
    %84 = vector.extract_strided_slice %22 {offsets = [0, 2, 0, 0], sizes = [2, 8, 16, 128], strides = [1, 1, 1, 1]} : vector<2x12x16x128xbf16> to vector<2x8x16x128xbf16>
    %85 = vector.extract_strided_slice %84 {offsets = [0, 0, 0, 0], sizes = [2, 8, 8, 128], strides = [1, 1, 1, 1]} : vector<2x8x16x128xbf16> to vector<2x8x8x128xbf16>
    %86 = vector.shape_cast %85 : vector<2x8x8x128xbf16> to vector<128x128xbf16>
    %c10 = arith.constant 10 : index
    %c0_50 = arith.constant 0 : index
    %c0_51 = arith.constant 0 : index
    %87 = vector.load %arg4[%c10, %c0_50, %c0_51] : memref<25x128x128xbf16, #tpu.memory_space<vmem>>, vector<1x128x128xbf16>
    %88 = vector.shape_cast %87 : vector<1x128x128xbf16> to vector<128x128xbf16>
    %cst_52 = arith.constant dense<0.000000e+00> : vector<128x128xf32>
    %89 = tpu.matmul %86, %88, %cst_52 {dimension_numbers = #tpu.dot_dimension_numbers<[1], [0], [0], [1], [0, 0, 1, 1], [], []>} : vector<128x128xbf16>, vector<128x128xbf16>, vector<128x128xf32> -> vector<128x128xf32>
    %90 = arith.addf %83, %89 : vector<128x128xf32>
    %91 = vector.extract_strided_slice %84 {offsets = [0, 0, 1, 0], sizes = [2, 8, 8, 128], strides = [1, 1, 1, 1]} : vector<2x8x16x128xbf16> to vector<2x8x8x128xbf16>
    %92 = vector.shape_cast %91 : vector<2x8x8x128xbf16> to vector<128x128xbf16>
    %c11 = arith.constant 11 : index
    %c0_53 = arith.constant 0 : index
    %c0_54 = arith.constant 0 : index
    %93 = vector.load %arg4[%c11, %c0_53, %c0_54] : memref<25x128x128xbf16, #tpu.memory_space<vmem>>, vector<1x128x128xbf16>
    %94 = vector.shape_cast %93 : vector<1x128x128xbf16> to vector<128x128xbf16>
    %cst_55 = arith.constant dense<0.000000e+00> : vector<128x128xf32>
    %95 = tpu.matmul %92, %94, %cst_55 {dimension_numbers = #tpu.dot_dimension_numbers<[1], [0], [0], [1], [0, 0, 1, 1], [], []>} : vector<128x128xbf16>, vector<128x128xbf16>, vector<128x128xf32> -> vector<128x128xf32>
    %96 = arith.addf %90, %95 : vector<128x128xf32>
    %97 = vector.extract_strided_slice %84 {offsets = [0, 0, 2, 0], sizes = [2, 8, 8, 128], strides = [1, 1, 1, 1]} : vector<2x8x16x128xbf16> to vector<2x8x8x128xbf16>
    %98 = vector.shape_cast %97 : vector<2x8x8x128xbf16> to vector<128x128xbf16>
    %c12 = arith.constant 12 : index
    %c0_56 = arith.constant 0 : index
    %c0_57 = arith.constant 0 : index
    %99 = vector.load %arg4[%c12, %c0_56, %c0_57] : memref<25x128x128xbf16, #tpu.memory_space<vmem>>, vector<1x128x128xbf16>
    %100 = vector.shape_cast %99 : vector<1x128x128xbf16> to vector<128x128xbf16>
    %cst_58 = arith.constant dense<0.000000e+00> : vector<128x128xf32>
    %101 = tpu.matmul %98, %100, %cst_58 {dimension_numbers = #tpu.dot_dimension_numbers<[1], [0], [0], [1], [0, 0, 1, 1], [], []>} : vector<128x128xbf16>, vector<128x128xbf16>, vector<128x128xf32> -> vector<128x128xf32>
    %102 = arith.addf %96, %101 : vector<128x128xf32>
    %103 = vector.extract_strided_slice %84 {offsets = [0, 0, 3, 0], sizes = [2, 8, 8, 128], strides = [1, 1, 1, 1]} : vector<2x8x16x128xbf16> to vector<2x8x8x128xbf16>
    %104 = vector.shape_cast %103 : vector<2x8x8x128xbf16> to vector<128x128xbf16>
    %c13 = arith.constant 13 : index
    %c0_59 = arith.constant 0 : index
    %c0_60 = arith.constant 0 : index
    %105 = vector.load %arg4[%c13, %c0_59, %c0_60] : memref<25x128x128xbf16, #tpu.memory_space<vmem>>, vector<1x128x128xbf16>
    %106 = vector.shape_cast %105 : vector<1x128x128xbf16> to vector<128x128xbf16>
    %cst_61 = arith.constant dense<0.000000e+00> : vector<128x128xf32>
    %107 = tpu.matmul %104, %106, %cst_61 {dimension_numbers = #tpu.dot_dimension_numbers<[1], [0], [0], [1], [0, 0, 1, 1], [], []>} : vector<128x128xbf16>, vector<128x128xbf16>, vector<128x128xf32> -> vector<128x128xf32>
    %108 = arith.addf %102, %107 : vector<128x128xf32>
    %109 = vector.extract_strided_slice %84 {offsets = [0, 0, 4, 0], sizes = [2, 8, 8, 128], strides = [1, 1, 1, 1]} : vector<2x8x16x128xbf16> to vector<2x8x8x128xbf16>
    %110 = vector.shape_cast %109 : vector<2x8x8x128xbf16> to vector<128x128xbf16>
    %c14 = arith.constant 14 : index
    %c0_62 = arith.constant 0 : index
    %c0_63 = arith.constant 0 : index
    %111 = vector.load %arg4[%c14, %c0_62, %c0_63] : memref<25x128x128xbf16, #tpu.memory_space<vmem>>, vector<1x128x128xbf16>
    %112 = vector.shape_cast %111 : vector<1x128x128xbf16> to vector<128x128xbf16>
    %cst_64 = arith.constant dense<0.000000e+00> : vector<128x128xf32>
    %113 = tpu.matmul %110, %112, %cst_64 {dimension_numbers = #tpu.dot_dimension_numbers<[1], [0], [0], [1], [0, 0, 1, 1], [], []>} : vector<128x128xbf16>, vector<128x128xbf16>, vector<128x128xf32> -> vector<128x128xf32>
    %114 = arith.addf %108, %113 : vector<128x128xf32>
    %115 = vector.extract_strided_slice %22 {offsets = [0, 3, 0, 0], sizes = [2, 8, 16, 128], strides = [1, 1, 1, 1]} : vector<2x12x16x128xbf16> to vector<2x8x16x128xbf16>
    %116 = vector.extract_strided_slice %115 {offsets = [0, 0, 0, 0], sizes = [2, 8, 8, 128], strides = [1, 1, 1, 1]} : vector<2x8x16x128xbf16> to vector<2x8x8x128xbf16>
    %117 = vector.shape_cast %116 : vector<2x8x8x128xbf16> to vector<128x128xbf16>
    %c15 = arith.constant 15 : index
    %c0_65 = arith.constant 0 : index
    %c0_66 = arith.constant 0 : index
    %118 = vector.load %arg4[%c15, %c0_65, %c0_66] : memref<25x128x128xbf16, #tpu.memory_space<vmem>>, vector<1x128x128xbf16>
    %119 = vector.shape_cast %118 : vector<1x128x128xbf16> to vector<128x128xbf16>
    %cst_67 = arith.constant dense<0.000000e+00> : vector<128x128xf32>
    %120 = tpu.matmul %117, %119, %cst_67 {dimension_numbers = #tpu.dot_dimension_numbers<[1], [0], [0], [1], [0, 0, 1, 1], [], []>} : vector<128x128xbf16>, vector<128x128xbf16>, vector<128x128xf32> -> vector<128x128xf32>
    %121 = arith.addf %114, %120 : vector<128x128xf32>
    %122 = vector.extract_strided_slice %115 {offsets = [0, 0, 1, 0], sizes = [2, 8, 8, 128], strides = [1, 1, 1, 1]} : vector<2x8x16x128xbf16> to vector<2x8x8x128xbf16>
    %123 = vector.shape_cast %122 : vector<2x8x8x128xbf16> to vector<128x128xbf16>
    %c16 = arith.constant 16 : index
    %c0_68 = arith.constant 0 : index
    %c0_69 = arith.constant 0 : index
    %124 = vector.load %arg4[%c16, %c0_68, %c0_69] : memref<25x128x128xbf16, #tpu.memory_space<vmem>>, vector<1x128x128xbf16>
    %125 = vector.shape_cast %124 : vector<1x128x128xbf16> to vector<128x128xbf16>
    %cst_70 = arith.constant dense<0.000000e+00> : vector<128x128xf32>
    %126 = tpu.matmul %123, %125, %cst_70 {dimension_numbers = #tpu.dot_dimension_numbers<[1], [0], [0], [1], [0, 0, 1, 1], [], []>} : vector<128x128xbf16>, vector<128x128xbf16>, vector<128x128xf32> -> vector<128x128xf32>
    %127 = arith.addf %121, %126 : vector<128x128xf32>
    %128 = vector.extract_strided_slice %115 {offsets = [0, 0, 2, 0], sizes = [2, 8, 8, 128], strides = [1, 1, 1, 1]} : vector<2x8x16x128xbf16> to vector<2x8x8x128xbf16>
    %129 = vector.shape_cast %128 : vector<2x8x8x128xbf16> to vector<128x128xbf16>
    %c17 = arith.constant 17 : index
    %c0_71 = arith.constant 0 : index
    %c0_72 = arith.constant 0 : index
    %130 = vector.load %arg4[%c17, %c0_71, %c0_72] : memref<25x128x128xbf16, #tpu.memory_space<vmem>>, vector<1x128x128xbf16>
    %131 = vector.shape_cast %130 : vector<1x128x128xbf16> to vector<128x128xbf16>
    %cst_73 = arith.constant dense<0.000000e+00> : vector<128x128xf32>
    %132 = tpu.matmul %129, %131, %cst_73 {dimension_numbers = #tpu.dot_dimension_numbers<[1], [0], [0], [1], [0, 0, 1, 1], [], []>} : vector<128x128xbf16>, vector<128x128xbf16>, vector<128x128xf32> -> vector<128x128xf32>
    %133 = arith.addf %127, %132 : vector<128x128xf32>
    %134 = vector.extract_strided_slice %115 {offsets = [0, 0, 3, 0], sizes = [2, 8, 8, 128], strides = [1, 1, 1, 1]} : vector<2x8x16x128xbf16> to vector<2x8x8x128xbf16>
    %135 = vector.shape_cast %134 : vector<2x8x8x128xbf16> to vector<128x128xbf16>
    %c18 = arith.constant 18 : index
    %c0_74 = arith.constant 0 : index
    %c0_75 = arith.constant 0 : index
    %136 = vector.load %arg4[%c18, %c0_74, %c0_75] : memref<25x128x128xbf16, #tpu.memory_space<vmem>>, vector<1x128x128xbf16>
    %137 = vector.shape_cast %136 : vector<1x128x128xbf16> to vector<128x128xbf16>
    %cst_76 = arith.constant dense<0.000000e+00> : vector<128x128xf32>
    %138 = tpu.matmul %135, %137, %cst_76 {dimension_numbers = #tpu.dot_dimension_numbers<[1], [0], [0], [1], [0, 0, 1, 1], [], []>} : vector<128x128xbf16>, vector<128x128xbf16>, vector<128x128xf32> -> vector<128x128xf32>
    %139 = arith.addf %133, %138 : vector<128x128xf32>
    %140 = vector.extract_strided_slice %115 {offsets = [0, 0, 4, 0], sizes = [2, 8, 8, 128], strides = [1, 1, 1, 1]} : vector<2x8x16x128xbf16> to vector<2x8x8x128xbf16>
    %141 = vector.shape_cast %140 : vector<2x8x8x128xbf16> to vector<128x128xbf16>
    %c19 = arith.constant 19 : index
    %c0_77 = arith.constant 0 : index
    %c0_78 = arith.constant 0 : index
    %142 = vector.load %arg4[%c19, %c0_77, %c0_78] : memref<25x128x128xbf16, #tpu.memory_space<vmem>>, vector<1x128x128xbf16>
    %143 = vector.shape_cast %142 : vector<1x128x128xbf16> to vector<128x128xbf16>
    %cst_79 = arith.constant dense<0.000000e+00> : vector<128x128xf32>
    %144 = tpu.matmul %141, %143, %cst_79 {dimension_numbers = #tpu.dot_dimension_numbers<[1], [0], [0], [1], [0, 0, 1, 1], [], []>} : vector<128x128xbf16>, vector<128x128xbf16>, vector<128x128xf32> -> vector<128x128xf32>
    %145 = arith.addf %139, %144 : vector<128x128xf32>
    %146 = vector.extract_strided_slice %22 {offsets = [0, 4, 0, 0], sizes = [2, 8, 16, 128], strides = [1, 1, 1, 1]} : vector<2x12x16x128xbf16> to vector<2x8x16x128xbf16>
    %147 = vector.extract_strided_slice %146 {offsets = [0, 0, 0, 0], sizes = [2, 8, 8, 128], strides = [1, 1, 1, 1]} : vector<2x8x16x128xbf16> to vector<2x8x8x128xbf16>
    %148 = vector.shape_cast %147 : vector<2x8x8x128xbf16> to vector<128x128xbf16>
    %c20 = arith.constant 20 : index
    %c0_80 = arith.constant 0 : index
    %c0_81 = arith.constant 0 : index
    %149 = vector.load %arg4[%c20, %c0_80, %c0_81] : memref<25x128x128xbf16, #tpu.memory_space<vmem>>, vector<1x128x128xbf16>
    %150 = vector.shape_cast %149 : vector<1x128x128xbf16> to vector<128x128xbf16>
    %cst_82 = arith.constant dense<0.000000e+00> : vector<128x128xf32>
    %151 = tpu.matmul %148, %150, %cst_82 {dimension_numbers = #tpu.dot_dimension_numbers<[1], [0], [0], [1], [0, 0, 1, 1], [], []>} : vector<128x128xbf16>, vector<128x128xbf16>, vector<128x128xf32> -> vector<128x128xf32>
    %152 = arith.addf %145, %151 : vector<128x128xf32>
    %153 = vector.extract_strided_slice %146 {offsets = [0, 0, 1, 0], sizes = [2, 8, 8, 128], strides = [1, 1, 1, 1]} : vector<2x8x16x128xbf16> to vector<2x8x8x128xbf16>
    %154 = vector.shape_cast %153 : vector<2x8x8x128xbf16> to vector<128x128xbf16>
    %c21 = arith.constant 21 : index
    %c0_83 = arith.constant 0 : index
    %c0_84 = arith.constant 0 : index
    %155 = vector.load %arg4[%c21, %c0_83, %c0_84] : memref<25x128x128xbf16, #tpu.memory_space<vmem>>, vector<1x128x128xbf16>
    %156 = vector.shape_cast %155 : vector<1x128x128xbf16> to vector<128x128xbf16>
    %cst_85 = arith.constant dense<0.000000e+00> : vector<128x128xf32>
    %157 = tpu.matmul %154, %156, %cst_85 {dimension_numbers = #tpu.dot_dimension_numbers<[1], [0], [0], [1], [0, 0, 1, 1], [], []>} : vector<128x128xbf16>, vector<128x128xbf16>, vector<128x128xf32> -> vector<128x128xf32>
    %158 = arith.addf %152, %157 : vector<128x128xf32>
    %159 = vector.extract_strided_slice %146 {offsets = [0, 0, 2, 0], sizes = [2, 8, 8, 128], strides = [1, 1, 1, 1]} : vector<2x8x16x128xbf16> to vector<2x8x8x128xbf16>
    %160 = vector.shape_cast %159 : vector<2x8x8x128xbf16> to vector<128x128xbf16>
    %c22 = arith.constant 22 : index
    %c0_86 = arith.constant 0 : index
    %c0_87 = arith.constant 0 : index
    %161 = vector.load %arg4[%c22, %c0_86, %c0_87] : memref<25x128x128xbf16, #tpu.memory_space<vmem>>, vector<1x128x128xbf16>
    %162 = vector.shape_cast %161 : vector<1x128x128xbf16> to vector<128x128xbf16>
    %cst_88 = arith.constant dense<0.000000e+00> : vector<128x128xf32>
    %163 = tpu.matmul %160, %162, %cst_88 {dimension_numbers = #tpu.dot_dimension_numbers<[1], [0], [0], [1], [0, 0, 1, 1], [], []>} : vector<128x128xbf16>, vector<128x128xbf16>, vector<128x128xf32> -> vector<128x128xf32>
    %164 = arith.addf %158, %163 : vector<128x128xf32>
    %165 = vector.extract_strided_slice %146 {offsets = [0, 0, 3, 0], sizes = [2, 8, 8, 128], strides = [1, 1, 1, 1]} : vector<2x8x16x128xbf16> to vector<2x8x8x128xbf16>
    %166 = vector.shape_cast %165 : vector<2x8x8x128xbf16> to vector<128x128xbf16>
    %c23 = arith.constant 23 : index
    %c0_89 = arith.constant 0 : index
    %c0_90 = arith.constant 0 : index
    %167 = vector.load %arg4[%c23, %c0_89, %c0_90] : memref<25x128x128xbf16, #tpu.memory_space<vmem>>, vector<1x128x128xbf16>
    %168 = vector.shape_cast %167 : vector<1x128x128xbf16> to vector<128x128xbf16>
    %cst_91 = arith.constant dense<0.000000e+00> : vector<128x128xf32>
    %169 = tpu.matmul %166, %168, %cst_91 {dimension_numbers = #tpu.dot_dimension_numbers<[1], [0], [0], [1], [0, 0, 1, 1], [], []>} : vector<128x128xbf16>, vector<128x128xbf16>, vector<128x128xf32> -> vector<128x128xf32>
    %170 = arith.addf %164, %169 : vector<128x128xf32>
    %171 = vector.extract_strided_slice %146 {offsets = [0, 0, 4, 0], sizes = [2, 8, 8, 128], strides = [1, 1, 1, 1]} : vector<2x8x16x128xbf16> to vector<2x8x8x128xbf16>
    %172 = vector.shape_cast %171 : vector<2x8x8x128xbf16> to vector<128x128xbf16>
    %c24 = arith.constant 24 : index
    %c0_92 = arith.constant 0 : index
    %c0_93 = arith.constant 0 : index
    %173 = vector.load %arg4[%c24, %c0_92, %c0_93] : memref<25x128x128xbf16, #tpu.memory_space<vmem>>, vector<1x128x128xbf16>
    %174 = vector.shape_cast %173 : vector<1x128x128xbf16> to vector<128x128xbf16>
    %cst_94 = arith.constant dense<0.000000e+00> : vector<128x128xf32>
    %175 = tpu.matmul %172, %174, %cst_94 {dimension_numbers = #tpu.dot_dimension_numbers<[1], [0], [0], [1], [0, 0, 1, 1], [], []>} : vector<128x128xbf16>, vector<128x128xbf16>, vector<128x128xf32> -> vector<128x128xf32>
    %176 = arith.addf %170, %175 : vector<128x128xf32>
    %c0_95 = arith.constant 0 : index
    %c0_96 = arith.constant 0 : index
    %177 = vector.load %arg5[%c0_95, %c0_96] : memref<1x128xf32, #tpu.memory_space<vmem>>, vector<1x128xf32>
    %178 = vector.broadcast %177 : vector<1x128xf32> to vector<128x128xf32>
    %179 = arith.addf %176, %178 : vector<128x128xf32>
    %180 = vector.shape_cast %179 : vector<128x128xf32> to vector<2x8x8x128xf32>
    %181 = vector.extract_strided_slice %180 {offsets = [0, 0, 0, 0], sizes = [2, 1, 1, 128], strides = [1, 1, 1, 1]} : vector<2x8x8x128xf32> to vector<2x1x1x128xf32>
    %182 = vector.shape_cast %181 : vector<2x1x1x128xf32> to vector<2x128xf32>
    %183 = vector.extract_strided_slice %180 {offsets = [0, 0, 1, 0], sizes = [2, 1, 1, 128], strides = [1, 1, 1, 1]} : vector<2x8x8x128xf32> to vector<2x1x1x128xf32>
    %184 = vector.shape_cast %183 : vector<2x1x1x128xf32> to vector<2x128xf32>
    %185 = arith.maximumf %182, %184 : vector<2x128xf32>
    %186 = vector.extract_strided_slice %180 {offsets = [0, 1, 0, 0], sizes = [2, 1, 1, 128], strides = [1, 1, 1, 1]} : vector<2x8x8x128xf32> to vector<2x1x1x128xf32>
    %187 = vector.shape_cast %186 : vector<2x1x1x128xf32> to vector<2x128xf32>
    %188 = arith.maximumf %185, %187 : vector<2x128xf32>
    %189 = vector.extract_strided_slice %180 {offsets = [0, 1, 1, 0], sizes = [2, 1, 1, 128], strides = [1, 1, 1, 1]} : vector<2x8x8x128xf32> to vector<2x1x1x128xf32>
    %190 = vector.shape_cast %189 : vector<2x1x1x128xf32> to vector<2x128xf32>
    %191 = arith.maximumf %188, %190 : vector<2x128xf32>
    %192 = vector.extract_strided_slice %180 {offsets = [0, 0, 2, 0], sizes = [2, 1, 1, 128], strides = [1, 1, 1, 1]} : vector<2x8x8x128xf32> to vector<2x1x1x128xf32>
    %193 = vector.shape_cast %192 : vector<2x1x1x128xf32> to vector<2x128xf32>
    %194 = vector.extract_strided_slice %180 {offsets = [0, 0, 3, 0], sizes = [2, 1, 1, 128], strides = [1, 1, 1, 1]} : vector<2x8x8x128xf32> to vector<2x1x1x128xf32>
    %195 = vector.shape_cast %194 : vector<2x1x1x128xf32> to vector<2x128xf32>
    %196 = arith.maximumf %193, %195 : vector<2x128xf32>
    %197 = vector.extract_strided_slice %180 {offsets = [0, 1, 2, 0], sizes = [2, 1, 1, 128], strides = [1, 1, 1, 1]} : vector<2x8x8x128xf32> to vector<2x1x1x128xf32>
    %198 = vector.shape_cast %197 : vector<2x1x1x128xf32> to vector<2x128xf32>
    %199 = arith.maximumf %196, %198 : vector<2x128xf32>
    %200 = vector.extract_strided_slice %180 {offsets = [0, 1, 3, 0], sizes = [2, 1, 1, 128], strides = [1, 1, 1, 1]} : vector<2x8x8x128xf32> to vector<2x1x1x128xf32>
    %201 = vector.shape_cast %200 : vector<2x1x1x128xf32> to vector<2x128xf32>
    %202 = arith.maximumf %199, %201 : vector<2x128xf32>
    %203 = vector.extract_strided_slice %180 {offsets = [0, 0, 4, 0], sizes = [2, 1, 1, 128], strides = [1, 1, 1, 1]} : vector<2x8x8x128xf32> to vector<2x1x1x128xf32>
    %204 = vector.shape_cast %203 : vector<2x1x1x128xf32> to vector<2x128xf32>
    %205 = vector.extract_strided_slice %180 {offsets = [0, 0, 5, 0], sizes = [2, 1, 1, 128], strides = [1, 1, 1, 1]} : vector<2x8x8x128xf32> to vector<2x1x1x128xf32>
    %206 = vector.shape_cast %205 : vector<2x1x1x128xf32> to vector<2x128xf32>
    %207 = arith.maximumf %204, %206 : vector<2x128xf32>
    %208 = vector.extract_strided_slice %180 {offsets = [0, 1, 4, 0], sizes = [2, 1, 1, 128], strides = [1, 1, 1, 1]} : vector<2x8x8x128xf32> to vector<2x1x1x128xf32>
    %209 = vector.shape_cast %208 : vector<2x1x1x128xf32> to vector<2x128xf32>
    %210 = arith.maximumf %207, %209 : vector<2x128xf32>
    %211 = vector.extract_strided_slice %180 {offsets = [0, 1, 5, 0], sizes = [2, 1, 1, 128], strides = [1, 1, 1, 1]} : vector<2x8x8x128xf32> to vector<2x1x1x128xf32>
    %212 = vector.shape_cast %211 : vector<2x1x1x128xf32> to vector<2x128xf32>
    %213 = arith.maximumf %210, %212 : vector<2x128xf32>
    %214 = vector.extract_strided_slice %180 {offsets = [0, 0, 6, 0], sizes = [2, 1, 1, 128], strides = [1, 1, 1, 1]} : vector<2x8x8x128xf32> to vector<2x1x1x128xf32>
    %215 = vector.shape_cast %214 : vector<2x1x1x128xf32> to vector<2x128xf32>
    %216 = vector.extract_strided_slice %180 {offsets = [0, 0, 7, 0], sizes = [2, 1, 1, 128], strides = [1, 1, 1, 1]} : vector<2x8x8x128xf32> to vector<2x1x1x128xf32>
    %217 = vector.shape_cast %216 : vector<2x1x1x128xf32> to vector<2x128xf32>
    %218 = arith.maximumf %215, %217 : vector<2x128xf32>
    %219 = vector.extract_strided_slice %180 {offsets = [0, 1, 6, 0], sizes = [2, 1, 1, 128], strides = [1, 1, 1, 1]} : vector<2x8x8x128xf32> to vector<2x1x1x128xf32>
    %220 = vector.shape_cast %219 : vector<2x1x1x128xf32> to vector<2x128xf32>
    %221 = arith.maximumf %218, %220 : vector<2x128xf32>
    %222 = vector.extract_strided_slice %180 {offsets = [0, 1, 7, 0], sizes = [2, 1, 1, 128], strides = [1, 1, 1, 1]} : vector<2x8x8x128xf32> to vector<2x1x1x128xf32>
    %223 = vector.shape_cast %222 : vector<2x1x1x128xf32> to vector<2x128xf32>
    %224 = arith.maximumf %221, %223 : vector<2x128xf32>
    %225 = vector.extract_strided_slice %180 {offsets = [0, 2, 0, 0], sizes = [2, 1, 1, 128], strides = [1, 1, 1, 1]} : vector<2x8x8x128xf32> to vector<2x1x1x128xf32>
    %226 = vector.shape_cast %225 : vector<2x1x1x128xf32> to vector<2x128xf32>
    %227 = vector.extract_strided_slice %180 {offsets = [0, 2, 1, 0], sizes = [2, 1, 1, 128], strides = [1, 1, 1, 1]} : vector<2x8x8x128xf32> to vector<2x1x1x128xf32>
    %228 = vector.shape_cast %227 : vector<2x1x1x128xf32> to vector<2x128xf32>
    %229 = arith.maximumf %226, %228 : vector<2x128xf32>
    %230 = vector.extract_strided_slice %180 {offsets = [0, 3, 0, 0], sizes = [2, 1, 1, 128], strides = [1, 1, 1, 1]} : vector<2x8x8x128xf32> to vector<2x1x1x128xf32>
    %231 = vector.shape_cast %230 : vector<2x1x1x128xf32> to vector<2x128xf32>
    %232 = arith.maximumf %229, %231 : vector<2x128xf32>
    %233 = vector.extract_strided_slice %180 {offsets = [0, 3, 1, 0], sizes = [2, 1, 1, 128], strides = [1, 1, 1, 1]} : vector<2x8x8x128xf32> to vector<2x1x1x128xf32>
    %234 = vector.shape_cast %233 : vector<2x1x1x128xf32> to vector<2x128xf32>
    %235 = arith.maximumf %232, %234 : vector<2x128xf32>
    %236 = vector.extract_strided_slice %180 {offsets = [0, 2, 2, 0], sizes = [2, 1, 1, 128], strides = [1, 1, 1, 1]} : vector<2x8x8x128xf32> to vector<2x1x1x128xf32>
    %237 = vector.shape_cast %236 : vector<2x1x1x128xf32> to vector<2x128xf32>
    %238 = vector.extract_strided_slice %180 {offsets = [0, 2, 3, 0], sizes = [2, 1, 1, 128], strides = [1, 1, 1, 1]} : vector<2x8x8x128xf32> to vector<2x1x1x128xf32>
    %239 = vector.shape_cast %238 : vector<2x1x1x128xf32> to vector<2x128xf32>
    %240 = arith.maximumf %237, %239 : vector<2x128xf32>
    %241 = vector.extract_strided_slice %180 {offsets = [0, 3, 2, 0], sizes = [2, 1, 1, 128], strides = [1, 1, 1, 1]} : vector<2x8x8x128xf32> to vector<2x1x1x128xf32>
    %242 = vector.shape_cast %241 : vector<2x1x1x128xf32> to vector<2x128xf32>
    %243 = arith.maximumf %240, %242 : vector<2x128xf32>
    %244 = vector.extract_strided_slice %180 {offsets = [0, 3, 3, 0], sizes = [2, 1, 1, 128], strides = [1, 1, 1, 1]} : vector<2x8x8x128xf32> to vector<2x1x1x128xf32>
    %245 = vector.shape_cast %244 : vector<2x1x1x128xf32> to vector<2x128xf32>
    %246 = arith.maximumf %243, %245 : vector<2x128xf32>
    %247 = vector.extract_strided_slice %180 {offsets = [0, 2, 4, 0], sizes = [2, 1, 1, 128], strides = [1, 1, 1, 1]} : vector<2x8x8x128xf32> to vector<2x1x1x128xf32>
    %248 = vector.shape_cast %247 : vector<2x1x1x128xf32> to vector<2x128xf32>
    %249 = vector.extract_strided_slice %180 {offsets = [0, 2, 5, 0], sizes = [2, 1, 1, 128], strides = [1, 1, 1, 1]} : vector<2x8x8x128xf32> to vector<2x1x1x128xf32>
    %250 = vector.shape_cast %249 : vector<2x1x1x128xf32> to vector<2x128xf32>
    %251 = arith.maximumf %248, %250 : vector<2x128xf32>
    %252 = vector.extract_strided_slice %180 {offsets = [0, 3, 4, 0], sizes = [2, 1, 1, 128], strides = [1, 1, 1, 1]} : vector<2x8x8x128xf32> to vector<2x1x1x128xf32>
    %253 = vector.shape_cast %252 : vector<2x1x1x128xf32> to vector<2x128xf32>
    %254 = arith.maximumf %251, %253 : vector<2x128xf32>
    %255 = vector.extract_strided_slice %180 {offsets = [0, 3, 5, 0], sizes = [2, 1, 1, 128], strides = [1, 1, 1, 1]} : vector<2x8x8x128xf32> to vector<2x1x1x128xf32>
    %256 = vector.shape_cast %255 : vector<2x1x1x128xf32> to vector<2x128xf32>
    %257 = arith.maximumf %254, %256 : vector<2x128xf32>
    %258 = vector.extract_strided_slice %180 {offsets = [0, 2, 6, 0], sizes = [2, 1, 1, 128], strides = [1, 1, 1, 1]} : vector<2x8x8x128xf32> to vector<2x1x1x128xf32>
    %259 = vector.shape_cast %258 : vector<2x1x1x128xf32> to vector<2x128xf32>
    %260 = vector.extract_strided_slice %180 {offsets = [0, 2, 7, 0], sizes = [2, 1, 1, 128], strides = [1, 1, 1, 1]} : vector<2x8x8x128xf32> to vector<2x1x1x128xf32>
    %261 = vector.shape_cast %260 : vector<2x1x1x128xf32> to vector<2x128xf32>
    %262 = arith.maximumf %259, %261 : vector<2x128xf32>
    %263 = vector.extract_strided_slice %180 {offsets = [0, 3, 6, 0], sizes = [2, 1, 1, 128], strides = [1, 1, 1, 1]} : vector<2x8x8x128xf32> to vector<2x1x1x128xf32>
    %264 = vector.shape_cast %263 : vector<2x1x1x128xf32> to vector<2x128xf32>
    %265 = arith.maximumf %262, %264 : vector<2x128xf32>
    %266 = vector.extract_strided_slice %180 {offsets = [0, 3, 7, 0], sizes = [2, 1, 1, 128], strides = [1, 1, 1, 1]} : vector<2x8x8x128xf32> to vector<2x1x1x128xf32>
    %267 = vector.shape_cast %266 : vector<2x1x1x128xf32> to vector<2x128xf32>
    %268 = arith.maximumf %265, %267 : vector<2x128xf32>
    %269 = vector.extract_strided_slice %180 {offsets = [0, 4, 0, 0], sizes = [2, 1, 1, 128], strides = [1, 1, 1, 1]} : vector<2x8x8x128xf32> to vector<2x1x1x128xf32>
    %270 = vector.shape_cast %269 : vector<2x1x1x128xf32> to vector<2x128xf32>
    %271 = vector.extract_strided_slice %180 {offsets = [0, 4, 1, 0], sizes = [2, 1, 1, 128], strides = [1, 1, 1, 1]} : vector<2x8x8x128xf32> to vector<2x1x1x128xf32>
    %272 = vector.shape_cast %271 : vector<2x1x1x128xf32> to vector<2x128xf32>
    %273 = arith.maximumf %270, %272 : vector<2x128xf32>
    %274 = vector.extract_strided_slice %180 {offsets = [0, 5, 0, 0], sizes = [2, 1, 1, 128], strides = [1, 1, 1, 1]} : vector<2x8x8x128xf32> to vector<2x1x1x128xf32>
    %275 = vector.shape_cast %274 : vector<2x1x1x128xf32> to vector<2x128xf32>
    %276 = arith.maximumf %273, %275 : vector<2x128xf32>
    %277 = vector.extract_strided_slice %180 {offsets = [0, 5, 1, 0], sizes = [2, 1, 1, 128], strides = [1, 1, 1, 1]} : vector<2x8x8x128xf32> to vector<2x1x1x128xf32>
    %278 = vector.shape_cast %277 : vector<2x1x1x128xf32> to vector<2x128xf32>
    %279 = arith.maximumf %276, %278 : vector<2x128xf32>
    %280 = vector.extract_strided_slice %180 {offsets = [0, 4, 2, 0], sizes = [2, 1, 1, 128], strides = [1, 1, 1, 1]} : vector<2x8x8x128xf32> to vector<2x1x1x128xf32>
    %281 = vector.shape_cast %280 : vector<2x1x1x128xf32> to vector<2x128xf32>
    %282 = vector.extract_strided_slice %180 {offsets = [0, 4, 3, 0], sizes = [2, 1, 1, 128], strides = [1, 1, 1, 1]} : vector<2x8x8x128xf32> to vector<2x1x1x128xf32>
    %283 = vector.shape_cast %282 : vector<2x1x1x128xf32> to vector<2x128xf32>
    %284 = arith.maximumf %281, %283 : vector<2x128xf32>
    %285 = vector.extract_strided_slice %180 {offsets = [0, 5, 2, 0], sizes = [2, 1, 1, 128], strides = [1, 1, 1, 1]} : vector<2x8x8x128xf32> to vector<2x1x1x128xf32>
    %286 = vector.shape_cast %285 : vector<2x1x1x128xf32> to vector<2x128xf32>
    %287 = arith.maximumf %284, %286 : vector<2x128xf32>
    %288 = vector.extract_strided_slice %180 {offsets = [0, 5, 3, 0], sizes = [2, 1, 1, 128], strides = [1, 1, 1, 1]} : vector<2x8x8x128xf32> to vector<2x1x1x128xf32>
    %289 = vector.shape_cast %288 : vector<2x1x1x128xf32> to vector<2x128xf32>
    %290 = arith.maximumf %287, %289 : vector<2x128xf32>
    %291 = vector.extract_strided_slice %180 {offsets = [0, 4, 4, 0], sizes = [2, 1, 1, 128], strides = [1, 1, 1, 1]} : vector<2x8x8x128xf32> to vector<2x1x1x128xf32>
    %292 = vector.shape_cast %291 : vector<2x1x1x128xf32> to vector<2x128xf32>
    %293 = vector.extract_strided_slice %180 {offsets = [0, 4, 5, 0], sizes = [2, 1, 1, 128], strides = [1, 1, 1, 1]} : vector<2x8x8x128xf32> to vector<2x1x1x128xf32>
    %294 = vector.shape_cast %293 : vector<2x1x1x128xf32> to vector<2x128xf32>
    %295 = arith.maximumf %292, %294 : vector<2x128xf32>
    %296 = vector.extract_strided_slice %180 {offsets = [0, 5, 4, 0], sizes = [2, 1, 1, 128], strides = [1, 1, 1, 1]} : vector<2x8x8x128xf32> to vector<2x1x1x128xf32>
    %297 = vector.shape_cast %296 : vector<2x1x1x128xf32> to vector<2x128xf32>
    %298 = arith.maximumf %295, %297 : vector<2x128xf32>
    %299 = vector.extract_strided_slice %180 {offsets = [0, 5, 5, 0], sizes = [2, 1, 1, 128], strides = [1, 1, 1, 1]} : vector<2x8x8x128xf32> to vector<2x1x1x128xf32>
    %300 = vector.shape_cast %299 : vector<2x1x1x128xf32> to vector<2x128xf32>
    %301 = arith.maximumf %298, %300 : vector<2x128xf32>
    %302 = vector.extract_strided_slice %180 {offsets = [0, 4, 6, 0], sizes = [2, 1, 1, 128], strides = [1, 1, 1, 1]} : vector<2x8x8x128xf32> to vector<2x1x1x128xf32>
    %303 = vector.shape_cast %302 : vector<2x1x1x128xf32> to vector<2x128xf32>
    %304 = vector.extract_strided_slice %180 {offsets = [0, 4, 7, 0], sizes = [2, 1, 1, 128], strides = [1, 1, 1, 1]} : vector<2x8x8x128xf32> to vector<2x1x1x128xf32>
    %305 = vector.shape_cast %304 : vector<2x1x1x128xf32> to vector<2x128xf32>
    %306 = arith.maximumf %303, %305 : vector<2x128xf32>
    %307 = vector.extract_strided_slice %180 {offsets = [0, 5, 6, 0], sizes = [2, 1, 1, 128], strides = [1, 1, 1, 1]} : vector<2x8x8x128xf32> to vector<2x1x1x128xf32>
    %308 = vector.shape_cast %307 : vector<2x1x1x128xf32> to vector<2x128xf32>
    %309 = arith.maximumf %306, %308 : vector<2x128xf32>
    %310 = vector.extract_strided_slice %180 {offsets = [0, 5, 7, 0], sizes = [2, 1, 1, 128], strides = [1, 1, 1, 1]} : vector<2x8x8x128xf32> to vector<2x1x1x128xf32>
    %311 = vector.shape_cast %310 : vector<2x1x1x128xf32> to vector<2x128xf32>
    %312 = arith.maximumf %309, %311 : vector<2x128xf32>
    %313 = vector.extract_strided_slice %180 {offsets = [0, 6, 0, 0], sizes = [2, 1, 1, 128], strides = [1, 1, 1, 1]} : vector<2x8x8x128xf32> to vector<2x1x1x128xf32>
    %314 = vector.shape_cast %313 : vector<2x1x1x128xf32> to vector<2x128xf32>
    %315 = vector.extract_strided_slice %180 {offsets = [0, 6, 1, 0], sizes = [2, 1, 1, 128], strides = [1, 1, 1, 1]} : vector<2x8x8x128xf32> to vector<2x1x1x128xf32>
    %316 = vector.shape_cast %315 : vector<2x1x1x128xf32> to vector<2x128xf32>
    %317 = arith.maximumf %314, %316 : vector<2x128xf32>
    %318 = vector.extract_strided_slice %180 {offsets = [0, 7, 0, 0], sizes = [2, 1, 1, 128], strides = [1, 1, 1, 1]} : vector<2x8x8x128xf32> to vector<2x1x1x128xf32>
    %319 = vector.shape_cast %318 : vector<2x1x1x128xf32> to vector<2x128xf32>
    %320 = arith.maximumf %317, %319 : vector<2x128xf32>
    %321 = vector.extract_strided_slice %180 {offsets = [0, 7, 1, 0], sizes = [2, 1, 1, 128], strides = [1, 1, 1, 1]} : vector<2x8x8x128xf32> to vector<2x1x1x128xf32>
    %322 = vector.shape_cast %321 : vector<2x1x1x128xf32> to vector<2x128xf32>
    %323 = arith.maximumf %320, %322 : vector<2x128xf32>
    %324 = vector.extract_strided_slice %180 {offsets = [0, 6, 2, 0], sizes = [2, 1, 1, 128], strides = [1, 1, 1, 1]} : vector<2x8x8x128xf32> to vector<2x1x1x128xf32>
    %325 = vector.shape_cast %324 : vector<2x1x1x128xf32> to vector<2x128xf32>
    %326 = vector.extract_strided_slice %180 {offsets = [0, 6, 3, 0], sizes = [2, 1, 1, 128], strides = [1, 1, 1, 1]} : vector<2x8x8x128xf32> to vector<2x1x1x128xf32>
    %327 = vector.shape_cast %326 : vector<2x1x1x128xf32> to vector<2x128xf32>
    %328 = arith.maximumf %325, %327 : vector<2x128xf32>
    %329 = vector.extract_strided_slice %180 {offsets = [0, 7, 2, 0], sizes = [2, 1, 1, 128], strides = [1, 1, 1, 1]} : vector<2x8x8x128xf32> to vector<2x1x1x128xf32>
    %330 = vector.shape_cast %329 : vector<2x1x1x128xf32> to vector<2x128xf32>
    %331 = arith.maximumf %328, %330 : vector<2x128xf32>
    %332 = vector.extract_strided_slice %180 {offsets = [0, 7, 3, 0], sizes = [2, 1, 1, 128], strides = [1, 1, 1, 1]} : vector<2x8x8x128xf32> to vector<2x1x1x128xf32>
    %333 = vector.shape_cast %332 : vector<2x1x1x128xf32> to vector<2x128xf32>
    %334 = arith.maximumf %331, %333 : vector<2x128xf32>
    %335 = vector.extract_strided_slice %180 {offsets = [0, 6, 4, 0], sizes = [2, 1, 1, 128], strides = [1, 1, 1, 1]} : vector<2x8x8x128xf32> to vector<2x1x1x128xf32>
    %336 = vector.shape_cast %335 : vector<2x1x1x128xf32> to vector<2x128xf32>
    %337 = vector.extract_strided_slice %180 {offsets = [0, 6, 5, 0], sizes = [2, 1, 1, 128], strides = [1, 1, 1, 1]} : vector<2x8x8x128xf32> to vector<2x1x1x128xf32>
    %338 = vector.shape_cast %337 : vector<2x1x1x128xf32> to vector<2x128xf32>
    %339 = arith.maximumf %336, %338 : vector<2x128xf32>
    %340 = vector.extract_strided_slice %180 {offsets = [0, 7, 4, 0], sizes = [2, 1, 1, 128], strides = [1, 1, 1, 1]} : vector<2x8x8x128xf32> to vector<2x1x1x128xf32>
    %341 = vector.shape_cast %340 : vector<2x1x1x128xf32> to vector<2x128xf32>
    %342 = arith.maximumf %339, %341 : vector<2x128xf32>
    %343 = vector.extract_strided_slice %180 {offsets = [0, 7, 5, 0], sizes = [2, 1, 1, 128], strides = [1, 1, 1, 1]} : vector<2x8x8x128xf32> to vector<2x1x1x128xf32>
    %344 = vector.shape_cast %343 : vector<2x1x1x128xf32> to vector<2x128xf32>
    %345 = arith.maximumf %342, %344 : vector<2x128xf32>
    %346 = vector.extract_strided_slice %180 {offsets = [0, 6, 6, 0], sizes = [2, 1, 1, 128], strides = [1, 1, 1, 1]} : vector<2x8x8x128xf32> to vector<2x1x1x128xf32>
    %347 = vector.shape_cast %346 : vector<2x1x1x128xf32> to vector<2x128xf32>
    %348 = vector.extract_strided_slice %180 {offsets = [0, 6, 7, 0], sizes = [2, 1, 1, 128], strides = [1, 1, 1, 1]} : vector<2x8x8x128xf32> to vector<2x1x1x128xf32>
    %349 = vector.shape_cast %348 : vector<2x1x1x128xf32> to vector<2x128xf32>
    %350 = arith.maximumf %347, %349 : vector<2x128xf32>
    %351 = vector.extract_strided_slice %180 {offsets = [0, 7, 6, 0], sizes = [2, 1, 1, 128], strides = [1, 1, 1, 1]} : vector<2x8x8x128xf32> to vector<2x1x1x128xf32>
    %352 = vector.shape_cast %351 : vector<2x1x1x128xf32> to vector<2x128xf32>
    %353 = arith.maximumf %350, %352 : vector<2x128xf32>
    %354 = vector.extract_strided_slice %180 {offsets = [0, 7, 7, 0], sizes = [2, 1, 1, 128], strides = [1, 1, 1, 1]} : vector<2x8x8x128xf32> to vector<2x1x1x128xf32>
    %355 = vector.shape_cast %354 : vector<2x1x1x128xf32> to vector<2x128xf32>
    %356 = arith.maximumf %353, %355 : vector<2x128xf32>
    %357 = tpu.concatenate %191, %202, %213, %224, %235, %246, %257, %268, %279, %290, %301, %312, %323, %334, %345, %356 in 1 : vector<2x128xf32>, vector<2x128xf32>, vector<2x128xf32>, vector<2x128xf32>, vector<2x128xf32>, vector<2x128xf32>, vector<2x128xf32>, vector<2x128xf32>, vector<2x128xf32>, vector<2x128xf32>, vector<2x128xf32>, vector<2x128xf32>, vector<2x128xf32>, vector<2x128xf32>, vector<2x128xf32>, vector<2x128xf32> -> vector<2x2048xf32>
    %cst_97 = arith.constant 0.000000e+00 : f32
    %358 = vector.broadcast %cst_97 : f32 to vector<2x2048xf32>
    %359 = arith.maximumf %357, %358 : vector<2x2048xf32>
    %360 = arith.truncf %359 : vector<2x2048xf32> to vector<2x2048xbf16>
    %c0_98 = arith.constant 0 : index
    %c0_99 = arith.constant 0 : index
    %361 = vector.load %arg6[%c0_98, %c0_99] : memref<2048x128xbf16, #tpu.memory_space<vmem>>, vector<2048x128xbf16>
    %cst_100 = arith.constant dense<0.000000e+00> : vector<2x128xf32>
    %362 = tpu.matmul %360, %361, %cst_100 {dimension_numbers = #tpu.dot_dimension_numbers<[1], [0], [0], [1], [0, 0, 1, 1], [], []>} : vector<2x2048xbf16>, vector<2048x128xbf16>, vector<2x128xf32> -> vector<2x128xf32>
    %c0_101 = arith.constant 0 : index
    %c0_102 = arith.constant 0 : index
    %363 = vector.load %arg7[%c0_101, %c0_102] : memref<1x128xf32, #tpu.memory_space<vmem>>, vector<1x128xf32>
    %364 = vector.broadcast %363 : vector<1x128xf32> to vector<2x128xf32>
    %365 = arith.addf %362, %364 : vector<2x128xf32>
    %cst_103 = arith.constant 0.000000e+00 : f32
    %366 = vector.broadcast %cst_103 : f32 to vector<2x128xf32>
    %367 = arith.maximumf %365, %366 : vector<2x128xf32>
    %368 = arith.truncf %367 : vector<2x128xf32> to vector<2x128xbf16>
    %c0_104 = arith.constant 0 : index
    %c0_105 = arith.constant 0 : index
    %369 = vector.load %arg8[%c0_104, %c0_105] : memref<128x128xbf16, #tpu.memory_space<vmem>>, vector<128x128xbf16>
    %cst_106 = arith.constant dense<0.000000e+00> : vector<2x128xf32>
    %370 = tpu.matmul %368, %369, %cst_106 {dimension_numbers = #tpu.dot_dimension_numbers<[1], [0], [0], [1], [0, 0, 1, 1], [], []>} : vector<2x128xbf16>, vector<128x128xbf16>, vector<2x128xf32> -> vector<2x128xf32>
    %c0_107 = arith.constant 0 : index
    %c0_108 = arith.constant 0 : index
    %371 = vector.load %arg9[%c0_107, %c0_108] : memref<1x128xf32, #tpu.memory_space<vmem>>, vector<1x128xf32>
    %372 = vector.broadcast %371 : vector<1x128xf32> to vector<2x128xf32>
    %373 = arith.addf %370, %372 : vector<2x128xf32>
    %c0_109 = arith.constant 0 : index
    %c0_110 = arith.constant 0 : index
    %374 = vector.load %arg10[%c0_109, %c0_110] : memref<2x128xf32, #tpu.memory_space<vmem>>, vector<2x128xf32>
    tpu.vector_store %arg10[%c0_109, %c0_110], %373 {strides = array<i32>} : memref<2x128xf32, #tpu.memory_space<vmem>>, vector<2x128xf32>,
    return
  }
  func.func @transform_0(%arg0: i32) -> (i32, i32, i32) {
    %c0_i32 = arith.constant 0 : i32
    %c0_i32_0 = arith.constant 0 : i32
    %c0_i32_1 = arith.constant 0 : i32
    return %c0_i32, %arg0, %c0_i32_0 : i32, i32, i32
  }
  func.func @transform_1(%arg0: i32) -> (i32, i32) {
    %c0_i32 = arith.constant 0 : i32
    %c0_i32_0 = arith.constant 0 : i32
    %c0_i32_1 = arith.constant 0 : i32
    return %c0_i32, %c0_i32_0 : i32, i32
  }
  func.func @transform_2(%arg0: i32) -> (i32, i32) {
    %c0_i32 = arith.constant 0 : i32
    %c0_i32_0 = arith.constant 0 : i32
    %c0_i32_1 = arith.constant 0 : i32
    return %c0_i32, %c0_i32_0 : i32, i32
  }
  func.func @transform_3(%arg0: i32) -> (i32, i32, i32) {
    %c0_i32 = arith.constant 0 : i32
    %c0_i32_0 = arith.constant 0 : i32
    %c0_i32_1 = arith.constant 0 : i32
    %c0_i32_2 = arith.constant 0 : i32
    return %c0_i32, %c0_i32_0, %c0_i32_1 : i32, i32, i32
  }
  func.func @transform_4(%arg0: i32) -> (i32, i32) {
    %c0_i32 = arith.constant 0 : i32
    %c0_i32_0 = arith.constant 0 : i32
    %c0_i32_1 = arith.constant 0 : i32
    return %c0_i32, %c0_i32_0 : i32, i32
  }
  func.func @transform_5(%arg0: i32) -> (i32, i32) {
    %c0_i32 = arith.constant 0 : i32
    %c0_i32_0 = arith.constant 0 : i32
    %c0_i32_1 = arith.constant 0 : i32
    return %c0_i32, %c0_i32_0 : i32, i32
  }
  func.func @transform_6(%arg0: i32) -> (i32, i32) {
    %c0_i32 = arith.constant 0 : i32
    %c0_i32_0 = arith.constant 0 : i32
    %c0_i32_1 = arith.constant 0 : i32
    return %c0_i32, %c0_i32_0 : i32, i32
  }
  func.func @transform_7(%arg0: i32) -> (i32, i32) {
    %c0_i32 = arith.constant 0 : i32
    %c0_i32_0 = arith.constant 0 : i32
    %c0_i32_1 = arith.constant 0 : i32
    return %c0_i32, %c0_i32_0 : i32, i32
  }
  func.func @transform_8(%arg0: i32) -> (i32, i32) {
    %c0_i32 = arith.constant 0 : i32
    %c0_i32_0 = arith.constant 0 : i32
    %c0_i32_1 = arith.constant 0 : i32
    return %c0_i32, %c0_i32_0 : i32, i32
  }
  func.func @transform_9(%arg0: i32) -> (i32, i32) {
    %c0_i32 = arith.constant 0 : i32
    %c0_i32_0 = arith.constant 0 : i32
    return %arg0, %c0_i32 : i32, i32
  }
}

</mosaic_0001>

<bundles_post_ra>
// kernel: discriminator_forward.1
= control target key start
LH: loop header
LB: loop body
LE: loop exit
PB: predicated region body
PF: predicated region fallthrough
CT: control target
= control target key end

     0   :  { %vm217_vm0 = vcmask 261120   ;;  %vm2280_vm1 = vsmask.f32 3328  ;;  %vm2281_vm2 = vsmask.f32 7440  ;;  %vm3512_vm7 = vcmask 1041408   ;;  %s17230_s1 = inlined_call_operand.vmem [shape: bf16[32,128], index: 1, kind: input, shape index: {}]   ;;  %s17231_s0 = inlined_call_operand.vmem [shape: bf16[4,384,32], index: 0, kind: input, shape index: {}]   ;;  %s17232_s3 = inlined_call_operand.vmem [shape: bf16[25,128,128], index: 3, kind: input, shape index: {}]   ;;  %s17233_s2 = inlined_call_operand.vmem [shape: f32[1,128], index: 2, kind: input, shape index: {}]   ;;  %s17234_s5 = inlined_call_operand.vmem [shape: bf16[2048,128], index: 5, kind: input, shape index: {}]   ;;  %s17235_s4 = inlined_call_operand.vmem [shape: f32[1,128], index: 4, kind: input, shape index: {}]   ;;  %s17236_s6 = inlined_call_operand.vmem [shape: f32[1,128], index: 6, kind: input, shape index: {}]   ;;  %s17237_s7 = inlined_call_operand.vmem [shape: bf16[128,128], index: 7, kind: input, shape index: {}]   ;;  %s17238_s8 = inlined_call_operand.vmem [shape: f32[1,128], index: 8, kind: input, shape index: {}]   ;;  %s17239_s9 = inlined_call_operand.vmem [shape: f32[2,128], index: 9, kind: output, shape index: {}]  }
   0x1   :  { %v13413_v0 = vld [vmem:[%s17230_s1] sm:$0xff]   ;;  %v13418_v1 = vld [vmem:[%s17230_s1 + $0x8] sm:$0xff]   ;;  %v12927_v4 = vld [vmem:[%s17231_s0 + $0x10] sm:$0xff]   ;;  %vm3139_vm4 = vsmask.f32 2304  ;;  %vm3513_vm8 = vcmask 1045508  }
   0x2   :  { %11509 = vmatprep.subr.bf16.mxu1 %v13413_v0  ;;  %v12925_v2 = vld [vmem:[%s17231_s0] sm:$0xff]   ;;  %v12926_v3 = vld [vmem:[%s17231_s0 + $0x8] sm:$0xff]   ;;  %v12928_v5 = vld [vmem:[%s17231_s0 + $0x18] sm:$0xff]   ;;  %vm3140_vm5 = vsmask.f32 6416  ;;  %vm2862_vm10 = vcmask 1042432  }
   0x3   :  { %11510 = vmatpush3.bf16.msra.mxu1 %v13413_v0  ;;  %11513 = vmatprep.mubr.msk.bf16.mxu1 %vm217_vm0, %v12925_v2  ;;  %v12929_v6 = vld [vmem:[%s17231_s0 + $0x20] sm:$0xff]   ;;  %v12930_v7 = vld [vmem:[%s17231_s0 + $0x28] sm:$0xff]   ;;  %v12931_v8 = vld [vmem:[%s17231_s0 + $0x30] sm:$0xff]   ;;  %vm2863_vm11 = vcmask 1046532   ;;  %vm7915_vm13 = vcmask 1041409   ;;  %vm13359_vm14 = vmmov 0  }
   0x4   :  { %11511 = vmatprep.subr.bf16.mxu1 %v13418_v1  ;;  %v12932_v9 = vld [vmem:[%s17231_s0 + $0x38] sm:$0xff]   ;;  %v12933_v10 = vld [vmem:[%s17231_s0 + $0x40] sm:$0xff]   ;;  %v12934_v11 = vld [vmem:[%s17231_s0 + $0x48] sm:$0xff]  }
   0x5   :  { %v12935_v12 = vld [vmem:[%s17231_s0 + $0x50] sm:$0xff]   ;;  %v12936_v13 = vld [vmem:[%s17231_s0 + $0x58] sm:$0xff]   ;;  %v12937_v14 = vld [vmem:[%s17231_s0 + $0x60] sm:$0xff]  }
   0x6   :  { %v12938_v15 = vld [vmem:[%s17231_s0 + $0x68] sm:$0xff]   ;;  %v12939_v16 = vld [vmem:[%s17231_s0 + $0x70] sm:$0xff]   ;;  %v12940_v17 = vld [vmem:[%s17231_s0 + $0x78] sm:$0xff]  }
   0x7   :  { %11512 = vmatpush3.bf16.msra.mxu1 %v13418_v1  ;;  %v12941_v18 = vld [vmem:[%s17231_s0 + $0x80] sm:$0xff]   ;;  %v12942_v19 = vld [vmem:[%s17231_s0 + $0x88] sm:$0xff]   ;;  %v12943_v20 = vld [vmem:[%s17231_s0 + $0x90] sm:$0xff]  }
   0x8   :  { %11561 = vmatprep.subr.bf16.mxu1 %v13413_v0  ;;  %v12944_v21 = vld [vmem:[%s17231_s0 + $0x98] sm:$0xff]   ;;  %v12945_v22 = vld [vmem:[%s17231_s0 + $0xa0] sm:$0xff]   ;;  %v12946_v23 = vld [vmem:[%s17231_s0 + $0xa8] sm:$0xff]  }
   0x9   :  { %v12947_v24 = vld [vmem:[%s17231_s0 + $0xb0] sm:$0xff]   ;;  %v12948_v25 = vld [vmem:[%s17231_s0 + $0xb8] sm:$0xff]   ;;  %v12949_v26 = vld [vmem:[%s17231_s0 + $0xc0] sm:$0xff]  }
   0xa   :  { %11514 = vmatmul.mubr.msk.bf16.vlgmr.msra.gmra.mrb[0].mxu1 %vm217_vm0, %v12926_v3  ;;  %v12950_v27 = vld [vmem:[%s17231_s0 + $0xc8] sm:$0xff]   ;;  %v12951_v28 = vld [vmem:[%s17231_s0 + $0xd0] sm:$0xff]   ;;  %v12952_v29 = vld [vmem:[%s17231_s0 + $0xd8] sm:$0xff]  }
   0xb   :  { %11562 = vmatpush3.bf16.msra.mxu1 %v13413_v0  ;;  %11517 = vmatprep.mubr.msk.bf16.mxu1 %vm217_vm0, %v12927_v4  ;;  %v12953_v30 = vld [vmem:[%s17231_s0 + $0xe0] sm:$0xff]   ;;  %v12954_v31 = vld [vmem:[%s17231_s0 + $0xe8] sm:$0xff]   ;;  %v12955_v32 = vld [vmem:[%s17231_s0 + $0xf0] sm:$0xff]  }
   0xc   :  { %11563 = vmatprep.subr.bf16.mxu1 %v13418_v1  ;;  %v12956_v33 = vld [vmem:[%s17231_s0 + $0xf8] sm:$0xff]   ;;  %v12957_v34 = vld [vmem:[%s17231_s0 + $0x100] sm:$0xff]   ;;  %v12958_v35 = vld [vmem:[%s17231_s0 + $0x108] sm:$0xff]  }
   0xd   :  { %v12959_v36 = vld [vmem:[%s17231_s0 + $0x110] sm:$0xff]   ;;  %v12960_v37 = vld [vmem:[%s17231_s0 + $0x118] sm:$0xff]   ;;  %v12961_v38 = vld [vmem:[%s17231_s0 + $0x120] sm:$0xff]  }
   0xe   :  { %v12962_v39 = vld [vmem:[%s17231_s0 + $0x128] sm:$0xff]   ;;  %v12963_v40 = vld [vmem:[%s17231_s0 + $0x130] sm:$0xff]   ;;  %v12964_v41 = vld [vmem:[%s17231_s0 + $0x138] sm:$0xff]  }
   0xf   :  { %11564 = vmatpush3.bf16.msra.mxu1 %v13418_v1  ;;  %v12965_v42 = vld [vmem:[%s17231_s0 + $0x140] sm:$0xff]   ;;  %v12966_v43 = vld [vmem:[%s17231_s0 + $0x148] sm:$0xff]   ;;  %v12967_v44 = vld [vmem:[%s17231_s0 + $0x150] sm:$0xff]  }
  0x10   :  { %11613 = vmatprep.subr.bf16.mxu1 %v13413_v0  ;;  %v12968_v45 = vld [vmem:[%s17231_s0 + $0x158] sm:$0xff]   ;;  %v12969_v46 = vld [vmem:[%s17231_s0 + $0x160] sm:$0xff]   ;;  %v12970_v47 = vld [vmem:[%s17231_s0 + $0x168] sm:$0xff]  }
  0x11   :  { %v12971_v48 = vld [vmem:[%s17231_s0 + $0x170] sm:$0xff]   ;;  %v12972_v49 = vld [vmem:[%s17231_s0 + $0x178] sm:$0xff]   ;;  %v12973_v50 = vld [vmem:[%s17231_s0 + $0x180] sm:$0xff]  }
  0x12   :  { %11518 = vmatmul.mubr.msk.bf16.gmra.mrb[4].mxu1 %vm217_vm0, %v12928_v5  ;;  %v12974_v51 = vld [vmem:[%s17231_s0 + $0x188] sm:$0xff]   ;;  %v12975_v52 = vld [vmem:[%s17231_s0 + $0x190] sm:$0xff]   ;;  %v12976_v53 = vld [vmem:[%s17231_s0 + $0x198] sm:$0xff]  }
  0x13   :  { %11521 = vmatprep.mubr.msk.bf16.mxu1 %vm217_vm0, %v12929_v6  ;;  %v12977_v54 = vld [vmem:[%s17231_s0 + $0x1a0] sm:$0xff]   ;;  %v12978_v55 = vld [vmem:[%s17231_s0 + $0x1a8] sm:$0xff]   ;;  %v12979_v56 = vld [vmem:[%s17231_s0 + $0x1b0] sm:$0xff]  }
  0x14   :  { %v12980_v59 = vld [vmem:[%s17231_s0 + $0x1b8] sm:$0xff]   ;;  %v12981_v61 = vld [vmem:[%s17231_s0 + $0x1c0] sm:$0xff]   ;;  %v12983_v3 = vld [vmem:[%s17231_s0 + $0x1d0] sm:$0xff]  }
  0x15   :  { %vm14469_vm3 = vmor %vm2280_vm1, %vm2281_vm2 }
  0x16   :  { %vm14522_vm6 = vmor %vm3139_vm4, %vm3140_vm5 }
  0x17   :  { %vm15075_vm9 = vmor %vm3512_vm7, %vm3513_vm8 }
  0x18   :  { %vm15242_vm12 = vmor %vm2862_vm10, %vm2863_vm11 }
  0x1a   :  { %11522 = vmatmul.mubr.msk.bf16.gmra.mrb[8].mxu1 %vm217_vm0, %v12930_v7  ;;  %v12984_v7 = vld [vmem:[%s17231_s0 + $0x1d8] sm:$0xff]  }
  0x1b   :  { %11525 = vmatprep.mubr.msk.bf16.mxu1 %vm217_vm0, %v12931_v8 }
  0x22   :  { %11526 = vmatmul.mubr.msk.bf16.gmra.mrb[12].mxu1 %vm217_vm0, %v12932_v9  ;;  %v12985_v9 = vld [vmem:[%s17231_s0 + $0x1e0] sm:$0xff]  }
  0x23   :  { %11529 = vmatprep.mubr.msk.bf16.mxu1 %vm217_vm0, %v12933_v10 }
  0x2a   :  { %11530 = vmatmul.mubr.msk.bf16.gmra.mrb[16].mxu1 %vm217_vm0, %v12934_v11 }
  0x2b   :  { %11533 = vmatprep.mubr.msk.bf16.mxu1 %vm217_vm0, %v12935_v12 }
  0x32   :  { %11534 = vmatmul.mubr.msk.bf16.gmra.mrb[20].mxu1 %vm217_vm0, %v12936_v13  ;;  %v12986_v13 = vld [vmem:[%s17231_s0 + $0x1e8] sm:$0xff]  }
  0x33   :  { %11537 = vmatprep.mubr.msk.bf16.mxu1 %vm217_vm0, %v12937_v14 }
  0x3a   :  { %11538 = vmatmul.mubr.msk.bf16.gmra.mrb[24].mxu1 %vm217_vm0, %v12938_v15  ;;  %v12987_v15 = vld [vmem:[%s17231_s0 + $0x1f0] sm:$0xff]  }
  0x3b   :  { %11541 = vmatprep.mubr.msk.bf16.mxu1 %vm217_vm0, %v12939_v16 }
  0x42   :  { %11542 = vmatmul.mubr.msk.bf16.gmra.mrb[28].mxu1 %vm217_vm0, %v12940_v17 }
  0x43   :  { %11545 = vmatprep.mubr.msk.bf16.mxu1 %vm217_vm0, %v12941_v18 }
  0x4a   :  { %11546 = vmatmul.mubr.msk.bf16.gmra.mrb[32].mxu1 %vm217_vm0, %v12942_v19  ;;  %v12988_v19 = vld [vmem:[%s17231_s0 + $0x1f8] sm:$0xff]  }
  0x4b   :  { %11549 = vmatprep.mubr.msk.bf16.mxu1 %vm217_vm0, %v12943_v20 }
  0x52   :  { %11550 = vmatmul.mubr.msk.bf16.gmra.mrb[36].mxu1 %vm217_vm0, %v12944_v21  ;;  %v12989_v21 = vld [vmem:[%s17231_s0 + $0x200] sm:$0xff]  }
  0x53   :  { %11553 = vmatprep.mubr.msk.bf16.mxu1 %vm217_vm0, %v12945_v22 }
  0x5a   :  { %11554 = vmatmul.mubr.msk.bf16.gmra.mrb[40].mxu1 %vm217_vm0, %v12946_v23 }
  0x5b   :  { %11557 = vmatprep.mubr.msk.bf16.mxu1 %vm217_vm0, %v12947_v24 }
  0x62   :  { %11558 = vmatmul.mubr.msk.bf16.gmra.mrb[44].mxu1 %vm217_vm0, %v12948_v25  ;;  %v12990_v25 = vld [vmem:[%s17231_s0 + $0x208] sm:$0xff]  }
  0x63   :  { %11565 = vmatprep.mubr.msk.bf16.mxu1 %vm217_vm0, %v12949_v26 }
  0x6a   :  { %11566 = vmatmul.mubr.msk.bf16.vlgmr.msra.gmra.mrb[48].mxu1 %vm217_vm0, %v12950_v27  ;;  %v12991_v27 = vld [vmem:[%s17231_s0 + $0x210] sm:$0xff]  }
  0x6b   :  { %11614 = vmatpush3.bf16.msra.mxu1 %v13413_v0  ;;  %11569 = vmatprep.mubr.msk.bf16.mxu1 %vm217_vm0, %v12951_v28 }
  0x6c   :  { %11615 = vmatprep.subr.bf16.mxu1 %v13418_v1 }
  0x6f   :  { %11616 = vmatpush3.bf16.msra.mxu1 %v13418_v1 }
  0x70   :  { %11665 = vmatprep.subr.bf16.mxu1 %v13413_v0 }
  0x72   :  { %11570 = vmatmul.mubr.msk.bf16.gmra.mrb[52].mxu1 %vm217_vm0, %v12952_v29 }
  0x73   :  { %11573 = vmatprep.mubr.msk.bf16.mxu1 %vm217_vm0, %v12953_v30 }
  0x7a   :  { %11574 = vmatmul.mubr.msk.bf16.gmra.mrb[56].mxu1 %vm217_vm0, %v12954_v31  ;;  %v12992_v31 = vld [vmem:[%s17231_s0 + $0x218] sm:$0xff]  }
  0x7b   :  { %11577 = vmatprep.mubr.msk.bf16.mxu1 %vm217_vm0, %v12955_v32 }
  0x82   :  { %11578 = vmatmul.mubr.msk.bf16.gmra.mrb[60].mxu1 %vm217_vm0, %v12956_v33  ;;  %v12993_v33 = vld [vmem:[%s17231_s0 + $0x220] sm:$0xff]  }
  0x83   :  { %11581 = vmatprep.mubr.msk.bf16.mxu1 %vm217_vm0, %v12957_v34 }
  0x8a   :  { %11582 = vmatmul.mubr.msk.bf16.gmra.mrb[64].mxu1 %vm217_vm0, %v12958_v35 }
  0x8b   :  { %11585 = vmatprep.mubr.msk.bf16.mxu1 %vm217_vm0, %v12959_v36 }
  0x92   :  { %11586 = vmatmul.mubr.msk.bf16.gmra.mrb[68].mxu1 %vm217_vm0, %v12960_v37  ;;  %v12994_v37 = vld [vmem:[%s17231_s0 + $0x228] sm:$0xff]  }
  0x93   :  { %11589 = vmatprep.mubr.msk.bf16.mxu1 %vm217_vm0, %v12961_v38 }
  0x9a   :  { %11590 = vmatmul.mubr.msk.bf16.gmra.mrb[72].mxu1 %vm217_vm0, %v12962_v39  ;;  %v12995_v39 = vld [vmem:[%s17231_s0 + $0x230] sm:$0xff]  }
  0x9b   :  { %11593 = vmatprep.mubr.msk.bf16.mxu1 %vm217_vm0, %v12963_v40 }
  0xa2   :  { %11594 = vmatmul.mubr.msk.bf16.gmra.mrb[76].mxu1 %vm217_vm0, %v12964_v41 }
  0xa3   :  { %11597 = vmatprep.mubr.msk.bf16.mxu1 %vm217_vm0, %v12965_v42 }
  0xaa   :  { %11598 = vmatmul.mubr.msk.bf16.gmra.mrb[80].mxu1 %vm217_vm0, %v12966_v43  ;;  %v12996_v43 = vld [vmem:[%s17231_s0 + $0x238] sm:$0xff]  }
  0xab   :  { %11601 = vmatprep.mubr.msk.bf16.mxu1 %vm217_vm0, %v12967_v44 }
  0xb2   :  { %11602 = vmatmul.mubr.msk.bf16.gmra.mrb[84].mxu1 %vm217_vm0, %v12968_v45  ;;  %v12997_v45 = vld [vmem:[%s17231_s0 + $0x240] sm:$0xff]  }
  0xb3   :  { %11605 = vmatprep.mubr.msk.bf16.mxu1 %vm217_vm0, %v12969_v46 }
  0xba   :  { %11606 = vmatmul.mubr.msk.bf16.gmra.mrb[88].mxu1 %vm217_vm0, %v12970_v47 }
  0xbb   :  { %11609 = vmatprep.mubr.msk.bf16.mxu1 %vm217_vm0, %v12971_v48 }
  0xc2   :  { %11610 = vmatmul.mubr.msk.bf16.gmra.mrb[92].mxu1 %vm217_vm0, %v12972_v49  ;;  %v12998_v49 = vld [vmem:[%s17231_s0 + $0x248] sm:$0xff]  }
  0xc3   :  { %11617 = vmatprep.mubr.msk.bf16.mxu1 %vm217_vm0, %v12973_v50 }
  0xca   :  { %11618 = vmatmul.mubr.msk.bf16.vlgmr.msra.gmra.mrb[96].mxu1 %vm217_vm0, %v12974_v51  ;;  %v12999_v51 = vld [vmem:[%s17231_s0 + $0x250] sm:$0xff]  }
  0xcb   :  { %11666 = vmatpush3.bf16.msra.mxu1 %v13413_v0  ;;  %11621 = vmatprep.mubr.msk.bf16.mxu1 %vm217_vm0, %v12975_v52 }
  0xcc   :  { %11667 = vmatprep.subr.bf16.mxu1 %v13418_v1 }
  0xcf   :  { %11668 = vmatpush3.bf16.msra.mxu1 %v13418_v1  ;;  %v12982_v1 = vld [vmem:[%s17231_s0 + $0x1c8] sm:$0xff]  }
  0xd2   :  { %11622 = vmatmul.mubr.msk.bf16.gmra.mrb[100].mxu1 %vm217_vm0, %v12976_v53 }
  0xd3   :  { %11625 = vmatprep.mubr.msk.bf16.mxu1 %vm217_vm0, %v12977_v54 }
  0xda   :  { %11626 = vmatmul.mubr.msk.bf16.gmra.mrb[104].mxu1 %vm217_vm0, %v12978_v55  ;;  %v13000_v55 = vld [vmem:[%s17231_s0 + $0x258] sm:$0xff]  }
  0xdb   :  { %11629 = vmatprep.mubr.msk.bf16.mxu1 %vm217_vm0, %v12979_v56 }
  0xdd   :  { %v13656_v57 = vpop.f32.mrb[0].mxu1 }
  0xde   :  { %v13658_v58 = vpop.f32.mrb[1].mxu1 }
  0xdf   :  { %v13663_v60 = vpop.f32.mrb[2].mxu1 }
  0xe0   :  { %v13668_v62 = vpop.f32.mrb[3].mxu1 }
  0xe2   :  { %11630 = vmatmul.mubr.msk.bf16.gmra.mrb[108].mxu1 %vm217_vm0, %v12980_v59  ;;  %v13001_v59 = vld [vmem:[%s17231_s0 + $0x260] sm:$0xff]  }
  0xe3   :  { %11633 = vmatprep.mubr.msk.bf16.mxu1 %vm217_vm0, %v12981_v61 }
  0xe5   :  { %v13672_v63 = vpop.f32.mrb[4].mxu1 }
  0xe6   :  { %v13674_v0 = vpop.f32.mrb[5].mxu1 }
  0xe7   :  { %v13679_v2 = vpop.f32.mrb[6].mxu1 }
  0xe8   :  { %v13684_v4 = vpop.f32.mrb[7].mxu1 }
  0xea   :  { %11634 = vmatmul.mubr.msk.bf16.gmra.mrb[112].mxu1 %vm217_vm0, %v12982_v1 }
  0xeb   :  { %11637 = vmatprep.mubr.msk.bf16.mxu1 %vm217_vm0, %v12983_v3 }
  0xed   :  { %v13688_v5 = vpop.f32.mrb[8].mxu1 }
  0xee   :  { %v13690_v6 = vpop.f32.mrb[9].mxu1 }
  0xef   :  { %v13695_v8 = vpop.f32.mrb[10].mxu1 }
  0xf0   :  { %17520 = vst [vmem:[#allocation2_spill] sm:$0xff] %v13695_v8  ;;  %v13700_v10 = vpop.f32.mrb[11].mxu1 }
  0xf2   :  { %11638 = vmatmul.mubr.msk.bf16.gmra.mrb[116].mxu1 %vm217_vm0, %v12984_v7  ;;  %v13002_v7 = vld [vmem:[%s17231_s0 + $0x268] sm:$0xff]  }
  0xf3   :  { %11641 = vmatprep.mubr.msk.bf16.mxu1 %vm217_vm0, %v12985_v9 }
  0xf5   :  { %v13704_v11 = vpop.f32.mrb[12].mxu1 }
  0xf6   :  { %v13706_v12 = vpop.f32.mrb[13].mxu1 }
  0xf7   :  { %v13711_v14 = vpop.f32.mrb[14].mxu1 }
  0xf8   :  { %17521 = vst [vmem:[#allocation3_spill] sm:$0xff] %v13711_v14  ;;  %v13716_v16 = vpop.f32.mrb[15].mxu1 }
  0xfa   :  { %11642 = vmatmul.mubr.msk.bf16.gmra.mrb[120].mxu1 %vm217_vm0, %v12986_v13  ;;  %v13003_v13 = vld [vmem:[%s17231_s0 + $0x270] sm:$0xff]  }
  0xfb   :  { %11645 = vmatprep.mubr.msk.bf16.mxu1 %vm217_vm0, %v12987_v15 }
  0xfd   :  { %v13720_v17 = vpop.f32.mrb[16].mxu1 }
  0xfe   :  { %v13722_v18 = vpop.f32.mrb[17].mxu1 }
  0xff   :  { %v13727_v20 = vpop.f32.mrb[18].mxu1 }
 0x100   :  { %17522 = vst [vmem:[#allocation4_spill] sm:$0xff] %v13727_v20  ;;  %v13732_v22 = vpop.f32.mrb[19].mxu1 }
 0x102   :  { %11646 = vmatmul.mubr.msk.bf16.gmra.mrb[124].mxu1 %vm217_vm0, %v12988_v19 }
 0x103   :  { %11649 = vmatprep.mubr.msk.bf16.mxu1 %vm217_vm0, %v12989_v21 }
 0x105   :  { %v13736_v23 = vpop.f32.mrb[20].mxu1 }
 0x106   :  { %v13738_v24 = vpop.f32.mrb[21].mxu1 }
 0x107   :  { %v13743_v26 = vpop.f32.mrb[22].mxu1 }
 0x108   :  { %17523 = vst [vmem:[#allocation5_spill] sm:$0xff] %v13743_v26  ;;  %v13748_v28 = vpop.f32.mrb[23].mxu1 }
 0x10a   :  { %11650 = vmatmul.mubr.msk.bf16.gmra.mrb[128].mxu1 %vm217_vm0, %v12990_v25 }
 0x10b   :  { %11653 = vmatprep.mubr.msk.bf16.mxu1 %vm217_vm0, %v12991_v27  ;;  %v13004_v27 = vld [vmem:[%s17231_s0 + $0x278] sm:$0xff]  }
 0x10d   :  { %v13752_v29 = vpop.f32.mrb[24].mxu1 }
 0x10e   :  { %v13754_v30 = vpop.f32.mrb[25].mxu1 }
 0x10f   :  { %v13759_v32 = vpop.f32.mrb[26].mxu1 }
 0x110   :  { %17524 = vst [vmem:[#allocation6_spill] sm:$0xff] %v13759_v32  ;;  %v13764_v34 = vpop.f32.mrb[27].mxu1 }
 0x112   :  { %11654 = vmatmul.mubr.msk.bf16.gmra.mrb[132].mxu1 %vm217_vm0, %v12992_v31 }
 0x113   :  { %11657 = vmatprep.mubr.msk.bf16.mxu1 %vm217_vm0, %v12993_v33 }
 0x115   :  { %v13768_v35 = vpop.f32.mrb[28].mxu1 }
 0x116   :  { %v13770_v36 = vpop.f32.mrb[29].mxu1 }
 0x117   :  { %v13775_v38 = vpop.f32.mrb[30].mxu1 }
 0x118   :  { %17525 = vst [vmem:[#allocation7_spill] sm:$0xff] %v13775_v38  ;;  %v13780_v40 = vpop.f32.mrb[31].mxu1 }
 0x119   :  { %17526 = vst [vmem:[#allocation8_spill] sm:$0xff] %v13780_v40  ;;  %v13025_v40 = vld [vmem:[%s17232_s3 + $0x50] sm:$0xff]  }
 0x11a   :  { %11658 = vmatmul.mubr.msk.bf16.gmra.mrb[136].mxu1 %vm217_vm0, %v12994_v37  ;;  %v13005_v37 = vld [vmem:[%s17231_s0 + $0x280] sm:$0xff]  }
 0x11b   :  { %11661 = vmatprep.mubr.msk.bf16.mxu1 %vm217_vm0, %v12995_v39 }
 0x11d   :  { %v13784_v41 = vpop.f32.mrb[32].mxu1 }
 0x11e   :  { %v13786_v42 = vpop.f32.mrb[33].mxu1 }
 0x11f   :  { %v13791_v44 = vpop.f32.mrb[34].mxu1 }
 0x120   :  { %v13796_v46 = vpop.f32.mrb[35].mxu1 }
 0x121   :  { %17527 = vst [vmem:[#allocation9_spill] sm:$0xff] %v13796_v46  ;;  %v13031_v46 = vld [vmem:[%s17232_s3 + $0x68] sm:$0xff]  }
 0x122   :  { %11662 = vmatmul.mubr.msk.bf16.gmra.mrb[140].mxu1 %vm217_vm0, %v12996_v43 }
 0x123   :  { %11669 = vmatprep.mubr.msk.bf16.mxu1 %vm217_vm0, %v12997_v45 }
 0x125   :  { %v13800_v47 = vpop.f32.mrb[36].mxu1 }
 0x126   :  { %v13802_v48 = vpop.f32.mrb[37].mxu1 }
 0x127   :  { %v13807_v50 = vpop.f32.mrb[38].mxu1 }
 0x128   :  { %v13812_v52 = vpop.f32.mrb[39].mxu1 }
 0x129   :  { %17528 = vst [vmem:[#allocation10_spill] sm:$0xff] %v13812_v52  ;;  %v13034_v52 = vld [vmem:[%s17232_s3 + $0xf0] sm:$0xff]  }
 0x12a   :  { %11670 = vmatmul.mubr.msk.bf16.vlgmr.msra.gmra.mrb[144].mxu1 %vm217_vm0, %v12998_v49 }
 0x12b   :  { %11673 = vmatprep.mubr.msk.bf16.mxu1 %vm217_vm0, %v12999_v51 }
 0x12d   :  { %v13816_v53 = vpop.f32.mrb[40].mxu1 }
 0x12e   :  { %17529 = vst [vmem:[#allocation11_spill] sm:$0xff] %v13816_v53  ;;  %v13818_v54 = vpop.f32.mrb[41].mxu1 }
 0x12f   :  { %v13823_v56 = vpop.f32.mrb[42].mxu1 }
 0x130   :  { %17530 = vst [vmem:[#allocation12_spill] sm:$0xff] %v13823_v56  ;;  %v13828_v61 = vpop.f32.mrb[43].mxu1 }
 0x132   :  { %11674 = vmatmul.mubr.msk.bf16.gmra.mrb[148].mxu1 %vm217_vm0, %v13000_v55 }
 0x133   :  { %11677 = vmatprep.mubr.msk.bf16.mxu1 %vm217_vm0, %v13001_v59  ;;  %v13006_v59 = vld [vmem:[%s17231_s0 + $0x288] sm:$0xff]  }
 0x135   :  { %v13832_v1 = vpop.f32.mrb[44].mxu1 }
 0x136   :  { %v13834_v3 = vpop.f32.mrb[45].mxu1 }
 0x137   :  { %17531 = vst [vmem:[#allocation13_spill] sm:$0xff] %v13834_v3  ;;  %v13839_v9 = vpop.f32.mrb[46].mxu1 }
 0x138   :  { %17532 = vst [vmem:[#allocation14_spill] sm:$0xff] %v13839_v9  ;;  %v13844_v15 = vpop.f32.mrb[47].mxu1 }
 0x139   :  { %17533 = vst [vmem:[#allocation15_spill] sm:$0xff] %v13844_v15 }
 0x13a   :  { %11678 = vmatmul.mubr.msk.bf16.gmra.mrb[152].mxu1 %vm217_vm0, %v13002_v7 }
 0x13b   :  { %11681 = vmatprep.mubr.msk.bf16.mxu1 %vm217_vm0, %v13003_v13 }
 0x13d   :  { %v13848_v19 = vpop.f32.mrb[48].mxu1 }
 0x13e   :  { %v13852_v25 = vpop.f32.mrb[49].mxu1 }
 0x13f   :  { %v13859_v33 = vpop.f32.mrb[50].mxu1 }
 0x140   :  { %v13866_v43 = vpop.f32.mrb[51].mxu1 }
 0x142   :  { %11682 = vmatmul.mubr.msk.bf16.gmra.mrb[156].mxu1 %vm217_vm0, %v13004_v27  ;;  %v13007_v27 = vld [vmem:[%s17231_s0 + $0x290] sm:$0xff]  }
 0x143   :  { %11685 = vmatprep.mubr.msk.bf16.mxu1 %vm217_vm0, %v13005_v37  ;;  %v13008_v37 = vld [vmem:[%s17231_s0 + $0x298] sm:$0xff]  }
 0x145   :  { %v13872_v49 = vpop.f32.mrb[52].mxu1 }
 0x146   :  { %v13876_v55 = vpop.f32.mrb[53].mxu1 }
 0x147   :  { %v13883_v13 = vpop.f32.mrb[54].mxu1 }
 0x148   :  { %17534 = vst [vmem:[#allocation16_spill] sm:$0xff] %v13883_v13  ;;  %v13890_v45 = vpop.f32.mrb[55].mxu1 }
 0x14a   :  { %11686 = vmatmul.mubr.msk.bf16.gmra.mrb[160].mxu1 %vm217_vm0, %v13006_v59  ;;  %v13009_v59 = vld [vmem:[%s17231_s0 + $0x2a0] sm:$0xff]  }
 0x14b   :  { %11689 = vmatprep.mubr.msk.bf16.mxu1 %vm217_vm0, %v13007_v27  ;;  %v13010_v27 = vld [vmem:[%s17231_s0 + $0x2a8] sm:$0xff]  }
 0x14d   :  { %v13896_v39 = vpop.f32.mrb[56].mxu1 }
 0x14e   :  { %17535 = vst [vmem:[#allocation17_spill] sm:$0xff] %v13896_v39  ;;  %v13900_v31 = vpop.f32.mrb[57].mxu1 }
 0x14f   :  { %17536 = vst [vmem:[#allocation18_spill] sm:$0xff] %v13900_v31  ;;  %v13907_v13 = vpop.f32.mrb[58].mxu1 }
 0x150   :  { %17537 = vst [vmem:[#allocation19_spill] sm:$0xff] %v13907_v13  ;;  %v13914_v51 = vpop.f32.mrb[59].mxu1 }
 0x152   :  { %11690 = vmatmul.mubr.msk.bf16.gmra.mrb[164].mxu1 %vm217_vm0, %v13008_v37  ;;  %v13011_v37 = vld [vmem:[%s17231_s0 + $0x2b0] sm:$0xff]  }
 0x153   :  { %11693 = vmatprep.mubr.msk.bf16.mxu1 %vm217_vm0, %v13009_v59  ;;  %v13012_v59 = vld [vmem:[%s17231_s0 + $0x2b8] sm:$0xff]  }
 0x155   :  { %v13920_v39 = vpop.f32.mrb[60].mxu1 }
 0x156   :  { %17538 = vst [vmem:[#allocation20_spill] sm:$0xff] %v13920_v39  ;;  %v13924_v31 = vpop.f32.mrb[61].mxu1 }
 0x157   :  { %17539 = vst [vmem:[#allocation21_spill] sm:$0xff] %v13924_v31  ;;  %v13931_v8 = vpop.f32.mrb[62].mxu1 }
 0x158   :  { %17540 = vst [vmem:[#allocation22_spill] sm:$0xff] %v13931_v8  ;;  %v13938_v7 = vpop.f32.mrb[63].mxu1 }
 0x15a   :  { %11694 = vmatmul.mubr.msk.bf16.gmra.mrb[168].mxu1 %vm217_vm0, %v13010_v27  ;;  %v13013_v27 = vld [vmem:[%s17231_s0 + $0x2c0] sm:$0xff]  }
 0x15b   :  { %11697 = vmatprep.mubr.msk.bf16.mxu1 %vm217_vm0, %v13011_v37  ;;  %v13014_v37 = vld [vmem:[%s17231_s0 + $0x2c8] sm:$0xff]  }
 0x15d   :  { %v13944_v39 = vpop.f32.mrb[64].mxu1 }
 0x15e   :  { %17541 = vst [vmem:[#allocation23_spill] sm:$0xff] %v13944_v39  ;;  %v13948_v31 = vpop.f32.mrb[65].mxu1 }
 0x15f   :  { %17542 = vst [vmem:[#allocation24_spill] sm:$0xff] %v13948_v31  ;;  %v13955_v14 = vpop.f32.mrb[66].mxu1 }
 0x160   :  { %17543 = vst [vmem:[#allocation25_spill] sm:$0xff] %v13955_v14  ;;  %v13962_v21 = vpop.f32.mrb[67].mxu1 }
 0x162   :  { %11698 = vmatmul.mubr.msk.bf16.gmra.mrb[172].mxu1 %vm217_vm0, %v13012_v59  ;;  %v13015_v59 = vld [vmem:[%s17231_s0 + $0x2d0] sm:$0xff]  }
 0x163   :  { %11701 = vmatprep.mubr.msk.bf16.mxu1 %vm217_vm0, %v13013_v27  ;;  %v13016_v27 = vld [vmem:[%s17231_s0 + $0x2d8] sm:$0xff]  }
 0x165   :  { %v13968_v39 = vpop.f32.mrb[68].mxu1 }
 0x166   :  { %17544 = vst [vmem:[#allocation26_spill] sm:$0xff] %v13968_v39  ;;  %v13972_v31 = vpop.f32.mrb[69].mxu1 }
 0x167   :  { %17545 = vst [vmem:[#allocation27_spill] sm:$0xff] %v13972_v31  ;;  %v13979_v20 = vpop.f32.mrb[70].mxu1 }
 0x168   :  { %17546 = vst [vmem:[#allocation28_spill] sm:$0xff] %v13979_v20  ;;  %v13986_v13 = vpop.f32.mrb[71].mxu1  ;;  %v13021_v20 = vld [vmem:[%s17232_s3 + $0x40] sm:$0xff]  }
 0x169   :  { %11717 = vmatprep.subr.bf16.mxu1 %v13021_v20 }
 0x16a   :  { %11702 = vmatmul.mubr.msk.bf16.gmra.mrb[176].mxu1 %vm217_vm0, %v13014_v37  ;;  %v13017_v37 = vld [vmem:[%s17231_s0 + $0x2e0] sm:$0xff]  }
 0x16b   :  { %11705 = vmatprep.mubr.msk.bf16.mxu1 %vm217_vm0, %v13015_v59  ;;  %v13018_v59 = vld [vmem:[%s17231_s0 + $0x2e8] sm:$0xff]   ;;  %11718 = vmatpush3.bf16.msra.mxu1 %v13021_v20  ;;  %v13020_v20 = vld [vmem:[%s17231_s0 + $0x2f8] sm:$0xff]  }
 0x16d   :  { %v13992_v39 = vpop.f32.mrb[72].mxu1 }
 0x16e   :  { %17547 = vst [vmem:[#allocation29_spill] sm:$0xff] %v13992_v39  ;;  %v13996_v31 = vpop.f32.mrb[73].mxu1 }
 0x16f   :  { %17548 = vst [vmem:[#allocation30_spill] sm:$0xff] %v13996_v31  ;;  %v14003_v26 = vpop.f32.mrb[74].mxu1 }
 0x170   :  { %17549 = vst [vmem:[#allocation31_spill] sm:$0xff] %v14003_v26  ;;  %v14010_v8 = vpop.f32.mrb[75].mxu1  ;;  %v13022_v26 = vld [vmem:[%s17232_s3 + $0xc0] sm:$0xff]  }
 0x171   :  { %11813 = vmatprep.subr.bf16.mxu0 %v13022_v26 }
 0x172   :  { %11706 = vmatmul.mubr.msk.bf16.gmra.mrb[180].mxu1 %vm217_vm0, %v13016_v27  ;;  %v13019_v27 = vld [vmem:[%s17231_s0 + $0x2f0] sm:$0xff]   ;;  %11814 = vmatpush3.bf16.msra.mxu0 %v13022_v26 }
 0x173   :  { %11709 = vmatprep.mubr.msk.bf16.mxu1 %vm217_vm0, %v13017_v37  ;;  %v13023_v37 = vld [vmem:[%s17232_s3 + $0x48] sm:$0xff]  }
 0x174   :  { %11719 = vmatprep.subr.bf16.mxu1 %v13023_v37 }
 0x175   :  { %v14016_v39 = vpop.f32.mrb[76].mxu1  ;;  %11720 = vmatpush3.bf16.msra.mxu1 %v13023_v37  ;;  %v13028_v37 = vld [vmem:[%s17232_s3 + $0xd8] sm:$0xff]  }
 0x176   :  { %17550 = vst [vmem:[#allocation32_spill] sm:$0xff] %v14016_v39  ;;  %v14020_v31 = vpop.f32.mrb[77].mxu1  ;;  %v13024_v39 = vld [vmem:[%s17232_s3 + $0xc8] sm:$0xff]   ;;  %11721 = vmatprep.subr.bf16.mxu1 %v13025_v40 }
 0x177   :  { %v14027_v32 = vpop.f32.mrb[78].mxu1  ;;  %11815 = vmatprep.subr.bf16.mxu0 %v13024_v39 }
 0x178   :  { %17551 = vst [vmem:[#allocation33_spill] sm:$0xff] %v14027_v32  ;;  %v14034_v14 = vpop.f32.mrb[79].mxu1  ;;  %11816 = vmatpush3.bf16.msra.mxu0 %v13024_v39  ;;  %v13027_v39 = vld [vmem:[%s17232_s3 + $0x58] sm:$0xff]  }
 0x179   :  { %17552 = vst [vmem:[#allocation34_spill] sm:$0xff] %v14034_v14  ;;  %11722 = vmatpush3.bf16.msra.mxu1 %v13025_v40 }
 0x17a   :  { %11710 = vmatmul.mubr.msk.bf16.gmra.mrb[184].mxu1 %vm217_vm0, %v13018_v59  ;;  %11723 = vmatprep.subr.bf16.mxu1 %v13027_v39 }
 0x17b   :  { %11713 = vmatprep.mubr.msk.bf16.mxu1 %vm217_vm0, %v13019_v27 }
 0x17d   :  { %v14052_v14 = vpop.f32.mrb[80].mxu1  ;;  %11724 = vmatpush3.bf16.msra.mxu1 %v13027_v39  ;;  %v17566_v39 = vmax.f32 %v13663_v60, %v13859_v33  ;;  %v17568_v60 = vmax.f32 %v13672_v63, %v13872_v49  ;;  %v17570_v33 = vld [vmem:[#allocation16_spill] sm:$0xff]  ;;  %v17572_v63 = vmax.f32 %v13684_v4, %v13890_v45  ;;  %v17580_v45 = vmax.f32 %v13700_v10, %v13914_v51 }
 0x17e   :  { %17553 = vst [vmem:[#allocation35_spill] sm:$0xff] %v14052_v14  ;;  %v14056_v59 = vpop.f32.mrb[81].mxu1  ;;  %v13026_v14 = vld [vmem:[%s17232_s3 + $0xd0] sm:$0xff]   ;;  %v17588_v51 = vmax.f32 %v13716_v16, %v13938_v7  ;;  %v17598_v7 = vmax.f32 %v13732_v22, %v13962_v21  ;;  %v17610_v21 = vmax.f32 %v13748_v28, %v13986_v13  ;;  %v17619_v13 = vmax.f32 %v13764_v34, %v14010_v8 }
 0x17f   :  { %v14063_v27 = vpop.f32.mrb[82].mxu1  ;;  %11817 = vmatprep.subr.bf16.mxu0 %v13026_v14  ;;  %v17626_v34 = vld [vmem:[#allocation8_spill] sm:$0xff] }
 0x180   :  { %17554 = vst [vmem:[#allocation36_spill] sm:$0xff] %v14063_v27  ;;  %v14067_v38 = vpop.f32.mrb[83].mxu1  ;;  %11818 = vmatpush3.bf16.msra.mxu0 %v13026_v14  ;;  %v13029_v27 = vld [vmem:[%s17232_s3 + $0x60] sm:$0xff]  }
 0x181   :  { %17555 = vst [vmem:[#allocation37_spill] sm:$0xff] %v14067_v38  ;;  %11819 = vmatprep.subr.bf16.mxu0 %v13028_v37  ;;  %v13030_v14 = vld [vmem:[%s17232_s3 + $0xe0] sm:$0xff]   ;;  %11725 = vmatprep.subr.bf16.mxu1 %v13029_v27 }
 0x182   :  { %11714 = vmatmul.mubr.msk.bf16.gmra.mrb[188].mxu1 %vm217_vm0, %v13020_v20 }
 0x183   :  { %11726 = vmatpush3.bf16.msra.mxu1 %v13029_v27 }
 0x184   :  { %11820 = vmatpush3.bf16.msra.mxu0 %v13028_v37  ;;  %11727 = vmatprep.subr.bf16.mxu1 %v13031_v46 }
 0x185   :  { %v14084_v32 = vpop.f32.mrb[84].mxu1  ;;  %11821 = vmatprep.subr.bf16.mxu0 %v13030_v14 }
 0x186   :  { %v14088_v26 = vpop.f32.mrb[85].mxu1 }
 0x187   :  { %v14092_v40 = vpop.f32.mrb[86].mxu1  ;;  %11728 = vmatpush3.bf16.msra.mxu1 %v13031_v46 }
 0x188   :  { %17556 = vst [vmem:[#allocation38_spill] sm:$0xff] %v14092_v40  ;;  %v14096_v38 = vpop.f32.mrb[87].mxu1  ;;  %11822 = vmatpush3.bf16.msra.mxu0 %v13030_v14 }
 0x189   :  { %17557 = vst [vmem:[#allocation39_spill] sm:$0xff] %v14096_v38  ;;  %v13032_v38 = vld [vmem:[%s17232_s3 + $0xe8] sm:$0xff]  }
 0x18a   :  { %11823 = vmatprep.subr.bf16.mxu0 %v13032_v38 }
 0x18c   :  { %11824 = vmatpush3.bf16.msra.mxu0 %v13032_v38  ;;  %v17565_v38 = vmax.f32 %v13658_v58, %v13852_v25  ;;  %v13036_v58 = vld [vmem:[%s17232_s3 + $0xf8] sm:$0xff]  }
 0x18d   :  { %v14106_v20 = vpop.f32.mrb[88].mxu1  ;;  %11825 = vmatprep.subr.bf16.mxu0 %v13034_v52 }
 0x18e   :  { %17558 = vst [vmem:[#allocation40_spill] sm:$0xff] %v14106_v20  ;;  %v14110_v37 = vpop.f32.mrb[89].mxu1  ;;  %v13033_v20 = vld [vmem:[%s17232_s3 + $0x70] sm:$0xff]  }
 0x18f   :  { %v14120_v27 = vpop.f32.mrb[90].mxu1  ;;  %11729 = vmatprep.subr.bf16.mxu1 %v13033_v20 }
 0x190   :  { %17559 = vst [vmem:[#allocation41_spill] sm:$0xff] %v14120_v27  ;;  %v14124_v40 = vpop.f32.mrb[91].mxu1  ;;  %11730 = vmatpush3.bf16.msra.mxu1 %v13033_v20  ;;  %11826 = vmatpush3.bf16.msra.mxu0 %v13034_v52  ;;  %v17564_v20 = vmax.f32 %v13656_v57, %v13848_v19  ;;  %v17567_v52 = vmax.f32 %v13668_v62, %v13866_v43 }
 0x191   :  { %v17569_v62 = vmax.f32 %v13674_v0, %v13876_v55  ;;  %11827 = vmatprep.subr.bf16.mxu0 %v13036_v58  ;;  %v17571_v43 = vmax.f32 %v13679_v2, %v17570_v33  ;;  %v17573_v0 = vld [vmem:[#allocation17_spill] sm:$0xff] }
 0x192   :  { %v17574_v55 = vmax.f32 %v13688_v5, %v17573_v0 }
 0x194   :  { %11828 = vmatpush3.bf16.msra.mxu0 %v13036_v58  ;;  %v17578_v58 = vld [vmem:[#allocation19_spill] sm:$0xff] }
 0x195   :  { %v14131_v53 = vpop.f32.mrb[92].mxu1 }
 0x196   :  { %17560 = vst [vmem:[#allocation42_spill] sm:$0xff] %v14131_v53  ;;  %v14135_v14 = vpop.f32.mrb[93].mxu1 }
 0x197   :  { %17561 = vst [vmem:[#allocation43_spill] sm:$0xff] %v14135_v14  ;;  %v14139_v56 = vpop.f32.mrb[94].mxu1 }
 0x198   :  { %17562 = vst [vmem:[#allocation44_spill] sm:$0xff] %v14139_v56  ;;  %v14143_v46 = vpop.f32.mrb[95].mxu1 }
 0x199   :  { %17563 = vst [vmem:[#allocation45_spill] sm:$0xff] %v14143_v46 }
 0x19d   :  { %v11619_v53 = vpop.f32.mrb[96].mxu1 }
 0x19e   :  { %v14153_v27 = vmax.f32 %v17564_v20, %v11619_v53  ;;  %v1304_v14 = vpop.f32.mrb[97].mxu1  ;;  %v13035_v53 = vld [vmem:[%s17232_s3 + $0x78] sm:$0xff]  }
 0x19f   :  { %v14158_v56 = vmax.f32 %v17565_v38, %v1304_v14  ;;  %v11620_v9 = vpop.f32.mrb[98].mxu1  ;;  %11731 = vmatprep.subr.bf16.mxu1 %v13035_v53 }
 0x1a0   :  { %v14163_v46 = vmax.f32 %v17566_v39, %v11620_v9  ;;  %v1307_v15 = vpop.f32.mrb[99].mxu1  ;;  %11732 = vmatpush3.bf16.msra.mxu1 %v13035_v53  ;;  %v17577_v53 = vld [vmem:[#allocation2_spill] sm:$0xff] }
 0x1a1   :  { %v14168_v3 = vmax.f32 %v17567_v52, %v1307_v15 }
 0x1a5   :  { %v11623_v57 = vpop.f32.mrb[100].mxu1 }
 0x1a6   :  { %v14179_v9 = vmax.f32 %v17568_v60, %v11623_v57  ;;  %v1320_v19 = vpop.f32.mrb[101].mxu1  ;;  %v17575_v57 = vld [vmem:[#allocation18_spill] sm:$0xff] }
 0x1a7   :  { %v14184_v15 = vmax.f32 %v17569_v62, %v1320_v19  ;;  %v11624_v25 = vpop.f32.mrb[102].mxu1  ;;  %v17576_v2 = vmax.f32 %v13690_v6, %v17575_v57  ;;  %v17579_v62 = vmax.f32 %v17577_v53, %v17578_v58  ;;  %v17585_v57 = vld [vmem:[#allocation3_spill] sm:$0xff] }
 0x1a8   :  { %v14189_v39 = vmax.f32 %v17571_v43, %v11624_v25  ;;  %v1323_v14 = vpop.f32.mrb[103].mxu1  ;;  %v17581_v43 = vld [vmem:[#allocation20_spill] sm:$0xff] }
 0x1a9   :  { %v14194_v49 = vmax.f32 %v17572_v63, %v1323_v14  ;;  %v17582_v14 = vmax.f32 %v13704_v11, %v17581_v43 }
 0x1ad   :  { %v11627_v38 = vpop.f32.mrb[104].mxu1 }
 0x1ae   :  { %v14199_v20 = vmax.f32 %v17574_v55, %v11627_v38  ;;  %v1336_v52 = vpop.f32.mrb[105].mxu1  ;;  %v17583_v38 = vld [vmem:[#allocation21_spill] sm:$0xff] }
 0x1af   :  { %v14204_v60 = vmax.f32 %v17576_v2, %v1336_v52  ;;  %v11628_v19 = vpop.f32.mrb[106].mxu1  ;;  %v17584_v0 = vmax.f32 %v13706_v12, %v17583_v38  ;;  %v17586_v2 = vld [vmem:[#allocation22_spill] sm:$0xff]  ;;  %v17594_v38 = vld [vmem:[#allocation4_spill] sm:$0xff] }
 0x1b0   :  { %v14209_v25 = vmax.f32 %v17579_v62, %v11628_v19  ;;  %v1339_v4 = vpop.f32.mrb[107].mxu1  ;;  %v17587_v19 = vmax.f32 %v17585_v57, %v17586_v2  ;;  %v17589_v62 = vld [vmem:[#allocation23_spill] sm:$0xff] }
 0x1b1   :  { %v14214_v33 = vmax.f32 %v17580_v45, %v1339_v4  ;;  %v17590_v4 = vmax.f32 %v13720_v17, %v17589_v62 }
 0x1b5   :  { %v11631_v5 = vpop.f32.mrb[108].mxu1 }
 0x1b6   :  { %v14219_v63 = vmax.f32 %v17582_v14, %v11631_v5  ;;  %v1352_v6 = vpop.f32.mrb[109].mxu1  ;;  %v17592_v5 = vld [vmem:[#allocation24_spill] sm:$0xff] }
 0x1b7   :  { %v14224_v55 = vmax.f32 %v17584_v0, %v1352_v6  ;;  %v11632_v52 = vpop.f32.mrb[110].mxu1  ;;  %v17593_v43 = vmax.f32 %v13722_v18, %v17592_v5  ;;  %v17595_v0 = vld [vmem:[#allocation25_spill] sm:$0xff] }
 0x1b8   :  { %v14229_v53 = vmax.f32 %v17587_v19, %v11632_v52  ;;  %v1355_v10 = vpop.f32.mrb[111].mxu1  ;;  %v17596_v52 = vmax.f32 %v17594_v38, %v17595_v0  ;;  %v17600_v19 = vld [vmem:[#allocation26_spill] sm:$0xff]  ;;  %v17606_v5 = vld [vmem:[#allocation5_spill] sm:$0xff] }
 0x1b9   :  { %v14234_v58 = vmax.f32 %v17588_v51, %v1355_v10  ;;  %v17601_v10 = vmax.f32 %v13736_v23, %v17600_v19 }
 0x1bd   :  { %v11635_v11 = vpop.f32.mrb[112].mxu1 }
 0x1be   :  { %v14239_v45 = vmax.f32 %v17590_v4, %v11635_v11  ;;  %v1368_v12 = vpop.f32.mrb[113].mxu1  ;;  %v17603_v11 = vld [vmem:[#allocation27_spill] sm:$0xff] }
 0x1bf   :  { %v14244_v14 = vmax.f32 %v17593_v43, %v1368_v12  ;;  %v11636_v6 = vpop.f32.mrb[114].mxu1  ;;  %v17604_v62 = vmax.f32 %v13738_v24, %v17603_v11  ;;  %v17607_v43 = vld [vmem:[#allocation28_spill] sm:$0xff]  ;;  %v17616_v11 = vld [vmem:[#allocation6_spill] sm:$0xff] }
 0x1c0   :  { %17591 = vst [vmem:[#allocation16_spill] sm:$0xff] %v14239_v45  ;;  %v14249_v57 = vmax.f32 %v17596_v52, %v11636_v6  ;;  %v1371_v16 = vpop.f32.mrb[115].mxu1  ;;  %v17608_v6 = vmax.f32 %v17606_v5, %v17607_v43  ;;  %v17612_v52 = vld [vmem:[#allocation29_spill] sm:$0xff] }
 0x1c1   :  { %v14254_v2 = vmax.f32 %v17598_v7, %v1371_v16  ;;  %v17613_v16 = vmax.f32 %v13752_v29, %v17612_v52 }
 0x1c2   :  { %17597 = vst [vmem:[#allocation17_spill] sm:$0xff] %v14249_v57 }
 0x1c3   :  { %17599 = vst [vmem:[#allocation18_spill] sm:$0xff] %v14254_v2 }
 0x1c5   :  { %v11639_v17 = vpop.f32.mrb[116].mxu1 }
 0x1c6   :  { %v14259_v51 = vmax.f32 %v17601_v10, %v11639_v17  ;;  %v1384_v18 = vpop.f32.mrb[117].mxu1  ;;  %v17614_v17 = vld [vmem:[#allocation30_spill] sm:$0xff] }
 0x1c7   :  { %v14264_v4 = vmax.f32 %v17604_v62, %v1384_v18  ;;  %v11640_v12 = vpop.f32.mrb[118].mxu1  ;;  %v17615_v19 = vmax.f32 %v13754_v30, %v17614_v17  ;;  %v17617_v62 = vld [vmem:[#allocation31_spill] sm:$0xff]  ;;  %v17624_v17 = vld [vmem:[#allocation33_spill] sm:$0xff] }
 0x1c8   :  { %17602 = vst [vmem:[#allocation2_spill] sm:$0xff] %v14259_v51  ;;  %v14269_v38 = vmax.f32 %v17608_v6, %v11640_v12  ;;  %v1387_v22 = vpop.f32.mrb[119].mxu1  ;;  %v17618_v12 = vmax.f32 %v17616_v11, %v17617_v62  ;;  %v17620_v6 = vld [vmem:[#allocation32_spill] sm:$0xff]  ;;  %v17627_v11 = vld [vmem:[#allocation34_spill] sm:$0xff] }
 0x1c9   :  { %17605 = vst [vmem:[#allocation19_spill] sm:$0xff] %v14264_v4  ;;  %v14274_v0 = vmax.f32 %v17610_v21, %v1387_v22  ;;  %v17621_v22 = vmax.f32 %v13768_v35, %v17620_v6  ;;  %v17628_v62 = vmax.f32 %v17626_v34, %v17627_v11 }
 0x1ca   :  { %17609 = vst [vmem:[#allocation20_spill] sm:$0xff] %v14269_v38 }
 0x1cb   :  { %17611 = vst [vmem:[#allocation21_spill] sm:$0xff] %v14274_v0 }
 0x1cd   :  { %v11643_v23 = vpop.f32.mrb[120].mxu1 }
 0x1ce   :  { %v14279_v7 = vmax.f32 %v17613_v16, %v11643_v23  ;;  %v1400_v24 = vpop.f32.mrb[121].mxu1  ;;  %v17622_v23 = vmax.f32 %v13770_v36, %v14020_v31  ;;  %v17631_v31 = vmax.f32 %v13786_v42, %v14056_v59  ;;  %v14345_v42 = vld [vmem:[%s17232_s3 + $0x100] sm:$0xff]  }
 0x1cf   :  { %v14284_v10 = vmax.f32 %v17615_v19, %v1400_v24  ;;  %v11644_v18 = vpop.f32.mrb[122].mxu1  ;;  %v17623_v24 = vld [vmem:[#allocation7_spill] sm:$0xff]  ;;  %11845 = vmatprep.subr.bf16.mxu0 %v14345_v42 }
 0x1d0   :  { %v14289_v5 = vmax.f32 %v17618_v12, %v11644_v18  ;;  %v1403_v28 = vpop.f32.mrb[123].mxu1  ;;  %v17625_v19 = vmax.f32 %v17623_v24, %v17624_v17  ;;  %v17635_v17 = vld [vmem:[#allocation9_spill] sm:$0xff] }
 0x1d1   :  { %v14294_v43 = vmax.f32 %v17619_v13, %v1403_v28  ;;  %v17629_v28 = vld [vmem:[#allocation35_spill] sm:$0xff] }
 0x1d2   :  { %v17630_v13 = vmax.f32 %v13784_v41, %v17629_v28 }
 0x1d5   :  { %v11647_v29 = vpop.f32.mrb[124].mxu1 }
 0x1d6   :  { %v14299_v21 = vmax.f32 %v17621_v22, %v11647_v29  ;;  %v1416_v30 = vpop.f32.mrb[125].mxu1 }
 0x1d7   :  { %v14304_v52 = vmax.f32 %v17622_v23, %v1416_v30  ;;  %v11648_v16 = vpop.f32.mrb[126].mxu1  ;;  %v14329_v30 = vld [vmem:[%s17232_s3] sm:$0xff]   ;;  %v17632_v23 = vld [vmem:[#allocation36_spill] sm:$0xff] }
 0x1d8   :  { %v14309_v18 = vmax.f32 %v17625_v19, %v11648_v16  ;;  %v1419_v8 = vpop.f32.mrb[127].mxu1  ;;  %v17633_v16 = vmax.f32 %v13791_v44, %v17632_v23  ;;  %v17636_v19 = vld [vmem:[#allocation37_spill] sm:$0xff]  ;;  %11749 = vmatprep.subr.bf16.mxu1 %v14329_v30  ;;  %v17639_v44 = vmax.f32 %v13800_v47, %v14084_v32  ;;  %v17650_v47 = vld [vmem:[#allocation11_spill] sm:$0xff] }
 0x1d9   :  { %v14314_v12 = vmax.f32 %v17628_v62, %v1419_v8  ;;  %v17637_v8 = vmax.f32 %v17635_v17, %v17636_v19 }
 0x1dd   :  { %v11651_v35 = vpop.f32.mrb[128].mxu1 }
 0x1de   :  { %v14319_v29 = vmax.f32 %v17630_v13, %v11651_v35  ;;  %v1432_v36 = vpop.f32.mrb[129].mxu1  ;;  %v17641_v35 = vmax.f32 %v13802_v48, %v14088_v26  ;;  %v17654_v26 = vmax.f32 %v13818_v54, %v14110_v37  ;;  %v17665_v37 = vld [vmem:[#allocation13_spill] sm:$0xff] }
 0x1df   :  { %v14324_v6 = vmax.f32 %v17631_v31, %v1432_v36  ;;  %v11652_v22 = vpop.f32.mrb[130].mxu1  ;;  %v17643_v36 = vld [vmem:[#allocation38_spill] sm:$0xff] }
 0x1e0   :  { %v14334_v24 = vmax.f32 %v17633_v16, %v11652_v22  ;;  %v1435_v41 = vpop.f32.mrb[131].mxu1  ;;  %v17644_v31 = vmax.f32 %v13807_v50, %v17643_v36  ;;  %v17646_v16 = vld [vmem:[#allocation10_spill] sm:$0xff] }
 0x1e1   :  { %v14339_v34 = vmax.f32 %v17637_v8, %v1435_v41  ;;  %v17647_v41 = vld [vmem:[#allocation39_spill] sm:$0xff]  ;;  %v17651_v8 = vld [vmem:[#allocation40_spill] sm:$0xff] }
 0x1e2   :  { %17634 = vst [vmem:[#allocation3_spill] sm:$0xff] %v14334_v24  ;;  %v17648_v17 = vmax.f32 %v17646_v16, %v17647_v41  ;;  %v17660_v16 = vmax.f32 %v13828_v61, %v14124_v40  ;;  %v17673_v40 = vld [vmem:[#allocation15_spill] sm:$0xff] }
 0x1e3   :  { %17638 = vst [vmem:[#allocation22_spill] sm:$0xff] %v14339_v34 }
 0x1e5   :  { %v11655_v59 = vpop.f32.mrb[132].mxu1 }
 0x1e6   :  { %v14351_v11 = vmax.f32 %v17639_v44, %v11655_v59  ;;  %v1448_v62 = vpop.f32.mrb[133].mxu1  ;;  %v17652_v59 = vmax.f32 %v17650_v47, %v17651_v8 }
 0x1e7   :  { %v14356_v28 = vmax.f32 %v17641_v35, %v1448_v62  ;;  %v11656_v13 = vpop.f32.mrb[134].mxu1  ;;  %v17656_v35 = vld [vmem:[#allocation12_spill] sm:$0xff] }
 0x1e8   :  { %17640 = vst [vmem:[#allocation23_spill] sm:$0xff] %v14351_v11  ;;  %v14361_v22 = vmax.f32 %v17644_v31, %v11656_v13  ;;  %v1451_v23 = vpop.f32.mrb[135].mxu1  ;;  %v17657_v13 = vld [vmem:[#allocation41_spill] sm:$0xff] }
 0x1e9   :  { %17642 = vst [vmem:[#allocation24_spill] sm:$0xff] %v14356_v28  ;;  %v14366_v19 = vmax.f32 %v17648_v17, %v1451_v23  ;;  %v17658_v36 = vmax.f32 %v17656_v35, %v17657_v13  ;;  %v17669_v35 = vld [vmem:[#allocation14_spill] sm:$0xff]  ;;  %v17670_v13 = vld [vmem:[#allocation44_spill] sm:$0xff] }
 0x1ea   :  { %17645 = vst [vmem:[#allocation4_spill] sm:$0xff] %v14361_v22 }
 0x1eb   :  { %17649 = vst [vmem:[#allocation25_spill] sm:$0xff] %v14366_v19 }
 0x1ed   :  { %v11659_v32 = vpop.f32.mrb[136].mxu1 }
 0x1ee   :  { %v14371_v44 = vmax.f32 %v17652_v59, %v11659_v32  ;;  %v1464_v48 = vpop.f32.mrb[137].mxu1  ;;  %v17662_v32 = vld [vmem:[#allocation42_spill] sm:$0xff]  ;;  %v17666_v59 = vld [vmem:[#allocation43_spill] sm:$0xff] }
 0x1ef   :  { %v14376_v62 = vmax.f32 %v17654_v26, %v1464_v48  ;;  %v11660_v50 = vpop.f32.mrb[138].mxu1  ;;  %v17663_v47 = vmax.f32 %v13832_v1, %v17662_v32  ;;  %v17667_v48 = vmax.f32 %v17665_v37, %v17666_v59  ;;  %v14411_v1 = vld [vmem:[%s17233_s2] ss:$0 sm:$0xff] }
 0x1f0   :  { %17653 = vst [vmem:[#allocation26_spill] sm:$0xff] %v14371_v44  ;;  %v14381_v31 = vmax.f32 %v17658_v36, %v11660_v50  ;;  %v1467_v23 = vpop.f32.mrb[139].mxu1  ;;  %v17671_v36 = vmax.f32 %v17669_v35, %v17670_v13 }
 0x1f1   :  { %17655 = vst [vmem:[#allocation27_spill] sm:$0xff] %v14376_v62  ;;  %v14386_v41 = vmax.f32 %v17660_v16, %v1467_v23  ;;  %v17674_v23 = vld [vmem:[#allocation45_spill] sm:$0xff] }
 0x1f2   :  { %17659 = vst [vmem:[#allocation5_spill] sm:$0xff] %v14381_v31  ;;  %v17675_v16 = vmax.f32 %v17673_v40, %v17674_v23 }
 0x1f3   :  { %17661 = vst [vmem:[#allocation28_spill] sm:$0xff] %v14386_v41 }
 0x1f5   :  { %v11663_v17 = vpop.f32.mrb[140].mxu1 }
 0x1f6   :  { %v14391_v8 = vmax.f32 %v17663_v47, %v11663_v17  ;;  %v1480_v54 = vpop.f32.mrb[141].mxu1 }
 0x1f7   :  { %v14396_v26 = vmax.f32 %v17667_v48, %v1480_v54  ;;  %v11664_v50 = vpop.f32.mrb[142].mxu1 }
 0x1f8   :  { %17664 = vst [vmem:[#allocation29_spill] sm:$0xff] %v14391_v8  ;;  %v14401_v31 = vmax.f32 %v17671_v36, %v11664_v50  ;;  %v1483_v61 = vpop.f32.mrb[143].mxu1 }
 0x1f9   :  { %17668 = vst [vmem:[#allocation30_spill] sm:$0xff] %v14396_v26  ;;  %v14406_v41 = vmax.f32 %v17675_v16, %v1483_v61  ;;  %v17688_v26 = vmov 0 }
 0x1fa   :  { %17672 = vst [vmem:[#allocation6_spill] sm:$0xff] %v14401_v31  ;;  %v17689_v26 = vsel %vm14469_vm3, 4294967295, %v17688_v26 }
 0x1fb   :  { %17676 = vst [vmem:[#allocation31_spill] sm:$0xff] %v14406_v41  ;;  %17690 = vst [vmem:[#allocation38_spill] sm:$0xff] %v17689_v26 }
 0x1fd   :  { %v11671_v17 = vpop.f32.mrb[144].mxu1 }
 0x1fe   :  { %v2011_v32 = vmax.f32 %v14153_v27, %v11671_v17  ;;  %v1818_v47 = vpop.f32.mrb[145].mxu1 }
 0x1ff   :  { %v2009_v54 = vmax.f32 %v14158_v56, %v1818_v47  ;;  %v11672_v37 = vpop.f32.mrb[146].mxu1 }
 0x200   :  { %v2066_v59 = vadd.f32 %v14411_v1, %v2011_v32  ;;  %v2012_v48 = vmax.f32 %v14163_v46, %v11672_v37  ;;  %v1821_v50 = vpop.f32.mrb[147].mxu1 }
 0x201   :  { %v2064_v35 = vadd.f32 %v14411_v1, %v2009_v54  ;;  %v2010_v13 = vmax.f32 %v14168_v3, %v1821_v50 }
 0x202   :  { %v14419_v36 = vmax.f32 %v2066_v59, 0.0  ;;  %v2067_v40 = vadd.f32 %v14411_v1, %v2012_v48 }
 0x203   :  { %v14421_v61 = vmax.f32 %v2064_v35, 0.0  ;;  %v2065_v27 = vadd.f32 %v14411_v1, %v2010_v13 }
 0x204   :  { %17677 = vst [vmem:[#allocation32_spill] sm:$0xff] %v14419_v36  ;;  %v14427_v56 = vpack.c.bf16 %v14419_v36, %v14419_v36  ;;  %v2115_v59 = vmax.f32 %v2067_v40, 0.0 }
 0x205   :  { %17678 = vst [vmem:[#allocation7_spill] sm:$0xff] %v14421_v61  ;;  %v14431_v46 = vpack.c.bf16 %v14421_v61, %v14421_v61  ;;  %v2113_v23 = vmax.f32 %v2065_v27, 0.0  ;;  %v11675_v16 = vpop.f32.mrb[148].mxu1 }
 0x206   :  { %17679 = vst [vmem:[#allocation33_spill] sm:$0xff] %v14427_v56  ;;  %v2015_v3 = vmax.f32 %v14179_v9, %v11675_v16  ;;  %v1834_v17 = vpop.f32.mrb[149].mxu1  ;;  %v17683_v40 = vshrl.u32 %v14427_v56, 16  ;;  %v17694_v11 = vshll.u32 %v14427_v56, 16 }
 0x207   :  { %17680 = vst [vmem:[#allocation8_spill] sm:$0xff] %v14431_v46  ;;  %v2284_v54 = vshrl.u32 %v14431_v46, 16  ;;  %v2287_v37 = vshll.u32 %v14431_v46, 16  ;;  %v2013_v48 = vmax.f32 %v14184_v15, %v1834_v17  ;;  %v11676_v50 = vpop.f32.mrb[150].mxu1  ;;  %v14439_v35 = vpack.c.bf16 %v2113_v23, %v2113_v23 }
 0x208   :  { %v2070_v13 = vadd.f32 %v14411_v1, %v2015_v3  ;;  %v2016_v27 = vmax.f32 %v14189_v39, %v11676_v50  ;;  %v1837_v9 = vpop.f32.mrb[151].mxu1  ;;  %v2300_v46 = vrot.slane %v17683_v40, 4  ;;  %v17684_v15 = vshll.u32 %v14427_v56, 16 }
 0x209   :  { %17681 = vst [vmem:[#allocation34_spill] sm:$0xff] %v14439_v35  ;;  %v2068_v16 = vadd.f32 %v14411_v1, %v2013_v48  ;;  %v2014_v32 = vmax.f32 %v14194_v49, %v1837_v9  ;;  %v2286_v47 = vrot.slane %v2284_v54, 4  ;;  %v2289_v36 = vrot.slane %v2287_v37, 5 }
 0x20a   :  { %v14445_v61 = vmax.f32 %v2070_v13, 0.0  ;;  %v2303_v23 = vrot.slane %v17684_v15, 5  ;;  %v14451_v17 = vpack.c.bf16 %v2115_v59, %v2115_v59  ;;  %v2071_v3 = vadd.f32 %v14411_v1, %v2016_v27 }
 0x20b   :  { %v14454_v39 = vmax.f32 %v2068_v16, 0.0  ;;  %v2290_v50 = vor.u32 %v2289_v36, %v2286_v47  ;;  %v2069_v48 = vadd.f32 %v14411_v1, %v2014_v32  ;;  %v2293_v9 = vshll.u32 %v14439_v35, 16 }
 0x20c   :  { %17682 = vst [vmem:[#allocation35_spill] sm:$0xff] %v14445_v61  ;;  %17685 = vst [vmem:[#allocation36_spill] sm:$0xff] %v14451_v17  ;;  %v14460_v13 = vpack.c.bf16 %v14445_v61, %v14445_v61  ;;  %v2304_v15 = vor.u32 %v2303_v23, %v2300_v46  ;;  %v2119_v59 = vmax.f32 %v2071_v3, 0.0  ;;  %v2307_v27 = vshll.u32 %v14451_v17, 16 }
 0x20d   :  { %17686 = vst [vmem:[#allocation9_spill] sm:$0xff] %v14454_v39  ;;  %v11679_v49 = vpop.f32.mrb[152].mxu1  ;;  %v14465_v36 = vpack.c.bf16 %v14454_v39, %v14454_v39  ;;  %v2291_v31 = vrot.slane %v2290_v50, 4  ;;  %v2117_v61 = vmax.f32 %v2069_v48, 0.0  ;;  %v2295_v46 = vrot.slane %v2293_v9, 5 }
 0x20e   :  { %v1850_v40 = vpop.f32.mrb[153].mxu1  ;;  %v2019_v32 = vmax.f32 %v14199_v20, %v11679_v49  ;;  %v17304_v23 = vshrl.u32 %v14460_v13, 16  ;;  %v2305_v3 = vrot.slane %v2304_v15, 4  ;;  %v17305_v8 = vshll.u32 %v14460_v13, 16 }
 0x20f   :  { %v11680_v41 = vpop.f32.mrb[154].mxu1  ;;  %17687 = vst [vmem:[#allocation37_spill] sm:$0xff] %v14465_v36  ;;  %v2017_v47 = vmax.f32 %v14204_v60, %v1850_v40  ;;  %v14475_v62 = vpack.c.bf16 %v2119_v59, %v2119_v59  ;;  %v2296_v60 = vsel %vm14469_vm3, %v2291_v31, %v2295_v46  ;;  %v2309_v50 = vrot.slane %v2307_v27, 5 }
 0x210   :  { %v1853_v16 = vpop.f32.mrb[155].mxu1  ;;  %v2020_v39 = vmax.f32 %v14209_v25, %v11680_v41  ;;  %v2312_v48 = vshrl.u32 %v14465_v36, 16  ;;  %v14482_v49 = vpack.c.bf16 %v2117_v61, %v2117_v61  ;;  %v2074_v40 = vadd.f32 %v14411_v1, %v2019_v32 }
 0x211   :  { %v2018_v20 = vmax.f32 %v14214_v33, %v1853_v16  ;;  %v2315_v15 = vshll.u32 %v14465_v36, 16  ;;  %v14490_v25 = vsel %vm14469_vm3, %v2305_v3, %v2309_v50  ;;  %v14496_v31 = vrot.slane %v17304_v23, 4 }
 0x212   :  { %17691 = vst [vmem:[#allocation10_spill] sm:$0xff] %v14490_v25  ;;  %v14500_v41 = vrot.slane %v17305_v8, 5  ;;  %v9869_v32 = vcombine.low %v2296_v60, %v14490_v25  ;;  %v2314_v46 = vrot.slane %v2312_v48, 4  ;;  %v3142_v3 = vrot.slane %v2284_v54, 5 }
 0x213   :  { %v2317_v36 = vrot.slane %v2315_v15, 5  ;;  %v3143_v50 = vrot.slane %v2287_v37, 6  ;;  %v14508_v19 = vmax.f32 %v2074_v40, 0.0  ;;  %v2321_v23 = vshll.u32 %v14482_v49, 16 }
 0x214   :  { %11733 = vmatprep.mubr.bf16.mxu1 %v9869_v32  ;;  %v3146_v8 = vshrl.u32 %v14439_v35, 16  ;;  %v3149_v22 = vrot.slane %v2293_v9, 6  ;;  %v2072_v61 = vadd.f32 %v14411_v1, %v2017_v47  ;;  %v17693_v60 = vshrl.u32 %v14427_v56, 16 }
 0x215   :  { %v14486_v59 = vpop.f32.mrb[156].mxu1  ;;  %17692 = vst [vmem:[#allocation39_spill] sm:$0xff] %v14508_v19  ;;  %v3144_v28 = vor.u32 %v3143_v50, %v3142_v3  ;;  %v3153_v54 = vrot.slane %v17694_v11, 6  ;;  %v2075_v37 = vadd.f32 %v14411_v1, %v2020_v39  ;;  %v2073_v40 = vadd.f32 %v14411_v1, %v2018_v20 }
 0x216   :  { %v14492_v33 = vpop.f32.mrb[157].mxu1  ;;  %v3152_v25 = vrot.slane %v17693_v60, 5  ;;  %v3148_v34 = vrot.slane %v3146_v8, 5  ;;  %v3156_v32 = vshrl.u32 %v14451_v17, 16  ;;  %v2318_v24 = vor.u32 %v2317_v36, %v2314_v46 }
 0x217   :  { %v14504_v16 = vpop.f32.mrb[158].mxu1  ;;  %v17695_v9 = vmov 0  ;;  %v3145_v47 = vrot.slane %v3144_v28, 4  ;;  %v3159_v50 = vrot.slane %v2307_v27, 6  ;;  %v3162_v11 = vrot.slane %v2312_v48, 5 }
 0x218   :  { %v14506_v44 = vpop.f32.mrb[159].mxu1  ;;  %v17696_v9 = vsel %vm14522_vm6, 4294967295, %v17695_v9  ;;  %v3154_v3 = vor.u32 %v3153_v54, %v3152_v25  ;;  %v3150_v60 = vor.u32 %v3149_v22, %v3148_v34  ;;  %v3158_v56 = vrot.slane %v3156_v32, 5 }
 0x219   :  { %17697 = vst [vmem:[#allocation11_spill] sm:$0xff] %v17696_v9  ;;  %v3163_v35 = vrot.slane %v2315_v15, 6  ;;  %v3166_v8 = vshrl.u32 %v14482_v49, 16  ;;  %v3169_v17 = vrot.slane %v2321_v23, 6  ;;  %v2023_v36 = vmax.f32 %v14219_v63, %v14486_v59 }
 0x21a   :  { %v3155_v20 = vrot.slane %v3154_v3, 4  ;;  %v3151_v28 = vsel %vm14522_vm6, %v3145_v47, %v3150_v60  ;;  %v3160_v25 = vor.u32 %v3159_v50, %v3158_v56  ;;  %v2021_v34 = vmax.f32 %v14224_v55, %v14492_v33 }
 0x21b   :  { %v3164_v27 = vor.u32 %v3163_v35, %v3162_v11  ;;  %v14539_v48 = vmax.f32 %v2072_v61, 0.0  ;;  %v3168_v15 = vrot.slane %v3166_v8, 5  ;;  %v2024_v54 = vmax.f32 %v14229_v53, %v14504_v16 }
 0x21c   :  { %v2022_v63 = vmax.f32 %v14234_v58, %v14506_v44  ;;  %v2319_v32 = vrot.slane %v2318_v24, 4  ;;  %v14549_v56 = vsel %vm14522_vm6, %v3155_v20, %v3160_v25  ;;  %v3176_v55 = vshrl.u32 %v14475_v62, 16 }
 0x21d   :  { %v14526_v39 = vpop.f32.mrb[160].mxu1  ;;  %17700 = vst [vmem:[#allocation41_spill] sm:$0xff] %v14539_v48  ;;  %17702 = vst [vmem:[#allocation13_spill] sm:$0xff] %v14549_v56  ;;  %v3165_v35 = vrot.slane %v3164_v27, 4  ;;  %v2123_v33 = vmax.f32 %v2075_v37, 0.0  ;;  %v3170_v61 = vor.u32 %v3169_v17, %v3168_v15  ;;  %v9965_v47 = vcombine.low %v3151_v28, %v14549_v56 }
 0x21e   :  { %17698 = vst [vmem:[#allocation40_spill] sm:$0xff] %v14526_v39  ;;  %v14531_v46 = vpop.f32.mrb[161].mxu1  ;;  %v2121_v3 = vmax.f32 %v2073_v40, 0.0  ;;  %v2323_v50 = vrot.slane %v2321_v23, 5  ;;  %v2332_v53 = vor.u32 %v14500_v41, %v14496_v31  ;;  %v17703_v58 = vshrl.u32 %v14460_v13, 16 }
 0x21f   :  { %v14537_v22 = vpop.f32.mrb[162].mxu1  ;;  %v17704_v24 = vshll.u32 %v14475_v62, 16  ;;  %v14561_v60 = vpack.c.bf16 %v14508_v19, %v14508_v19  ;;  %v14565_v17 = vsel %vm14522_vm6, %v3165_v35, %v3170_v61  ;;  %11829 = vmatprep.mubr.bf16.mxu0 %v9965_v47  ;;  %v17707_v23 = vshll.u32 %v14460_v13, 16 }
 0x220   :  { %17699 = vst [vmem:[#allocation12_spill] sm:$0xff] %v14537_v22  ;;  %v14545_v59 = vpop.f32.mrb[163].mxu1  ;;  %v3172_v44 = vrot.slane %v17703_v58, 5  ;;  %17706 = vst [vmem:[#allocation14_spill] sm:$0xff] %v14565_v17  ;;  %v14571_v31 = vpack.c.bf16 %v14539_v48, %v14539_v48  ;;  %v14577_v40 = vsel %vm14469_vm3, %v2319_v32, %v2323_v50  ;;  %v2333_v11 = vrot.slane %v2332_v53, 4 }
 0x221   :  { %17701 = vst [vmem:[#allocation42_spill] sm:$0xff] %v14545_v59  ;;  %v2337_v16 = vrot.slane %v17704_v24, 5  ;;  %17705 = vst [vmem:[#allocation43_spill] sm:$0xff] %v14561_v60  ;;  %v3173_v37 = vrot.slane %v17707_v23, 6  ;;  %v14581_v8 = vpack.c.bf16 %v2123_v33, %v2123_v33  ;;  %v3178_v25 = vrot.slane %v3176_v55, 5 }
 0x222   :  { %17708 = vst [vmem:[#allocation44_spill] sm:$0xff] %v14571_v31  ;;  %17709 = vst [vmem:[#allocation15_spill] sm:$0xff] %v14577_v40  ;;  %v17712_v27 = vmov %v17704_v24  ;;  %v14587_v61 = vpack.c.bf16 %v2121_v3, %v2121_v3  ;;  %v2078_v55 = vadd.f32 %v14411_v1, %v2023_v36  ;;  %v13039_v24 = vld [vmem:[%s17232_s3 + $0x8] sm:$0xff]   ;;  %v14611_v23 = vadd.f32 %v14411_v1, %v2024_v54 }
 0x223   :  { %17711 = vst [vmem:[#allocation46_spill] sm:$0xff] %v14581_v8  ;;  %v3174_v28 = vor.u32 %v3173_v37, %v3172_v44  ;;  %v3179_v15 = vrot.slane %v17712_v27, 6  ;;  %v14591_v47 = vsel %vm14469_vm3, %v2333_v11, %v2337_v16  ;;  %v2076_v16 = vadd.f32 %v14411_v1, %v2021_v34 }
 0x224   :  { %17714 = vst [vmem:[#allocation48_spill] sm:$0xff] %v14587_v61  ;;  %v14602_v53 = vcombine.low %v14577_v40, %v14591_v47  ;;  %v2077_v37 = vadd.f32 %v14411_v1, %v2022_v63  ;;  %v2343_v34 = vshll.u32 %v14571_v31, 16  ;;  %v3196_v54 = vshrl.u32 %v14581_v8, 16 }
 0x225   :  { %v14579_v20 = vpop.f32.mrb[164].mxu1  ;;  %v3175_v3 = vrot.slane %v3174_v28, 4  ;;  %v3180_v58 = vor.u32 %v3179_v15, %v3178_v25  ;;  %v2340_v25 = vshrl.u32 %v14571_v31, 16  ;;  %v3186_v63 = vshrl.u32 %v14587_v61, 16  ;;  %v13040_v15 = vld [vmem:[%s17232_s3 + $0x108] sm:$0xff]  }
 0x226   :  { %17710 = vst [vmem:[#allocation45_spill] sm:$0xff] %v14579_v20  ;;  %v14585_v35 = vpop.f32.mrb[165].mxu1  ;;  %17716 = vst [vmem:[#allocation50_spill] sm:$0xff] %v14602_v53  ;;  %11734 = vmatmul.mubr.bf16.vlgmr.msra.gmra.mrb[192].mxu1 %v14602_v53  ;;  %v2345_v28 = vrot.slane %v2343_v34, 5  ;;  %v2349_v32 = vshll.u32 %v14587_v61, 16  ;;  %v14641_v36 = vmax.f32 %v2076_v16, 0.0 }
 0x227   :  { %17713 = vst [vmem:[#allocation47_spill] sm:$0xff] %v14585_v35  ;;  %v14597_v50 = vpop.f32.mrb[166].mxu1  ;;  %v14619_v11 = vsel %vm14522_vm6, %v3175_v3, %v3180_v58  ;;  %11750 = vmatpush3.bf16.msra.mxu1 %v14329_v30  ;;  %v13041_v3 = vld [vmem:[%s17232_s3 + $0x10] sm:$0xff]   ;;  %v14638_v58 = vmax.f32 %v2078_v55, 0.0  ;;  %v2342_v41 = vrot.slane %v2340_v25, 4  ;;  %v2125_v33 = vmax.f32 %v2077_v37, 0.0 }
 0x228   :  { %17715 = vst [vmem:[#allocation49_spill] sm:$0xff] %v14597_v50  ;;  %v14604_v44 = vpop.f32.mrb[167].mxu1  ;;  %v14629_v27 = vcombine.low %v14565_v17, %v14619_v11  ;;  %11751 = vmatprep.subr.bf16.mxu1 %v13039_v24  ;;  %v2354_v30 = vshrl.u32 %v14561_v60, 16  ;;  %v13042_v17 = vld [vmem:[%s17232_s3 + $0x110] sm:$0xff]   ;;  %v2351_v40 = vrot.slane %v2349_v32, 5  ;;  %v2357_v19 = vshll.u32 %v14561_v60, 16 }
 0x229   :  { %17717 = vst [vmem:[#allocation51_spill] sm:$0xff] %v14604_v44  ;;  %17719 = vst [vmem:[#allocation53_spill] sm:$0xff] %v14638_v58  ;;  %v2346_v56 = vor.u32 %v2345_v28, %v2342_v41  ;;  %v13043_v16 = vld [vmem:[%s17232_s3 + $0x18] sm:$0xff]   ;;  %v3182_v2 = vrot.slane %v2340_v25, 5  ;;  %v3183_v55 = vrot.slane %v2343_v34, 6  ;;  %v14667_v48 = vpack.c.bf16 %v2125_v33, %v2125_v33  ;;  %v17825_v26 = vld [vmem:[#allocation42_spill] sm:$0xff] }
 0x22a   :  { %17718 = vst [vmem:[#allocation52_spill] sm:$0xff] %v14629_v27  ;;  %11830 = vmatmul.mubr.bf16.vlgmr.msra.gmra.mrb[0].mxu0 %v14629_v27  ;;  %v2356_v37 = vrot.slane %v2354_v30, 4  ;;  %v2363_v27 = vshll.u32 %v14581_v8, 16  ;;  %v2359_v28 = vrot.slane %v2357_v19, 5  ;;  %v3188_v60 = vrot.slane %v3186_v63, 5  ;;  %v13044_v33 = vld [vmem:[%s17232_s3 + $0x118] sm:$0xff]  }
 0x22b   :  { %11846 = vmatpush3.bf16.msra.mxu0 %v14345_v42  ;;  %11752 = vmatpush3.bf16.msra.mxu1 %v13039_v24  ;;  %v2347_v41 = vrot.slane %v2346_v56, 4  ;;  %v14665_v42 = vpack.c.bf16 %v14641_v36, %v14641_v36  ;;  %17720 = vst [vmem:[#allocation54_spill] sm:$0xff] %v14667_v48  ;;  %v3189_v22 = vrot.slane %v2349_v32, 6  ;;  %v3184_v24 = vor.u32 %v3183_v55, %v3182_v2  ;;  %v13047_v55 = vld [vmem:[%s17232_s3 + $0x28] sm:$0xff]  }
 0x22c   :  { %11847 = vmatprep.subr.bf16.mxu0 %v13040_v15  ;;  %11753 = vmatprep.subr.bf16.mxu1 %v13041_v3  ;;  %v2360_v57 = vor.u32 %v2359_v28, %v2356_v37  ;;  %v2365_v8 = vrot.slane %v2363_v27, 5  ;;  %v3192_v61 = vrot.slane %v2354_v30, 5  ;;  %v3193_v31 = vrot.slane %v2357_v19, 6 }
 0x22d   :  { %v14645_v53 = vpop.f32.mrb[168].mxu1  ;;  %v2352_v25 = vsel %vm14469_vm3, %v2347_v41, %v2351_v40  ;;  %v3190_v34 = vor.u32 %v3189_v22, %v3188_v60  ;;  %v13045_v40 = vld [vmem:[%s17232_s3 + $0x20] sm:$0xff]   ;;  %v3185_v63 = vrot.slane %v3184_v24, 4  ;;  %v3198_v2 = vrot.slane %v3196_v54, 5 }
 0x22e   :  { %v14652_v59 = vpop.f32.mrb[169].mxu1  ;;  %v14672_v56 = vcombine.low %v14591_v47, %v2352_v25  ;;  %v2361_v32 = vrot.slane %v2360_v57, 4  ;;  %v3194_v47 = vor.u32 %v3193_v31, %v3192_v61  ;;  %v13046_v57 = vld [vmem:[%s17232_s3 + $0x120] sm:$0xff]   ;;  %v14714_v24 = vpack.c.bf16 %v14638_v58, %v14638_v58 }
 0x22f   :  { %v14659_v39 = vpop.f32.mrb[170].mxu1  ;;  %11848 = vmatpush3.bf16.msra.mxu0 %v13040_v15  ;;  %11754 = vmatpush3.bf16.msra.mxu1 %v13041_v3  ;;  %v3199_v15 = vrot.slane %v2363_v27, 6  ;;  %v3191_v31 = vsel %vm14522_vm6, %v3185_v63, %v3190_v34 }
 0x230   :  { %v14661_v45 = vpop.f32.mrb[171].mxu1  ;;  %17721 = vst [vmem:[#allocation55_spill] sm:$0xff] %v14672_v56  ;;  %11849 = vmatprep.subr.bf16.mxu0 %v13042_v17  ;;  %11755 = vmatprep.subr.bf16.mxu1 %v13043_v16  ;;  %v14693_v54 = vsel %vm14469_vm3, %v2361_v32, %v2365_v8  ;;  %v3195_v41 = vrot.slane %v3194_v47, 4  ;;  %v14708_v8 = vcombine.low %v14619_v11, %v3191_v31  ;;  %17725 = vst [vmem:[#allocation59_spill] sm:$0xff] %v14714_v24 }
 0x231   :  { %17722 = vst [vmem:[#allocation56_spill] sm:$0xff] %v14693_v54  ;;  %v3200_v61 = vor.u32 %v3199_v15, %v3198_v2  ;;  %v14705_v37 = vcombine.low %v2352_v25, %v14693_v54  ;;  %v2371_v11 = vshll.u32 %v14665_v42, 16  ;;  %v17727_v32 = vmax.f32 %v14611_v23, 0.0  ;;  %v13049_v23 = vld [vmem:[%s17232_s3 + $0x30] sm:$0xff]  }
 0x232   :  { %17724 = vst [vmem:[#allocation58_spill] sm:$0xff] %v14708_v8  ;;  %v2377_v2 = vshll.u32 %v14667_v48, 16 }
 0x233   :  { %11850 = vmatpush3.bf16.msra.mxu0 %v13042_v17  ;;  %17723 = vst [vmem:[#allocation57_spill] sm:$0xff] %v14705_v37  ;;  %11756 = vmatpush3.bf16.msra.mxu1 %v13043_v16  ;;  %v2368_v17 = vshrl.u32 %v14665_v42, 16  ;;  %v14722_v25 = vsel %vm14522_vm6, %v3195_v41, %v3200_v61  ;;  %v14728_v16 = vpack.c.bf16 %v17727_v32, %v17727_v32  ;;  %v2373_v47 = vrot.slane %v2371_v11, 5  ;;  %v13048_v61 = vld [vmem:[%s17232_s3 + $0x128] sm:$0xff]  }
 0x234   :  { %11851 = vmatprep.subr.bf16.mxu0 %v13044_v33  ;;  %11757 = vmatprep.subr.bf16.mxu1 %v13045_v40  ;;  %17726 = vst [vmem:[#allocation60_spill] sm:$0xff] %v14722_v25  ;;  %v14731_v63 = vcombine.low %v3191_v31, %v14722_v25  ;;  %v3206_v41 = vshrl.u32 %v14667_v48, 16  ;;  %v2382_v31 = vshrl.u32 %v14714_v24, 16  ;;  %v2385_v32 = vshll.u32 %v14714_v24, 16 }
 0x235   :  { %v14686_v3 = vpop.f32.mrb[172].mxu1  ;;  %11737 = vmatprep.mubr.bf16.mxu1 %v14705_v37  ;;  %17728 = vst [vmem:[#allocation61_spill] sm:$0xff] %v14728_v16  ;;  %v2370_v15 = vrot.slane %v2368_v17, 4  ;;  %v2379_v22 = vrot.slane %v2377_v2, 5  ;;  %v2391_v19 = vshll.u32 %v14728_v16, 16  ;;  %v3203_v56 = vrot.slane %v2371_v11, 6 }
 0x236   :  { %v14699_v30 = vpop.f32.mrb[173].mxu1  ;;  %17729 = vst [vmem:[#allocation62_spill] sm:$0xff] %v14731_v63  ;;  %11833 = vmatprep.mubr.bf16.mxu0 %v14731_v63  ;;  %v2384_v27 = vrot.slane %v2382_v31, 4  ;;  %v2387_v25 = vrot.slane %v2385_v32, 5  ;;  %v3202_v63 = vrot.slane %v2368_v17, 5  ;;  %v3208_v50 = vrot.slane %v3206_v41, 5 }
 0x237   :  { %v14710_v28 = vpop.f32.mrb[174].mxu1  ;;  %11852 = vmatpush3.bf16.msra.mxu0 %v13044_v33  ;;  %11758 = vmatpush3.bf16.msra.mxu1 %v13045_v40  ;;  %v2374_v33 = vor.u32 %v2373_v47, %v2370_v15  ;;  %v3216_v40 = vshrl.u32 %v14728_v16, 16  ;;  %v13050_v15 = vld [vmem:[%s17232_s3 + $0x130] sm:$0xff]   ;;  %v2393_v47 = vrot.slane %v2391_v19, 5  ;;  %v3209_v38 = vrot.slane %v2377_v2, 6 }
 0x238   :  { %v14717_v34 = vpop.f32.mrb[175].mxu1  ;;  %11853 = vmatprep.subr.bf16.mxu0 %v13046_v57  ;;  %11759 = vmatprep.subr.bf16.mxu1 %v13047_v55  ;;  %v3212_v20 = vrot.slane %v2382_v31, 5  ;;  %v3204_v11 = vor.u32 %v3203_v56, %v3202_v63  ;;  %v3219_v35 = vrot.slane %v2391_v19, 6  ;;  %v2035_v2 = vmax.f32 %v14279_v7, %v14645_v53  ;;  %v13052_v56 = vld [vmem:[%s17232_s3 + $0x138] sm:$0xff]  }
 0x239   :  { %v2375_v8 = vrot.slane %v2374_v33, 4  ;;  %v3213_v33 = vrot.slane %v2385_v32, 6  ;;  %v3210_v44 = vor.u32 %v3209_v38, %v3208_v50  ;;  %v3218_v0 = vrot.slane %v3216_v40, 5 }
 0x23a   :  { %v3205_v31 = vrot.slane %v3204_v11, 4  ;;  %v2033_v24 = vmax.f32 %v14284_v10, %v14652_v59  ;;  %v2036_v38 = vmax.f32 %v14289_v5, %v14659_v39  ;;  %v2034_v7 = vmax.f32 %v14294_v43, %v14661_v45  ;;  %v17744_v11 = vld [vmem:[#allocation22_spill] sm:$0xff] }
 0x23b   :  { %11854 = vmatpush3.bf16.msra.mxu0 %v13046_v57  ;;  %11760 = vmatpush3.bf16.msra.mxu1 %v13047_v55  ;;  %v13051_v57 = vld [vmem:[%s17232_s3 + $0x38] sm:$0xff]   ;;  %v14762_v17 = vsel %vm14469_vm3, %v2375_v8, %v2379_v22  ;;  %v2388_v55 = vor.u32 %v2387_v25, %v2384_v27  ;;  %v3214_v4 = vor.u32 %v3213_v33, %v3212_v20  ;;  %v14778_v20 = vld [vmem:[%s17232_s3 + $0x80] sm:$0xff]  }
 0x23c   :  { %11855 = vmatprep.subr.bf16.mxu0 %v13048_v61  ;;  %11761 = vmatprep.subr.bf16.mxu1 %v13049_v23  ;;  %17730 = vst [vmem:[#allocation63_spill] sm:$0xff] %v14762_v17  ;;  %v3220_v22 = vor.u32 %v3219_v35, %v3218_v0  ;;  %17731 = vst [vmem:[#allocation64_spill] sm:$0xff] %v14778_v20  ;;  %v14786_v59 = vsel %vm14522_vm6, %v3205_v31, %v3210_v44 }
 0x23d   :  { %v14744_v60 = vpop.f32.mrb[176].mxu1  ;;  %v2389_v41 = vrot.slane %v2388_v55, 4  ;;  %17733 = vst [vmem:[#allocation66_spill] sm:$0xff] %v14786_v59  ;;  %v3215_v0 = vrot.slane %v3214_v4, 4  ;;  %v2088_v5 = vadd.f32 %v14411_v1, %v2033_v24  ;;  %v2090_v43 = vadd.f32 %v14411_v1, %v2035_v2 }
 0x23e   :  { %v14748_v37 = vpop.f32.mrb[177].mxu1  ;;  %v2091_v35 = vadd.f32 %v14411_v1, %v2036_v38  ;;  %v2089_v50 = vadd.f32 %v14411_v1, %v2034_v7  ;;  %v2039_v19 = vmax.f32 %v14299_v21, %v14686_v3  ;;  %v2037_v27 = vmax.f32 %v14304_v52, %v14699_v30  ;;  %v14823_v21 = vld [vmem:[%s17232_s3 + $0x140] sm:$0xff]  }
 0x23f   :  { %v14750_v54 = vpop.f32.mrb[178].mxu1  ;;  %11856 = vmatpush3.bf16.msra.mxu0 %v13048_v61  ;;  %11762 = vmatpush3.bf16.msra.mxu1 %v13049_v23  ;;  %v14782_v10 = vsel %vm14469_vm3, %v2389_v41, %v2393_v47  ;;  %v14802_v4 = vsel %vm14522_vm6, %v3215_v0, %v3220_v22  ;;  %v14804_v44 = vmax.f32 %v2088_v5, 0.0  ;;  %17738 = vst [vmem:[#allocation71_spill] sm:$0xff] %v14823_v21  ;;  %v14837_v40 = vmax.f32 %v2090_v43, 0.0 }
 0x240   :  { %v14755_v51 = vpop.f32.mrb[179].mxu1  ;;  %11857 = vmatprep.subr.bf16.mxu0 %v13050_v15  ;;  %11763 = vmatprep.subr.bf16.mxu1 %v13051_v57  ;;  %17732 = vst [vmem:[#allocation65_spill] sm:$0xff] %v14782_v10  ;;  %v14793_v45 = vcombine.low %v14762_v17, %v14782_v10  ;;  %17735 = vst [vmem:[#allocation68_spill] sm:$0xff] %v14802_v4  ;;  %v14815_v24 = vcombine.low %v14786_v59, %v14802_v4  ;;  %v2137_v3 = vmax.f32 %v2089_v50, 0.0 }
 0x241   :  { %17736 = vst [vmem:[#allocation69_spill] sm:$0xff] %v14804_v44  ;;  %v14827_v52 = vpack.c.bf16 %v14804_v44, %v14804_v44  ;;  %v2040_v30 = vmax.f32 %v14309_v18, %v14710_v28  ;;  %v2139_v63 = vmax.f32 %v2091_v35, 0.0  ;;  %v2094_v61 = vadd.f32 %v14411_v1, %v2039_v19  ;;  %17740 = vst [vmem:[#allocation73_spill] sm:$0xff] %v14837_v40  ;;  %v17755_v44 = vld [vmem:[#allocation24_spill] sm:$0xff] }
 0x242   :  { %17734 = vst [vmem:[#allocation67_spill] sm:$0xff] %v14793_v45  ;;  %11738 = vmatmul.mubr.bf16.gmra.mrb[196].mxu1 %v14793_v45  ;;  %17737 = vst [vmem:[#allocation70_spill] sm:$0xff] %v14815_v24  ;;  %11834 = vmatmul.mubr.bf16.gmra.mrb[4].mxu0 %v14815_v24  ;;  %v2038_v23 = vmax.f32 %v14314_v12, %v14717_v34  ;;  %v2043_v32 = vmax.f32 %v14319_v29, %v14744_v60  ;;  %v17743_v60 = vld [vmem:[#allocation3_spill] sm:$0xff] }
 0x243   :  { %11858 = vmatpush3.bf16.msra.mxu0 %v13050_v15  ;;  %11764 = vmatpush3.bf16.msra.mxu1 %v13051_v57  ;;  %17739 = vst [vmem:[#allocation72_spill] sm:$0xff] %v14827_v52  ;;  %v2396_v15 = vshrl.u32 %v14827_v52, 16  ;;  %v2399_v47 = vshll.u32 %v14827_v52, 16  ;;  %v2092_v57 = vadd.f32 %v14411_v1, %v2037_v27  ;;  %v14843_v18 = vpack.c.bf16 %v2137_v3, %v2137_v3 }
 0x244   :  { %11859 = vmatprep.subr.bf16.mxu0 %v13052_v56  ;;  %11781 = vmatprep.subr.bf16.mxu1 %v14778_v20  ;;  %v2041_v28 = vmax.f32 %v14324_v6, %v14748_v37  ;;  %v14849_v34 = vpack.c.bf16 %v2139_v63, %v2139_v63  ;;  %v14851_v29 = vmax.f32 %v2094_v61, 0.0  ;;  %v2044_v55 = vmax.f32 %v17743_v60, %v14750_v54 }
 0x245   :  { %v14789_v39 = vpop.f32.mrb[180].mxu1  ;;  %17741 = vst [vmem:[#allocation74_spill] sm:$0xff] %v14843_v18  ;;  %v2042_v33 = vmax.f32 %v17744_v11, %v14755_v51  ;;  %v14861_v41 = vpack.c.bf16 %v14837_v40, %v14837_v40  ;;  %v14863_v31 = vmax.f32 %v2092_v57, 0.0  ;;  %v2398_v6 = vrot.slane %v2396_v15, 4 }
 0x246   :  { %v14798_v53 = vpop.f32.mrb[181].mxu1  ;;  %17742 = vst [vmem:[#allocation75_spill] sm:$0xff] %v14851_v29  ;;  %v2401_v37 = vrot.slane %v2399_v47, 5  ;;  %v2095_v22 = vadd.f32 %v14411_v1, %v2040_v30  ;;  %v2093_v54 = vadd.f32 %v14411_v1, %v2038_v23  ;;  %v2405_v51 = vshll.u32 %v14843_v18, 16 }
 0x247   :  { %v14810_v8 = vpop.f32.mrb[182].mxu1  ;;  %11860 = vmatpush3.bf16.msra.mxu0 %v13052_v56  ;;  %17745 = vst [vmem:[#allocation3_spill] sm:$0xff] %v14861_v41  ;;  %17746 = vst [vmem:[#allocation22_spill] sm:$0xff] %v14863_v31  ;;  %v3236_v0 = vshrl.u32 %v14849_v34, 16  ;;  %v3226_v5 = vshrl.u32 %v14843_v18, 16  ;;  %v14876_v43 = vpack.c.bf16 %v14851_v29, %v14851_v29  ;;  %v14880_v35 = vpack.c.bf16 %v14863_v31, %v14863_v31 }
 0x248   :  { %v14817_v25 = vpop.f32.mrb[183].mxu1  ;;  %11877 = vmatprep.subr.bf16.mxu0 %v14823_v21  ;;  %v2402_v7 = vor.u32 %v2401_v37, %v2398_v6  ;;  %v2098_v50 = vadd.f32 %v14411_v1, %v2043_v32  ;;  %v2410_v27 = vshrl.u32 %v14861_v41, 16  ;;  %v2143_v3 = vmax.f32 %v2095_v22, 0.0 }
 0x249   :  { %17748 = vst [vmem:[#allocation77_spill] sm:$0xff] %v14876_v43  ;;  %17749 = vst [vmem:[#allocation78_spill] sm:$0xff] %v14880_v35  ;;  %v2407_v30 = vrot.slane %v2405_v51, 5  ;;  %v2413_v63 = vshll.u32 %v14861_v41, 16  ;;  %v2419_v61 = vshll.u32 %v14849_v34, 16  ;;  %v2141_v23 = vmax.f32 %v2093_v54, 0.0 }
 0x24a   :  { %v2403_v19 = vrot.slane %v2402_v7, 4  ;;  %v2412_v57 = vrot.slane %v2410_v27, 4  ;;  %v3222_v60 = vrot.slane %v2396_v15, 5  ;;  %v3223_v11 = vrot.slane %v2399_v47, 6 }
 0x24b   :  { %v2096_v37 = vadd.f32 %v14411_v1, %v2041_v28  ;;  %v2415_v7 = vrot.slane %v2413_v63, 5  ;;  %v2421_v24 = vrot.slane %v2419_v61, 5  ;;  %v3228_v4 = vrot.slane %v3226_v5, 5 }
 0x24c   :  { %v2408_v32 = vsel %vm14469_vm3, %v2403_v19, %v2407_v30  ;;  %v3224_v22 = vor.u32 %v3223_v11, %v3222_v60  ;;  %v3229_v59 = vrot.slane %v2405_v51, 6  ;;  %v3232_v10 = vrot.slane %v2410_v27, 5  ;;  %v17754_v19 = vld [vmem:[#allocation23_spill] sm:$0xff]  ;;  %v17756_v27 = vld [vmem:[#allocation4_spill] sm:$0xff] }
 0x24d   :  { %v14847_v12 = vpop.f32.mrb[184].mxu1  ;;  %v2416_v54 = vor.u32 %v2415_v7, %v2412_v57  ;;  %v3233_v15 = vrot.slane %v2413_v63, 6  ;;  %v3238_v47 = vrot.slane %v3236_v0, 5  ;;  %v3239_v29 = vrot.slane %v2419_v61, 6 }
 0x24e   :  { %v14857_v2 = vpop.f32.mrb[185].mxu1  ;;  %v3225_v28 = vrot.slane %v3224_v22, 4  ;;  %v3230_v40 = vor.u32 %v3229_v59, %v3228_v4  ;;  %v2045_v21 = vmax.f32 %v17755_v44, %v14798_v53  ;;  %v14903_v57 = vpack.c.bf16 %v2143_v3, %v2143_v3  ;;  %v17759_v59 = vld [vmem:[#allocation25_spill] sm:$0xff] }
 0x24f   :  { %v14865_v56 = vpop.f32.mrb[186].mxu1  ;;  %v2417_v60 = vrot.slane %v2416_v54, 4  ;;  %v3234_v5 = vor.u32 %v3233_v15, %v3232_v10  ;;  %v3240_v51 = vor.u32 %v3239_v29, %v3238_v47  ;;  %v14905_v0 = vpack.c.bf16 %v2141_v23, %v2141_v23 }
 0x250   :  { %17747 = vst [vmem:[#allocation76_spill] sm:$0xff] %v14865_v56  ;;  %v14868_v38 = vpop.f32.mrb[187].mxu1  ;;  %17757 = vst [vmem:[#allocation23_spill] sm:$0xff] %v14903_v57  ;;  %v2099_v63 = vadd.f32 %v14411_v1, %v2044_v55  ;;  %v3231_v10 = vsel %vm14522_vm6, %v3225_v28, %v3230_v40  ;;  %v2424_v44 = vshrl.u32 %v14880_v35, 16  ;;  %v2097_v29 = vadd.f32 %v14411_v1, %v2042_v33 }
 0x251   :  { %17758 = vst [vmem:[#allocation24_spill] sm:$0xff] %v14905_v0  ;;  %v14912_v61 = vsel %vm14469_vm3, %v2417_v60, %v2421_v24  ;;  %v3235_v53 = vrot.slane %v3234_v5, 4  ;;  %v14919_v23 = vmax.f32 %v2096_v37, 0.0  ;;  %v2427_v24 = vshll.u32 %v14880_v35, 16 }
 0x252   :  { %17760 = vst [vmem:[#allocation4_spill] sm:$0xff] %v14912_v61  ;;  %v9873_v3 = vcombine.low %v2408_v32, %v14912_v61  ;;  %v2426_v7 = vrot.slane %v2424_v44, 4  ;;  %v3256_v22 = vshrl.u32 %v14903_v57, 16  ;;  %v3246_v40 = vshrl.u32 %v14905_v0, 16 }
 0x253   :  { %17761 = vst [vmem:[#allocation25_spill] sm:$0xff] %v14919_v23  ;;  %v14923_v55 = vsel %vm14522_vm6, %v3235_v53, %v3240_v51  ;;  %v14928_v54 = vmax.f32 %v2098_v50, 0.0  ;;  %v2147_v33 = vmax.f32 %v2099_v63, 0.0  ;;  %v2429_v32 = vrot.slane %v2427_v24, 5  ;;  %v14942_v51 = vld [vmem:[%s17233_s2] ss:$0 sm:$0xff] }
 0x254   :  { %17762 = vst [vmem:[#allocation83_spill] sm:$0xff] %v14923_v55  ;;  %11741 = vmatprep.mubr.bf16.mxu1 %v9873_v3  ;;  %v9969_v1 = vcombine.low %v3231_v10, %v14923_v55  ;;  %v2433_v37 = vshll.u32 %v14905_v0, 16  ;;  %v2438_v15 = vshrl.u32 %v14876_v43, 16  ;;  %v2145_v47 = vmax.f32 %v2097_v29, 0.0 }
 0x255   :  { %v14886_v6 = vpop.f32.mrb[188].mxu1  ;;  %v2441_v28 = vshll.u32 %v14876_v43, 16  ;;  %v2447_v60 = vshll.u32 %v14903_v57, 16  ;;  %v3242_v5 = vrot.slane %v2424_v44, 5  ;;  %v14937_v50 = vpack.c.bf16 %v14919_v23, %v14919_v23 }
 0x256   :  { %17750 = vst [vmem:[#allocation79_spill] sm:$0xff] %v14886_v6  ;;  %v14891_v45 = vpop.f32.mrb[189].mxu1  ;;  %11837 = vmatprep.mubr.bf16.mxu0 %v9969_v1  ;;  %v2100_v63 = vadd.f32 %v14942_v51, %v2045_v21  ;;  %v2430_v10 = vor.u32 %v2429_v32, %v2426_v7  ;;  %v2440_v53 = vrot.slane %v2438_v15, 4  ;;  %v2435_v29 = vrot.slane %v2433_v37, 5  ;;  %v17764_v7 = vld [vmem:[#allocation26_spill] sm:$0xff] }
 0x257   :  { %17751 = vst [vmem:[#allocation80_spill] sm:$0xff] %v14891_v45  ;;  %v14893_v17 = vpop.f32.mrb[190].mxu1  ;;  %v2443_v3 = vrot.slane %v2441_v28, 5  ;;  %v2449_v1 = vrot.slane %v2447_v60, 5  ;;  %v3243_v4 = vrot.slane %v2427_v24, 6  ;;  %v3248_v30 = vrot.slane %v3246_v40, 5 }
 0x258   :  { %17752 = vst [vmem:[#allocation81_spill] sm:$0xff] %v14893_v17  ;;  %v14895_v31 = vpop.f32.mrb[191].mxu1  ;;  %v2431_v11 = vrot.slane %v2430_v10, 4  ;;  %v3249_v44 = vrot.slane %v2433_v37, 6  ;;  %v3252_v55 = vrot.slane %v2438_v15, 5  ;;  %v3253_v43 = vrot.slane %v2441_v28, 6 }
 0x259   :  { %17753 = vst [vmem:[#allocation82_spill] sm:$0xff] %v14895_v31  ;;  %v2444_v61 = vor.u32 %v2443_v3, %v2440_v53  ;;  %v3244_v23 = vor.u32 %v3243_v4, %v3242_v5  ;;  %v3258_v35 = vrot.slane %v3256_v22, 5  ;;  %v3259_v21 = vrot.slane %v2447_v60, 6  ;;  %v17765_v40 = vld [vmem:[#allocation27_spill] sm:$0xff] }
 0x25a   :  { %v14947_v57 = vsel %vm14469_vm3, %v2431_v11, %v2435_v29  ;;  %v3250_v0 = vor.u32 %v3249_v44, %v3248_v30  ;;  %v3254_v24 = vor.u32 %v3253_v43, %v3252_v55  ;;  %v14953_v15 = vpack.c.bf16 %v2147_v33, %v2147_v33  ;;  %v17767_v11 = vld [vmem:[#allocation28_spill] sm:$0xff] }
 0x25b   :  { %17763 = vst [vmem:[#allocation84_spill] sm:$0xff] %v14947_v57  ;;  %v2445_v41 = vrot.slane %v2444_v61, 4  ;;  %v3245_v20 = vrot.slane %v3244_v23, 4  ;;  %v3260_v4 = vor.u32 %v3259_v21, %v3258_v35  ;;  %v14959_v30 = vpack.c.bf16 %v2145_v47, %v2145_v47 }
 0x25c   :  { %v3255_v61 = vrot.slane %v3254_v24, 4  ;;  %v14971_v35 = vpack.c.bf16 %v14928_v54, %v14928_v54  ;;  %v17770_v23 = vmax.f32 %v17754_v19, %v14789_v39  ;;  %v17771_v33 = vmax.f32 %v17756_v27, %v14810_v8 }
 0x25d   :  { %v14963_v60 = vsel %vm14469_vm3, %v2445_v41, %v2449_v1  ;;  %v14967_v43 = vsel %vm14522_vm6, %v3245_v20, %v3250_v0  ;;  %v14985_v20 = vmax.f32 %v2100_v63, 0.0  ;;  %v2452_v10 = vshrl.u32 %v14937_v50, 16 }
 0x25e   :  { %17768 = vst [vmem:[#allocation26_spill] sm:$0xff] %v14963_v60  ;;  %17769 = vst [vmem:[#allocation27_spill] sm:$0xff] %v14967_v43  ;;  %v2102_v55 = vadd.f32 %v14942_v51, %v17770_v23  ;;  %v2103_v41 = vadd.f32 %v14942_v51, %v17771_v33  ;;  %v14983_v47 = vcombine.low %v14947_v57, %v14963_v60  ;;  %v2455_v39 = vshll.u32 %v14937_v50, 16 }
 0x25f   :  { %17773 = vst [vmem:[#allocation85_spill] sm:$0xff] %v14985_v20  ;;  %v14989_v0 = vsel %vm14522_vm6, %v3255_v61, %v3260_v4  ;;  %v3276_v19 = vshrl.u32 %v14953_v15, 16  ;;  %v17775_v8 = vmax.f32 %v17759_v59, %v14817_v25  ;;  %v3266_v53 = vshrl.u32 %v14959_v30, 16 }
 0x260   :  { %17772 = vst [vmem:[#allocation28_spill] sm:$0xff] %v14983_v47  ;;  %17774 = vst [vmem:[#allocation86_spill] sm:$0xff] %v14989_v0  ;;  %11742 = vmatmul.mubr.bf16.gmra.mrb[200].mxu1 %v14983_v47  ;;  %v15001_v63 = vcombine.low %v14967_v43, %v14989_v0  ;;  %v2454_v29 = vrot.slane %v2452_v10, 4  ;;  %v2457_v3 = vrot.slane %v2455_v39, 5  ;;  %v2461_v1 = vshll.u32 %v14959_v30, 16 }
 0x261   :  { %v2101_v27 = vadd.f32 %v14942_v51, %v17775_v8  ;;  %v15005_v44 = vmax.f32 %v2102_v55, 0.0  ;;  %v2151_v21 = vmax.f32 %v2103_v41, 0.0  ;;  %v2466_v25 = vshrl.u32 %v14971_v35, 16 }
 0x262   :  { %17776 = vst [vmem:[#allocation87_spill] sm:$0xff] %v15001_v63  ;;  %11838 = vmatmul.mubr.bf16.gmra.mrb[8].mxu0 %v15001_v63  ;;  %v2469_v59 = vshll.u32 %v14971_v35, 16  ;;  %v15012_v24 = vpack.c.bf16 %v14985_v20, %v14985_v20  ;;  %v2458_v4 = vor.u32 %v2457_v3, %v2454_v29  ;;  %v2475_v61 = vshll.u32 %v14953_v15, 16 }
 0x263   :  { %17777 = vst [vmem:[#allocation88_spill] sm:$0xff] %v15005_v44  ;;  %v3262_v23 = vrot.slane %v2452_v10, 5  ;;  %v2149_v33 = vmax.f32 %v2101_v27, 0.0  ;;  %v2463_v8 = vrot.slane %v2461_v1, 5  ;;  %v2468_v28 = vrot.slane %v2466_v25, 4 }
 0x264   :  { %v2471_v55 = vrot.slane %v2469_v59, 5  ;;  %v2459_v32 = vrot.slane %v2458_v4, 4  ;;  %v2477_v41 = vrot.slane %v2475_v61, 5  ;;  %v3263_v5 = vrot.slane %v2455_v39, 6 }
 0x265   :  { %v3268_v37 = vrot.slane %v3266_v53, 5  ;;  %v3269_v47 = vrot.slane %v2461_v1, 6  ;;  %v3272_v0 = vrot.slane %v2466_v25, 5  ;;  %v3273_v43 = vrot.slane %v2469_v59, 6 }
 0x266   :  { %v2472_v63 = vor.u32 %v2471_v55, %v2468_v28  ;;  %v15017_v57 = vsel %vm14469_vm3, %v2459_v32, %v2463_v8  ;;  %v3264_v29 = vor.u32 %v3263_v5, %v3262_v23  ;;  %v3278_v3 = vrot.slane %v3276_v19, 5 }
 0x267   :  { %17778 = vst [vmem:[#allocation89_spill] sm:$0xff] %v15017_v57  ;;  %v3279_v20 = vrot.slane %v2475_v61, 6  ;;  %v3270_v27 = vor.u32 %v3269_v47, %v3268_v37  ;;  %v3274_v60 = vor.u32 %v3273_v43, %v3272_v0  ;;  %v15025_v59 = vpack.c.bf16 %v2149_v33, %v2149_v33 }
 0x268   :  { %v2473_v10 = vrot.slane %v2472_v63, 4  ;;  %v3265_v22 = vrot.slane %v3264_v29, 4  ;;  %v15035_v47 = vpack.c.bf16 %v15005_v44, %v15005_v44  ;;  %v15050_v63 = vpack.c.bf16 %v2151_v21, %v2151_v21  ;;  %v17788_v29 = vld [vmem:[#allocation37_spill] sm:$0xff] }
 0x269   :  { %v3280_v39 = vor.u32 %v3279_v20, %v3278_v3  ;;  %v3275_v5 = vrot.slane %v3274_v60, 4  ;;  %v2480_v60 = vshrl.u32 %v15012_v24, 16  ;;  %v2483_v23 = vshll.u32 %v15012_v24, 16 }
 0x26a   :  { %v15029_v32 = vsel %vm14469_vm3, %v2473_v10, %v2477_v41  ;;  %v15043_v0 = vsel %vm14522_vm6, %v3265_v22, %v3270_v27  ;;  %v2489_v22 = vshll.u32 %v15025_v59, 16  ;;  %v3286_v8 = vshrl.u32 %v15025_v59, 16 }
 0x26b   :  { %17782 = vst [vmem:[#allocation90_spill] sm:$0xff] %v15029_v32  ;;  %v15039_v20 = vcombine.low %v15017_v57, %v15029_v32  ;;  %17785 = vst [vmem:[#allocation92_spill] sm:$0xff] %v15043_v0  ;;  %v15047_v19 = vsel %vm14522_vm6, %v3275_v5, %v3280_v39  ;;  %v2482_v33 = vrot.slane %v2480_v60, 4  ;;  %v2485_v55 = vrot.slane %v2483_v23, 5 }
 0x26c   :  { %17786 = vst [vmem:[#allocation93_spill] sm:$0xff] %v15047_v19  ;;  %v15055_v61 = vcombine.low %v15043_v0, %v15047_v19  ;;  %v2494_v21 = vshrl.u32 %v15035_v47, 16  ;;  %v9984_v41 = vrot.slane %v14460_v13, 10  ;;  %v9983_v3 = vrot.slane %v17788_v29, 10 }
 0x26d   :  { %17784 = vst [vmem:[#allocation91_spill] sm:$0xff] %v15039_v20  ;;  %11745 = vmatprep.mubr.bf16.mxu1 %v15039_v20  ;;  %v3529_v10 = vrot.slane %v14475_v62, 6  ;;  %v3525_v27 = vrot.slane %v14482_v49, 6  ;;  %v3296_v39 = vshrl.u32 %v15050_v63, 16  ;;  %v2486_v5 = vor.u32 %v2485_v55, %v2482_v33 }
 0x26e   :  { %17787 = vst [vmem:[#allocation94_spill] sm:$0xff] %v15055_v61  ;;  %11841 = vmatprep.mubr.bf16.mxu0 %v15055_v61  ;;  %v2496_v25 = vrot.slane %v2494_v21, 4  ;;  %v2497_v4 = vshll.u32 %v15035_v47, 16  ;;  %v2491_v43 = vrot.slane %v2489_v22, 5  ;;  %v2503_v53 = vshll.u32 %v15050_v63, 16 }
 0x26f   :  { %v3282_v61 = vrot.slane %v2480_v60, 5  ;;  %v3283_v20 = vrot.slane %v2483_v23, 6  ;;  %v2487_v0 = vrot.slane %v2486_v5, 4  ;;  %v3288_v1 = vrot.slane %v3286_v8, 5  ;;  %v17792_v23 = vld [vmem:[#allocation8_spill] sm:$0xff]  ;;  %v17794_v8 = vld [vmem:[#allocation33_spill] sm:$0xff] }
 0x270   :  { %v2499_v17 = vrot.slane %v2497_v4, 5  ;;  %v3289_v6 = vrot.slane %v2489_v22, 6  ;;  %v2505_v56 = vrot.slane %v2503_v53, 5  ;;  %v3292_v37 = vrot.slane %v2494_v21, 5 }
 0x271   :  { %v3284_v31 = vor.u32 %v3283_v20, %v3282_v61  ;;  %v3293_v45 = vrot.slane %v2497_v4, 6  ;;  %v15071_v28 = vsel %vm14469_vm3, %v2487_v0, %v2491_v43  ;;  %v3298_v19 = vrot.slane %v3296_v39, 5  ;;  %v17793_v4 = vld [vmem:[#allocation34_spill] sm:$0xff]  ;;  %v17795_v0 = vld [vmem:[#allocation36_spill] sm:$0xff] }
 0x272   :  { %v2500_v33 = vor.u32 %v2499_v17, %v2496_v25  ;;  %v3290_v55 = vor.u32 %v3289_v6, %v3288_v1  ;;  %v3299_v57 = vrot.slane %v2503_v53, 6  ;;  %v17789_v60 = vmov 0  ;;  %v17808_v39 = vld [vmem:[#allocation48_spill] sm:$0xff] }
 0x273   :  { %v3285_v44 = vrot.slane %v3284_v31, 4  ;;  %v3294_v32 = vor.u32 %v3293_v45, %v3292_v37  ;;  %v17790_v60 = vsel %vm15075_vm9, 4294967295, %v17789_v60  ;;  %v9981_v20 = vrot.slane %v17792_v23, 10 }
 0x274   :  { %17791 = vst [vmem:[#allocation37_spill] sm:$0xff] %v17790_v60  ;;  %v2501_v61 = vrot.slane %v2500_v33, 4  ;;  %v3517_v22 = vrot.slane %v17793_v4, 6  ;;  %v9982_v43 = vrot.slane %v17794_v8, 10  ;;  %v3521_v17 = vrot.slane %v17795_v0, 6  ;;  %v17983_v60 = vld [vmem:[#allocation84_spill] sm:$0xff] }
 0x275   :  { %v15085_v31 = vsel %vm14522_vm6, %v3285_v44, %v3290_v55  ;;  %v3295_v45 = vrot.slane %v3294_v32, 4  ;;  %v3300_v6 = vor.u32 %v3299_v57, %v3298_v19  ;;  %v15089_v53 = vsel %vm15075_vm9, %v9983_v3, %v3525_v27 }
 0x276   :  { %17796 = vst [vmem:[#allocation8_spill] sm:$0xff] %v15085_v31  ;;  %17797 = vst [vmem:[#allocation34_spill] sm:$0xff] %v15089_v53  ;;  %v15093_v1 = vsel %vm14469_vm3, %v2501_v61, %v2505_v56  ;;  %v3518_v25 = vsel %vm15075_vm9, %v9981_v20, %v3517_v22  ;;  %v15099_v37 = vsel %vm15075_vm9, %v9982_v43, %v3521_v17  ;;  %v3533_v5 = vrot.slane %v17808_v39, 6  ;;  %v17809_v20 = vld [vmem:[#allocation46_spill] sm:$0xff]  ;;  %v17811_v43 = vld [vmem:[#allocation17_spill] sm:$0xff] }
 0x277   :  { %17798 = vst [vmem:[#allocation33_spill] sm:$0xff] %v15093_v1  ;;  %17799 = vst [vmem:[#allocation36_spill] sm:$0xff] %v15099_v37  ;;  %v3530_v44 = vsel %vm15075_vm9, %v9984_v41, %v3529_v10  ;;  %v17800_v57 = vmax.f32 %v14244_v14, %v14531_v46  ;;  %v15109_v19 = vcombine.low %v15071_v28, %v15093_v1  ;;  %v17805_v41 = vld [vmem:[#allocation7_spill] sm:$0xff]  ;;  %v17806_v10 = vld [vmem:[#allocation32_spill] sm:$0xff]  ;;  %v3537_v61 = vrot.slane %v17809_v20, 6 }
 0x278   :  { %v15113_v56 = vsel %vm14522_vm6, %v3295_v45, %v3300_v6  ;;  %v15116_v21 = vcombine.low %v15089_v53, %v3530_v44  ;;  %v10782_v14 = vpack.c.bf16 %v17806_v10, %v17805_v41  ;;  %v17807_v46 = vld [vmem:[#allocation44_spill] sm:$0xff]  ;;  %v10013_v33 = vcombine.low %v3518_v25, %v15099_v37  ;;  %v17815_v41 = vld [vmem:[#allocation9_spill] sm:$0xff]  ;;  %v17824_v1 = vld [vmem:[#allocation18_spill] sm:$0xff] }
 0x279   :  { %v2080_v32 = vadd.f32 %v14942_v51, %v17800_v57  ;;  %17801 = vst [vmem:[#allocation95_spill] sm:$0xff] %v15109_v19  ;;  %17802 = vst [vmem:[#allocation96_spill] sm:$0xff] %v15113_v56  ;;  %v15120_v3 = vcombine.low %v15085_v31, %v15113_v56  ;;  %v9985_v27 = vrot.slane %v17807_v46, 10  ;;  %11746 = vmatmul.mubr.bf16.gmra.mrb[204].mxu1 %v15109_v19  ;;  %v17812_v17 = vld [vmem:[#allocation12_spill] sm:$0xff]  ;;  %v9904_v25 = vrot.slane %v14460_v13, 9 }
 0x27a   :  { %17803 = vst [vmem:[#allocation97_spill] sm:$0xff] %v15116_v21  ;;  %11765 = vmatprep.mubr.bf16.mxu1 %v10782_v14  ;;  %v17813_v45 = vmax.f32 %v17811_v43, %v17812_v17  ;;  %v17816_v14 = vld [vmem:[#allocation35_spill] sm:$0xff]  ;;  %v2879_v19 = vrot.slane %v14475_v62, 5  ;;  %v2875_v43 = vrot.slane %v14482_v49, 5  ;;  %v17819_v17 = vld [vmem:[#allocation41_spill] sm:$0xff]  ;;  %v17826_v56 = vmax.f32 %v17824_v1, %v17825_v26 }
 0x27b   :  { %17804 = vst [vmem:[#allocation98_spill] sm:$0xff] %v15120_v3  ;;  %11842 = vmatmul.mubr.bf16.gmra.mrb[12].mxu0 %v15120_v3  ;;  %v3534_v55 = vsel %vm15075_vm9, %v9985_v27, %v3533_v5  ;;  %v15132_v22 = vmax.f32 %v2080_v32, 0.0  ;;  %v15145_v3 = vpack.c.bf16 %v17816_v14, %v17815_v41  ;;  %v17818_v27 = vld [vmem:[#allocation43_spill] sm:$0xff]  ;;  %v9903_v32 = vrot.slane %v17788_v29, 9 }
 0x27c   :  { %v15138_v6 = vadd.f32 %v14942_v51, %v17813_v45  ;;  %11861 = vmatprep.mubr.bf16.mxu0 %v10013_v33  ;;  %v15140_v57 = vcombine.low %v3530_v44, %v3534_v55  ;;  %v9986_v5 = vrot.slane %v17818_v27, 10  ;;  %v15153_v33 = vpack.c.bf16 %v17819_v17, %v17816_v14  ;;  %v17821_v44 = vld [vmem:[#allocation16_spill] sm:$0xff] }
 0x27d   :  { %17810 = vst [vmem:[#allocation7_spill] sm:$0xff] %v15132_v22  ;;  %17817 = vst [vmem:[#allocation44_spill] sm:$0xff] %v15145_v3  ;;  %v17822_v45 = vld [vmem:[#allocation40_spill] sm:$0xff]  ;;  %v15165_v9 = vadd.f32 %v14942_v51, %v17826_v56  ;;  %v3541_v49 = vrot.slane %v14667_v48, 6  ;;  %v15174_v29 = vpack.c.bf16 %v15132_v22, %v15132_v22  ;;  %v17829_v1 = vmax.f32 %v17767_v11, %v14868_v38  ;;  %v13056_v11 = vld [vmem:[%s17232_s3 + $0x148] sm:$0xff]  }
 0x27e   :  { %17814 = vst [vmem:[#allocation32_spill] sm:$0xff] %v15140_v57  ;;  %17820 = vst [vmem:[#allocation48_spill] sm:$0xff] %v15153_v33  ;;  %v17823_v13 = vmax.f32 %v17821_v44, %v17822_v45  ;;  %v15169_v62 = vsel %vm15075_vm9, %v9986_v5, %v3537_v61  ;;  %v17828_v44 = vmax.f32 %v17765_v40, %v14857_v2  ;;  %v17830_v61 = vld [vmem:[#allocation39_spill] sm:$0xff]  ;;  %v3545_v2 = vrot.slane %v14728_v16, 6 }
 0x27f   :  { %17827 = vst [vmem:[#allocation46_spill] sm:$0xff] %v15169_v62  ;;  %v15187_v56 = vadd.f32 %v14942_v51, %v17829_v1  ;;  %v15191_v5 = vpack.c.bf16 %v17830_v61, %v17819_v17  ;;  %v13055_v45 = vld [vmem:[%s17232_s3 + $0x88] sm:$0xff]   ;;  %v3549_v40 = vrot.slane %v14843_v18, 6  ;;  %v15201_v38 = vcombine.low %v3534_v55, %v15169_v62 }
 0x280   :  { %v15159_v57 = vadd.f32 %v14942_v51, %v17823_v13  ;;  %v15181_v26 = vadd.f32 %v14942_v51, %v17828_v44  ;;  %v9987_v13 = vrot.slane %v14665_v42, 10  ;;  %v15208_v17 = vpack.c.bf16 %v14638_v58, %v14641_v36  ;;  %v17834_v44 = vld [vmem:[#allocation59_spill] sm:$0xff]  ;;  %v17836_v58 = vld [vmem:[#allocation64_spill] sm:$0xff] }
 0x281   :  { %17831 = vst [vmem:[#allocation17_spill] sm:$0xff] %v15191_v5  ;;  %11766 = vmatmul.mubr.bf16.vlgmr.msra.gmra.mrb[192].mxu1 %v15145_v3  ;;  %17832 = vst [vmem:[#allocation12_spill] sm:$0xff] %v15201_v38  ;;  %v9988_v1 = vrot.slane %v17834_v44, 10  ;;  %v3553_v14 = vrot.slane %v14849_v34, 6  ;;  %v9989_v3 = vrot.slane %v14827_v52, 10  ;;  %v9995_v22 = vrot.slane %v15012_v24, 10 }
 0x282   :  { %17833 = vst [vmem:[#allocation9_spill] sm:$0xff] %v15208_v17  ;;  %11769 = vmatprep.mubr.bf16.mxu1 %v15191_v5  ;;  %v15216_v55 = vsel %vm15075_vm9, %v9987_v13, %v3541_v49  ;;  %v3573_v33 = vrot.slane %v15025_v59, 6  ;;  %11782 = vmatpush3.bf16.msra.mxu1 %v17836_v58  ;;  %v17837_v62 = vld [vmem:[#allocation3_spill] sm:$0xff]  ;;  %v3577_v5 = vrot.slane %v15050_v63, 6  ;;  %v2129_v49 = vmax.f32 %v15165_v9, 0.0  ;;  %v13057_v52 = vld [vmem:[%s17232_s3 + $0x90] sm:$0xff]  }
 0x283   :  { %11862 = vmatmul.mubr.bf16.vlgmr.msra.gmra.mrb[0].mxu0 %v15116_v21  ;;  %17835 = vst [vmem:[#allocation35_spill] sm:$0xff] %v15216_v55  ;;  %v9990_v37 = vrot.slane %v17837_v62, 10  ;;  %v9996_v21 = vrot.slane %v15035_v47, 10  ;;  %v17838_v13 = vld [vmem:[#allocation71_spill] sm:$0xff]  ;;  %11783 = vmatprep.subr.bf16.mxu1 %v13055_v45  ;;  %v15233_v58 = vsel %vm15075_vm9, %v9988_v1, %v3545_v2  ;;  %v17844_v1 = vld [vmem:[#allocation24_spill] sm:$0xff]  ;;  %v3565_v31 = vrot.slane %v14959_v30, 6 }
 0x284   :  { %11865 = vmatprep.mubr.bf16.mxu0 %v15201_v38  ;;  %11878 = vmatpush3.bf16.msra.mxu0 %v17838_v13  ;;  %17839 = vst [vmem:[#allocation43_spill] sm:$0xff] %v15233_v58  ;;  %v3550_v38 = vsel %vm15075_vm9, %v9989_v3, %v3549_v40  ;;  %v15239_v53 = vsel %vm15075_vm9, %v9995_v22, %v3573_v33  ;;  %v13058_v13 = vld [vmem:[%s17232_s3 + $0x150] sm:$0xff]   ;;  %v3557_v3 = vrot.slane %v17844_v1, 6  ;;  %v17846_v40 = vld [vmem:[#allocation23_spill] sm:$0xff] }
 0x285   :  { %17840 = vst [vmem:[#allocation41_spill] sm:$0xff] %v15239_v53  ;;  %11879 = vmatprep.subr.bf16.mxu0 %v13056_v11  ;;  %v15251_v2 = vsel %vm15075_vm9, %v9990_v37, %v3553_v14  ;;  %v15256_v22 = vsel %vm15075_vm9, %v9996_v21, %v3577_v5  ;;  %v15260_v33 = vsel %vm15242_vm12, %v9903_v32, %v2875_v43  ;;  %v3561_v18 = vrot.slane %v17846_v40, 6  ;;  %v13214_v9 = vld [vmem:[%s17232_s3 + $0x608] sm:$0xff]  }
 0x286   :  { %17843 = vst [vmem:[#allocation16_spill] sm:$0xff] %v15251_v2  ;;  %17845 = vst [vmem:[#allocation40_spill] sm:$0xff] %v15256_v22  ;;  %v15266_v16 = vcombine.low %v15239_v53, %v15256_v22  ;;  %v2880_v37 = vsel %vm15242_vm12, %v9904_v25, %v2879_v19  ;;  %11784 = vmatpush3.bf16.msra.mxu1 %v13055_v45  ;;  %v3569_v14 = vrot.slane %v14953_v15, 6  ;;  %v9905_v32 = vrot.slane %v17807_v46, 9  ;;  %v17850_v22 = vld [vmem:[#allocation69_spill] sm:$0xff]  ;;  %v17852_v25 = vld [vmem:[#allocation78_spill] sm:$0xff] }
 0x287   :  { %v15272_v21 = vcombine.low %v15260_v33, %v2880_v37  ;;  %v2883_v43 = vrot.slane %v17808_v39, 5  ;;  %11785 = vmatprep.subr.bf16.mxu1 %v13057_v52  ;;  %v15278_v5 = vcombine.low %v15216_v55, %v15233_v58  ;;  %v17851_v53 = vld [vmem:[#allocation73_spill] sm:$0xff]  ;;  %v9991_v45 = vrot.slane %v17852_v25, 10 }
 0x288   :  { %17847 = vst [vmem:[#allocation18_spill] sm:$0xff] %v15266_v16  ;;  %11880 = vmatpush3.bf16.msra.mxu0 %v13056_v11  ;;  %v10786_v44 = vpack.c.bf16 %v17851_v53, %v17850_v22  ;;  %v13059_v19 = vld [vmem:[%s17232_s3 + $0x98] sm:$0xff]   ;;  %v10017_v46 = vcombine.low %v3550_v38, %v15251_v2  ;;  %v9993_v11 = vrot.slane %v14937_v50, 10  ;;  %v9994_v22 = vrot.slane %v14971_v35, 10 }
 0x289   :  { %17848 = vst [vmem:[#allocation42_spill] sm:$0xff] %v15272_v21  ;;  %17849 = vst [vmem:[#allocation39_spill] sm:$0xff] %v15278_v5  ;;  %v17853_v21 = vld [vmem:[#allocation77_spill] sm:$0xff]  ;;  %11770 = vmatmul.mubr.bf16.gmra.mrb[196].mxu1 %v15208_v17  ;;  %11881 = vmatprep.subr.bf16.mxu0 %v13058_v13  ;;  %v15296_v53 = vsel %vm15242_vm12, %v9905_v32, %v2883_v43  ;;  %v17854_v58 = vmax.f32 %v15138_v6, 0.0  ;;  %v15306_v38 = vsel %vm15075_vm9, %v9991_v45, %v3557_v3 }
 0x28a   :  { %v9992_v48 = vrot.slane %v17853_v21, 10  ;;  %v13060_v39 = vld [vmem:[%s17232_s3 + $0x158] sm:$0xff]   ;;  %11773 = vmatprep.mubr.bf16.mxu1 %v10786_v44  ;;  %17855 = vst [vmem:[#allocation64_spill] sm:$0xff] %v15306_v38  ;;  %v15309_v17 = vcombine.low %v2880_v37, %v15296_v53  ;;  %v15312_v2 = vmax.f32 %v15159_v57, 0.0  ;;  %11786 = vmatpush3.bf16.msra.mxu1 %v13057_v52  ;;  %v15324_v44 = vsel %vm15075_vm9, %v9994_v22, %v3569_v14 }
 0x28b   :  { %v15301_v55 = vpack.c.bf16 %v17854_v58, %v17854_v58  ;;  %11866 = vmatmul.mubr.bf16.gmra.mrb[4].mxu0 %v15278_v5  ;;  %v15320_v58 = vsel %vm15075_vm9, %v9993_v11, %v3565_v31  ;;  %v15326_v3 = vpack.c.bf16 %v2129_v49, %v2129_v49  ;;  %v17857_v57 = vmax.f32 %v17764_v7, %v14847_v12  ;;  %v17858_v31 = vld [vmem:[#allocation22_spill] sm:$0xff]  ;;  %v17859_v49 = vld [vmem:[#allocation75_spill] sm:$0xff]  ;;  %v17861_v7 = vld [vmem:[#allocation25_spill] sm:$0xff] }
 0x28c   :  { %17856 = vst [vmem:[#allocation3_spill] sm:$0xff] %v15312_v2  ;;  %11869 = vmatprep.mubr.bf16.mxu0 %v10017_v46  ;;  %v15316_v6 = vsel %vm15075_vm9, %v9992_v48, %v3561_v18  ;;  %v15333_v37 = vmax.f32 %v15181_v26, 0.0  ;;  %v2153_v48 = vmax.f32 %v15187_v56, 0.0  ;;  %11882 = vmatpush3.bf16.msra.mxu0 %v13058_v13  ;;  %v13061_v18 = vld [vmem:[%s17232_s3 + $0xa0] sm:$0xff]   ;;  %v15341_v14 = vpack.c.bf16 %v17859_v49, %v17858_v31  ;;  %v17867_v5 = vld [vmem:[#allocation47_spill] sm:$0xff] }
 0x28d   :  { %v2106_v52 = vadd.f32 %v14942_v51, %v17857_v57  ;;  %11787 = vmatprep.subr.bf16.mxu1 %v13059_v19  ;;  %11883 = vmatprep.subr.bf16.mxu0 %v13060_v39  ;;  %v13062_v12 = vld [vmem:[%s17232_s3 + $0x160] sm:$0xff]   ;;  %v15348_v26 = vpack.c.bf16 %v14928_v54, %v17861_v7  ;;  %v9911_v56 = vrot.slane %v17852_v25, 9  ;;  %v2907_v13 = vrot.slane %v17844_v1, 5  ;;  %v13063_v57 = vld [vmem:[%s17232_s3 + $0xa8] sm:$0xff]  }
 0x28e   :  { %17860 = vst [vmem:[#allocation71_spill] sm:$0xff] %v15341_v14  ;;  %v15354_v32 = vcombine.low %v15306_v38, %v15316_v6  ;;  %v15358_v43 = vcombine.low %v15320_v58, %v15324_v44  ;;  %v9912_v45 = vrot.slane %v17853_v21, 9  ;;  %v2911_v46 = vrot.slane %v17846_v40, 5  ;;  %11788 = vmatpush3.bf16.msra.mxu1 %v13059_v19 }
 0x28f   :  { %17862 = vst [vmem:[#allocation24_spill] sm:$0xff] %v15348_v26  ;;  %v2867_v11 = vrot.slane %v17793_v4, 5  ;;  %v15365_v25 = vsel %vm15242_vm12, %v9911_v56, %v2907_v13  ;;  %v9913_v1 = vrot.slane %v14937_v50, 9  ;;  %v2915_v22 = vrot.slane %v14959_v30, 5  ;;  %11789 = vmatprep.subr.bf16.mxu1 %v13061_v18  ;;  %v13064_v50 = vld [vmem:[%s17232_s3 + $0x168] sm:$0xff]  }
 0x290   :  { %17863 = vst [vmem:[#allocation23_spill] sm:$0xff] %v15354_v32  ;;  %17864 = vst [vmem:[#allocation69_spill] sm:$0xff] %v15358_v43  ;;  %11884 = vmatpush3.bf16.msra.mxu0 %v13060_v39  ;;  %v2871_v21 = vrot.slane %v17795_v0, 5  ;;  %v2912_v40 = vsel %vm15242_vm12, %v9912_v45, %v2911_v46  ;;  %v9914_v4 = vrot.slane %v14971_v35, 9  ;;  %v2919_v19 = vrot.slane %v14953_v15, 5  ;;  %v17866_v46 = vld [vmem:[#allocation19_spill] sm:$0xff] }
 0x291   :  { %17865 = vst [vmem:[#allocation78_spill] sm:$0xff] %v15365_v25  ;;  %11774 = vmatmul.mubr.bf16.gmra.mrb[200].mxu1 %v15341_v14  ;;  %11885 = vmatprep.subr.bf16.mxu0 %v13062_v12  ;;  %v15382_v30 = vcombine.low %v15365_v25, %v2912_v40  ;;  %v2916_v0 = vsel %vm15242_vm12, %v9913_v1, %v2915_v22  ;;  %v9915_v39 = vrot.slane %v15012_v24, 9  ;;  %v2923_v56 = vrot.slane %v15025_v59, 5  ;;  %v17907_v25 = vld [vmem:[#allocation48_spill] sm:$0xff] }
 0x292   :  { %11777 = vmatprep.mubr.bf16.mxu1 %v15348_v26  ;;  %v9901_v15 = vrot.slane %v17792_v23, 9  ;;  %v2920_v35 = vsel %vm15242_vm12, %v9914_v4, %v2919_v19  ;;  %v9916_v13 = vrot.slane %v15035_v47, 9  ;;  %v2927_v45 = vrot.slane %v15050_v63, 5  ;;  %11790 = vmatpush3.bf16.msra.mxu1 %v13061_v18  ;;  %v17869_v4 = vld [vmem:[#allocation5_spill] sm:$0xff]  ;;  %v17870_v19 = vld [vmem:[#allocation76_spill] sm:$0xff] }
 0x293   :  { %11870 = vmatmul.mubr.bf16.gmra.mrb[8].mxu0 %v15354_v32  ;;  %v17868_v1 = vmax.f32 %v17866_v46, %v17867_v5  ;;  %v9902_v59 = vrot.slane %v17794_v8, 9  ;;  %v15401_v22 = vcombine.low %v2916_v0, %v2920_v35  ;;  %v2924_v23 = vsel %vm15242_vm12, %v9915_v39, %v2923_v56  ;;  %11791 = vmatprep.subr.bf16.mxu1 %v13063_v57  ;;  %v13065_v5 = vld [vmem:[%s17232_s3 + $0xb0] sm:$0xff]  }
 0x294   :  { %11873 = vmatprep.mubr.bf16.mxu0 %v15358_v43  ;;  %v17871_v47 = vmax.f32 %v17869_v4, %v17870_v19  ;;  %11886 = vmatpush3.bf16.msra.mxu0 %v13062_v12  ;;  %v2868_v18 = vsel %vm15242_vm12, %v9901_v15, %v2867_v11  ;;  %v2903_v8 = vrot.slane %v14849_v34, 5  ;;  %v15417_v46 = vsel %vm15242_vm12, %v9916_v13, %v2927_v45  ;;  %v13066_v39 = vld [vmem:[%s17232_s3 + $0x170] sm:$0xff]   ;;  %v17874_v11 = vld [vmem:[#allocation26_spill] sm:$0xff] }
 0x295   :  { %v2084_v24 = vadd.f32 %v14942_v51, %v17868_v1  ;;  %17872 = vst [vmem:[#allocation77_spill] sm:$0xff] %v15417_v46  ;;  %11887 = vmatprep.subr.bf16.mxu0 %v13064_v50  ;;  %v15424_v12 = vsel %vm15242_vm12, %v9902_v59, %v2871_v21  ;;  %v15427_v56 = vcombine.low %v2924_v23, %v15417_v46  ;;  %v17873_v1 = vld [vmem:[#allocation89_spill] sm:$0xff]  ;;  %v17875_v34 = vld [vmem:[#allocation90_spill] sm:$0xff]  ;;  %v15437_v45 = vmax.f32 %v2106_v52, 0.0  ;;  %v17893_v32 = vld [vmem:[#allocation8_spill] sm:$0xff] }
 0x296   :  { %v2107_v63 = vadd.f32 %v14942_v51, %v17871_v47  ;;  %v15431_v15 = vcombine.low %v17874_v11, %v17873_v1  ;;  %v15435_v13 = vcombine.low %v17875_v34, %v15071_v28  ;;  %v15441_v4 = vpack.c.bf16 %v15333_v37, %v15333_v37  ;;  %11792 = vmatpush3.bf16.msra.mxu1 %v13063_v57  ;;  %v17877_v59 = vld [vmem:[#allocation85_spill] sm:$0xff]  ;;  %v17878_v47 = vld [vmem:[#allocation88_spill] sm:$0xff]  ;;  %v17883_v28 = vld [vmem:[#allocation51_spill] sm:$0xff] }
 0x297   :  { %17876 = vst [vmem:[#allocation22_spill] sm:$0xff] %v15437_v45  ;;  %v15443_v19 = vpack.c.bf16 %v2153_v48, %v2153_v48  ;;  %v9910_v21 = vrot.slane %v17837_v62, 9  ;;  %v15448_v43 = vpack.c.bf16 %v17878_v47, %v17877_v59  ;;  %v10790_v1 = vpack.c.bf16 %v17815_v41, %v17806_v10  ;;  %11793 = vmatprep.subr.bf16.mxu1 %v13065_v5  ;;  %v13067_v62 = vld [vmem:[%s17232_s3 + $0xb8] sm:$0xff]   ;;  %v17908_v14 = vld [vmem:[#allocation72_spill] sm:$0xff] }
 0x298   :  { %11888 = vmatpush3.bf16.msra.mxu0 %v13064_v50  ;;  %v9933_v48 = vcombine.low %v2868_v18, %v15424_v12  ;;  %v2887_v57 = vrot.slane %v17809_v20, 5  ;;  %v2155_v41 = vmax.f32 %v2107_v63, 0.0  ;;  %v13068_v50 = vld [vmem:[%s17232_s3 + $0x178] sm:$0xff]   ;;  %v15471_v34 = vcombine.low %v2912_v40, %v2916_v0 }
 0x299   :  { %17879 = vst [vmem:[#allocation75_spill] sm:$0xff] %v15448_v43  ;;  %v15462_v11 = vsel %vm15242_vm12, %v9910_v21, %v2903_v8  ;;  %11778 = vmatmul.mubr.bf16.gmra.mrb[204].mxu1 %v15448_v43  ;;  %11889 = vmatprep.subr.bf16.mxu0 %v13066_v39  ;;  %v15473_v20 = vcombine.low %v2920_v35, %v2924_v23  ;;  %v9906_v52 = vrot.slane %v17818_v27, 9  ;;  %v17882_v10 = vld [vmem:[#allocation21_spill] sm:$0xff]  ;;  %v4435_v0 = vshrl.u32 %v15443_v19, 16  ;;  %v17890_v21 = vld [vmem:[#allocation59_spill] sm:$0xff] }
 0x29a   :  { %17880 = vst [vmem:[#allocation25_spill] sm:$0xff] %v15471_v34  ;;  %v15477_v8 = vpack.c.bf16 %v15312_v2, %v15312_v2  ;;  %11797 = vmatprep.mubr.bf16.mxu1 %v9933_v48  ;;  %v17884_v18 = vmax.f32 %v17882_v10, %v17883_v28  ;;  %11794 = vmatpush3.bf16.msra.mxu1 %v13065_v5  ;;  %v17885_v23 = vshrl.u32 %v15174_v29, 16  ;;  %v17886_v10 = vshll.u32 %v15174_v29, 16  ;;  %v17892_v35 = vld [vmem:[#allocation61_spill] sm:$0xff]  ;;  %v17902_v2 = vld [vmem:[#allocation35_spill] sm:$0xff] }
 0x29b   :  { %17881 = vst [vmem:[#allocation19_spill] sm:$0xff] %v15473_v20  ;;  %11874 = vmatmul.mubr.bf16.gmra.mrb[12].mxu0 %v15266_v16  ;;  %11795 = vmatprep.subr.bf16.mxu1 %v13067_v62  ;;  %v15497_v27 = vsel %vm15242_vm12, %v9906_v52, %v2887_v57  ;;  %v13069_v52 = vld [vmem:[%s17232_s3 + $0x180] sm:$0xff]   ;;  %v15518_v57 = vpack.c.bf16 %v14641_v36, %v17830_v61  ;;  %v9908_v48 = vrot.slane %v17890_v21, 9  ;;  %v2895_v16 = vrot.slane %v17892_v35, 5  ;;  %v13070_v35 = vld [vmem:[%s17232_s3 + $0x188] sm:$0xff]   ;;  %v17912_v34 = vld [vmem:[#allocation41_spill] sm:$0xff] }
 0x29c   :  { %v15487_v40 = vadd.f32 %v14942_v51, %v17884_v18  ;;  %11893 = vmatprep.mubr.bf16.mxu0 %v10790_v1  ;;  %v15493_v63 = vrot.slane %v17885_v23, 5  ;;  %11890 = vmatpush3.bf16.msra.mxu0 %v13066_v39  ;;  %v15503_v5 = vrot.slane %v17886_v10, 6  ;;  %v15505_v1 = vmax.f32 %v2084_v24, 0.0  ;;  %v17889_v10 = vld [vmem:[#allocation54_spill] sm:$0xff]  ;;  %v17937_v20 = vld [vmem:[#allocation20_spill] sm:$0xff] }
 0x29d   :  { %v15509_v18 = vpack.c.bf16 %v15437_v45, %v15437_v45  ;;  %v15511_v39 = vpack.c.bf16 %v2155_v41, %v2155_v41  ;;  %11891 = vmatprep.subr.bf16.mxu0 %v13068_v50  ;;  %17888 = vst [vmem:[#allocation5_spill] sm:$0xff] %v15518_v57  ;;  %v9907_v23 = vrot.slane %v14665_v42, 9  ;;  %v2891_v24 = vrot.slane %v17889_v10, 5  ;;  %v17894_v45 = vld [vmem:[#allocation93_spill] sm:$0xff]  ;;  %v17897_v10 = vld [vmem:[#allocation74_spill] sm:$0xff] }
 0x29e   :  { %17887 = vst [vmem:[#allocation47_spill] sm:$0xff] %v15505_v1  ;;  %11796 = vmatpush3.bf16.msra.mxu1 %v13067_v62  ;;  %v15527_v41 = vcombine.low %v15296_v53, %v15497_v27  ;;  %v15532_v36 = vcombine.low %v17894_v45, %v17893_v32  ;;  %v17896_v42 = vshrl.u32 %v15441_v4, 16  ;;  %v2899_v21 = vrot.slane %v17897_v10, 5  ;;  %v17900_v32 = vld [vmem:[#allocation34_spill] sm:$0xff]  ;;  %v17901_v45 = vld [vmem:[#allocation36_spill] sm:$0xff] }
 0x29f   :  { %v17898_v43 = vshll.u32 %v15441_v4, 16  ;;  %v4437_v62 = vrot.slane %v4435_v0, 5  ;;  %v17899_v26 = vshll.u32 %v15443_v19, 16  ;;  %v10163_v10 = vrot.slane %v15174_v29, 10  ;;  %v17905_v0 = vld [vmem:[#allocation42_spill] sm:$0xff] }
 0x2a0   :  { %17891 = vst [vmem:[#allocation76_spill] sm:$0xff] %v15527_v41  ;;  %17895 = vst [vmem:[#allocation89_spill] sm:$0xff] %v15532_v36  ;;  %v4431_v61 = vrot.slane %v17896_v42, 5  ;;  %11892 = vmatpush3.bf16.msra.mxu0 %v13068_v50  ;;  %v17903_v42 = vld [vmem:[#allocation46_spill] sm:$0xff] }
 0x2a1   :  { %v4432_v28 = vrot.slane %v17898_v43, 6  ;;  %v4438_v53 = vrot.slane %v17899_v26, 6  ;;  %11909 = vmatprep.subr.bf16.mxu0 %v13069_v52  ;;  %v15548_v50 = vcombine.low %v17903_v42, %v17902_v2  ;;  %v4639_v43 = vrot.slane %v15326_v3, 6  ;;  %11798 = vmatmul.mubr.bf16.vlgmr.msra.gmra.mrb[192].mxu1 %v17905_v0 }
 0x2a2   :  { %v17472_v26 = vshll.u32 %v15326_v3, 16  ;;  %11801 = vmatprep.mubr.bf16.mxu1 %v15527_v41  ;;  %v9909_v2 = vrot.slane %v17908_v14, 9  ;;  %v15565_v0 = vcombine.low %v15316_v6, %v15320_v58  ;;  %v15575_v14 = vcombine.low %v15324_v44, %v17912_v34  ;;  %v17924_v41 = vld [vmem:[#allocation82_spill] sm:$0xff] }
 0x2a3   :  { %17904 = vst [vmem:[#allocation26_spill] sm:$0xff] %v15548_v50  ;;  %v4433_v36 = vor.u32 %v4432_v28, %v4431_v61  ;;  %v4439_v46 = vor.u32 %v4438_v53, %v4437_v62  ;;  %11894 = vmatmul.mubr.bf16.vlgmr.msra.gmra.mrb[0].mxu0 %v17907_v25  ;;  %v15561_v42 = vsel %vm15075_vm9, %v10163_v10, %v4639_v43  ;;  %v10164_v28 = vrot.slane %v15441_v4, 10  ;;  %v17910_v62 = vld [vmem:[#allocation43_spill] sm:$0xff]  ;;  %v17920_v25 = vld [vmem:[#allocation80_spill] sm:$0xff] }
 0x2a4   :  { %17909 = vst [vmem:[#allocation90_spill] sm:$0xff] %v15565_v0  ;;  %11897 = vmatprep.mubr.bf16.mxu0 %v15518_v57  ;;  %11910 = vmatpush3.bf16.msra.mxu0 %v13069_v52  ;;  %v15571_v53 = vcombine.low %v17910_v62, %v15561_v42  ;;  %17913 = vst [vmem:[#allocation88_spill] sm:$0xff] %v15575_v14  ;;  %v4643_v10 = vrot.slane %v15443_v19, 6  ;;  %v15580_v6 = vsel %vm15242_vm12, %v9907_v23, %v2891_v24  ;;  %v13071_v52 = vld [vmem:[%s17232_s3 + $0x190] sm:$0xff]   ;;  %v17927_v14 = vld [vmem:[#allocation7_spill] sm:$0xff] }
 0x2a5   :  { %v4434_v61 = vrot.slane %v4433_v36, 4  ;;  %11911 = vmatprep.subr.bf16.mxu0 %v13070_v35  ;;  %v15584_v58 = vsel %vm15242_vm12, %v9908_v48, %v2895_v16  ;;  %v2900_v36 = vsel %vm15242_vm12, %v9909_v2, %v2899_v21  ;;  %v17914_v44 = vshrl.u32 %v15326_v3, 16  ;;  %v17916_v21 = vld [vmem:[#allocation96_spill] sm:$0xff]  ;;  %v17923_v48 = vld [vmem:[#allocation31_spill] sm:$0xff] }
 0x2a6   :  { %17911 = vst [vmem:[#allocation85_spill] sm:$0xff] %v15571_v53  ;;  %v4428_v43 = vrot.slane %v17472_v26, 6  ;;  %v15601_v16 = vsel %vm15075_vm9, %v10164_v28, %v4643_v10  ;;  %v2133_v24 = vmax.f32 %v15487_v40, 0.0  ;;  %v15621_v40 = vcombine.low %v15580_v6, %v15584_v58  ;;  %v17926_v26 = vld [vmem:[#allocation53_spill] sm:$0xff] }
 0x2a7   :  { %v4427_v34 = vrot.slane %v17914_v44, 5  ;;  %v15597_v23 = vsel %vm14522_vm6, %v4434_v61, %v4439_v46  ;;  %v17917_v44 = vld [vmem:[#allocation40_spill] sm:$0xff]  ;;  %v5451_v46 = vshrl.u32 %v15511_v39, 16  ;;  %v17919_v61 = vld [vmem:[#allocation30_spill] sm:$0xff]  ;;  %v15630_v0 = vpack.c.bf16 %v17927_v14, %v17926_v26 }
 0x2a8   :  { %v15607_v2 = vcombine.low %v17916_v21, %v15597_v23  ;;  %v15611_v57 = vcombine.low %v17917_v44, %v15601_v16  ;;  %v17921_v28 = vmax.f32 %v17919_v61, %v17920_v25  ;;  %11912 = vmatpush3.bf16.msra.mxu0 %v13070_v35  ;;  %17922 = vst [vmem:[#allocation51_spill] sm:$0xff] %v15621_v40  ;;  %v13072_v35 = vld [vmem:[%s17232_s3 + $0x198] sm:$0xff]   ;;  %v17930_v26 = vshrl.u32 %v15477_v8, 16 }
 0x2a9   :  { %v17925_v44 = vmax.f32 %v17923_v48, %v17924_v41  ;;  %17928 = vst [vmem:[#allocation54_spill] sm:$0xff] %v15630_v0  ;;  %11913 = vmatprep.subr.bf16.mxu0 %v13071_v52  ;;  %v9937_v25 = vcombine.low %v2900_v36, %v15462_v11  ;;  %11802 = vmatmul.mubr.bf16.gmra.mrb[196].mxu1 %v15621_v40  ;;  %v17932_v40 = vshll.u32 %v15477_v8, 16  ;;  %v5453_v61 = vrot.slane %v5451_v46, 5 }
 0x2aa   :  { %17918 = vst [vmem:[#allocation21_spill] sm:$0xff] %v15611_v57  ;;  %v2108_v10 = vadd.f32 %v14942_v51, %v17921_v28  ;;  %v17929_v28 = vld [vmem:[#allocation73_spill] sm:$0xff]  ;;  %v4429_v48 = vor.u32 %v4428_v43, %v4427_v34  ;;  %v5437_v21 = vrot.slane %v17930_v26, 5  ;;  %v17931_v36 = vor.u32 %v15503_v5, %v15493_v63  ;;  %v17934_v43 = vld [vmem:[#allocation2_spill] sm:$0xff] }
 0x2ab   :  { %v2109_v57 = vadd.f32 %v14942_v51, %v17925_v44  ;;  %v10794_v41 = vpack.c.bf16 %v17858_v31, %v17929_v28  ;;  %11898 = vmatmul.mubr.bf16.gmra.mrb[4].mxu0 %v15630_v0  ;;  %11805 = vmatprep.mubr.bf16.mxu1 %v9937_v25  ;;  %v5438_v38 = vrot.slane %v17932_v40, 6  ;;  %v17933_v31 = vshrl.u32 %v15301_v55, 16  ;;  %v17935_v28 = vld [vmem:[#allocation45_spill] sm:$0xff] }
 0x2ac   :  { %v4424_v14 = vrot.slane %v17931_v36, 4  ;;  %v17936_v44 = vmax.f32 %v17934_v43, %v17935_v28  ;;  %v17938_v0 = vld [vmem:[#allocation49_spill] sm:$0xff]  ;;  %11914 = vmatpush3.bf16.msra.mxu0 %v13071_v52  ;;  %v17940_v63 = vshll.u32 %v15301_v55, 16  ;;  %v15666_v40 = vpack.c.bf16 %v15505_v1, %v15505_v1 }
 0x2ad   :  { %v5443_v34 = vrot.slane %v17933_v31, 5  ;;  %v17939_v25 = vmax.f32 %v17937_v20, %v17938_v0  ;;  %11901 = vmatprep.mubr.bf16.mxu0 %v10794_v41  ;;  %v15668_v36 = vpack.c.bf16 %v2133_v24, %v2133_v24  ;;  %11915 = vmatprep.subr.bf16.mxu0 %v13072_v35  ;;  %v5439_v20 = vor.u32 %v5438_v38, %v5437_v21 }
 0x2ae   :  { %v2086_v26 = vadd.f32 %v14942_v51, %v17936_v44  ;;  %v5444_v5 = vrot.slane %v17940_v63, 6  ;;  %v13073_v44 = vld [vmem:[%s17232_s3 + $0x1a0] sm:$0xff]   ;;  %v17941_v0 = vshrl.u32 %v15509_v18, 16  ;;  %v15675_v41 = vmax.f32 %v2108_v10, 0.0 }
 0x2af   :  { %v15660_v53 = vadd.f32 %v14942_v51, %v17939_v25  ;;  %v2157_v52 = vmax.f32 %v2109_v57, 0.0  ;;  %v17943_v28 = vshll.u32 %v15509_v18, 16  ;;  %v15681_v24 = vsel %vm14522_vm6, %v4424_v14, %v4429_v48  ;;  %v13074_v14 = vld [vmem:[%s17232_s3 + $0x1a8] sm:$0xff]  }
 0x2b0   :  { %v5447_v31 = vrot.slane %v17941_v0, 5  ;;  %17942 = vst [vmem:[#allocation59_spill] sm:$0xff] %v15675_v41  ;;  %v5445_v43 = vor.u32 %v5444_v5, %v5443_v34  ;;  %v5440_v63 = vrot.slane %v5439_v20, 4  ;;  %v17944_v1 = vshll.u32 %v15511_v39, 16  ;;  %11916 = vmatpush3.bf16.msra.mxu0 %v13072_v35 }
 0x2b1   :  { %v5448_v25 = vrot.slane %v17943_v28, 6  ;;  %v15687_v38 = vpack.c.bf16 %v17861_v7, %v17859_v49  ;;  %v10307_v57 = vrot.slane %v15477_v8, 10  ;;  %v5643_v21 = vrot.slane %v15301_v55, 6  ;;  %11917 = vmatprep.subr.bf16.mxu0 %v13073_v44  ;;  %11806 = vmatmul.mubr.bf16.gmra.mrb[200].mxu1 %v15382_v30 }
 0x2b2   :  { %v5454_v50 = vrot.slane %v17944_v1, 6  ;;  %v15696_v46 = vsel %vm14522_vm6, %v5440_v63, %v5445_v43  ;;  %v10308_v35 = vrot.slane %v15509_v18, 10  ;;  %v5647_v49 = vrot.slane %v15511_v39, 6  ;;  %11809 = vmatprep.mubr.bf16.mxu1 %v15401_v22  ;;  %v17956_v63 = vld [vmem:[#allocation29_spill] sm:$0xff] }
 0x2b3   :  { %17945 = vst [vmem:[#allocation61_spill] sm:$0xff] %v15687_v38  ;;  %v5449_v10 = vor.u32 %v5448_v25, %v5447_v31  ;;  %17946 = vst [vmem:[#allocation8_spill] sm:$0xff] %v15696_v46  ;;  %v15703_v7 = vpack.c.bf16 %v17877_v59, %v14928_v54  ;;  %v15707_v48 = vcombine.low %v15681_v24, %v15696_v46  ;;  %11902 = vmatmul.mubr.bf16.gmra.mrb[8].mxu0 %v15687_v38 }
 0x2b4   :  { %v5455_v1 = vor.u32 %v5454_v50, %v5453_v61  ;;  %v15711_v5 = vsel %vm15075_vm9, %v10307_v57, %v5643_v21  ;;  %v15713_v50 = vmax.f32 %v2086_v26, 0.0  ;;  %v15717_v61 = vpack.c.bf16 %v15675_v41, %v15675_v41  ;;  %11918 = vmatpush3.bf16.msra.mxu0 %v13073_v44 }
 0x2b5   :  { %17947 = vst [vmem:[#allocation93_spill] sm:$0xff] %v15703_v7  ;;  %v5450_v34 = vrot.slane %v5449_v10, 4  ;;  %17948 = vst [vmem:[#allocation74_spill] sm:$0xff] %v15711_v5  ;;  %v15723_v54 = vcombine.low %v15561_v42, %v15711_v5  ;;  %v15727_v59 = vsel %vm15075_vm9, %v10308_v35, %v5647_v49  ;;  %v15729_v20 = vpack.c.bf16 %v2157_v52, %v2157_v52  ;;  %v13075_v52 = vld [vmem:[%s17232_s3 + $0x1b0] sm:$0xff]   ;;  %v17957_v10 = vld [vmem:[#allocation79_spill] sm:$0xff] }
 0x2b6   :  { %17949 = vst [vmem:[#allocation34_spill] sm:$0xff] %v15713_v50  ;;  %17951 = vst [vmem:[#allocation35_spill] sm:$0xff] %v15727_v59  ;;  %11905 = vmatprep.mubr.bf16.mxu0 %v15703_v7  ;;  %v15738_v0 = vcombine.low %v15601_v16, %v15727_v59  ;;  %v17486_v42 = vshrl.u32 %v15666_v40, 16  ;;  %v6433_v31 = vshrl.u32 %v15668_v36, 16  ;;  %11919 = vmatprep.subr.bf16.mxu0 %v13074_v14  ;;  %v2135_v25 = vmax.f32 %v15660_v53, 0.0  ;;  %v17959_v35 = vld [vmem:[#allocation6_spill] sm:$0xff] }
 0x2b7   :  { %17950 = vst [vmem:[#allocation36_spill] sm:$0xff] %v15723_v54  ;;  %v15734_v26 = vsel %vm14522_vm6, %v5450_v34, %v5455_v1  ;;  %v15753_v16 = vpack.c.bf16 %v15713_v50, %v15713_v50  ;;  %v17958_v57 = vmax.f32 %v17956_v63, %v17957_v10  ;;  %v6443_v28 = vshrl.u32 %v15729_v20, 16  ;;  %v13076_v10 = vld [vmem:[%s17232_s3 + $0x1b8] sm:$0xff]  }
 0x2b8   :  { %17952 = vst [vmem:[#allocation46_spill] sm:$0xff] %v15734_v26  ;;  %17953 = vst [vmem:[#allocation72_spill] sm:$0xff] %v15738_v0  ;;  %v15747_v44 = vcombine.low %v15597_v23, %v15734_v26  ;;  %v17960_v23 = vld [vmem:[#allocation81_spill] sm:$0xff]  ;;  %11920 = vmatpush3.bf16.msra.mxu0 %v13074_v14  ;;  %v6429_v53 = vrot.slane %v17486_v42, 5  ;;  %v15771_v63 = vpack.c.bf16 %v15333_v37, %v17878_v47  ;;  %v6435_v14 = vrot.slane %v6433_v31, 5 }
 0x2b9   :  { %17955 = vst [vmem:[#allocation41_spill] sm:$0xff] %v15753_v16  ;;  %v2110_v21 = vadd.f32 %v14942_v51, %v17958_v57  ;;  %v17961_v49 = vmax.f32 %v17959_v35, %v17960_v23  ;;  %11921 = vmatprep.subr.bf16.mxu0 %v13075_v52  ;;  %11810 = vmatmul.mubr.bf16.gmra.mrb[204].mxu1 %v15427_v56  ;;  %v17963_v23 = vld [vmem:[#allocation15_spill] sm:$0xff]  ;;  %v17965_v43 = vshrl.u32 %v15174_v29, 16  ;;  %v17966_v1 = vshll.u32 %v15174_v29, 16 }
 0x2ba   :  { %17954 = vst [vmem:[#allocation43_spill] sm:$0xff] %v15747_v44  ;;  %v17967_v41 = vshll.u32 %v15668_v36, 16  ;;  %v15788_v38 = vpack.c.bf16 %v2135_v25, %v2135_v25  ;;  %v17969_v31 = vshrl.u32 %v15717_v61, 16  ;;  %v13077_v25 = vld [vmem:[%s17232_s3 + $0x1c0] sm:$0xff]  }
 0x2bb   :  { %v2111_v34 = vadd.f32 %v14942_v51, %v17961_v49  ;;  %v17962_v51 = vshll.u32 %v15666_v40, 16  ;;  %v17964_v49 = vld [vmem:[#allocation10_spill] sm:$0xff]  ;;  %v3996_v47 = vrot.slane %v17965_v43, 4  ;;  %v3999_v50 = vrot.slane %v17966_v1, 5  ;;  %11906 = vmatmul.mubr.bf16.gmra.mrb[12].mxu0 %v15771_v63 }
 0x2bc   :  { %v10081_v42 = vcombine.low %v17964_v49, %v17963_v23  ;;  %v6436_v7 = vrot.slane %v17967_v41, 6  ;;  %17968 = vst [vmem:[#allocation11_spill] sm:$0xff] %v15788_v38  ;;  %v6439_v57 = vrot.slane %v17969_v31, 5  ;;  %11922 = vmatpush3.bf16.msra.mxu0 %v13075_v52  ;;  %v17970_v43 = vshll.u32 %v15717_v61, 16 }
 0x2bd   :  { %v6430_v35 = vrot.slane %v17962_v51, 6  ;;  %v6445_v1 = vrot.slane %v6443_v28, 5  ;;  %v15796_v54 = vmax.f32 %v2110_v21, 0.0  ;;  %v2159_v41 = vmax.f32 %v2111_v34, 0.0  ;;  %11923 = vmatprep.subr.bf16.mxu0 %v13076_v10 }
 0x2be   :  { %11925 = vmatprep.mubr.bf16.mxu0 %v10081_v42  ;;  %v6437_v23 = vor.u32 %v6436_v7, %v6435_v14  ;;  %v6440_v49 = vrot.slane %v17970_v43, 6  ;;  %v4000_v0 = vor.u32 %v3999_v50, %v3996_v47  ;;  %v10445_v7 = vrot.slane %v15666_v40, 10  ;;  %v17979_v50 = vld [vmem:[#allocation55_spill] sm:$0xff] }
 0x2bf   :  { %v6431_v51 = vor.u32 %v6430_v35, %v6429_v53  ;;  %17971 = vst [vmem:[#allocation96_spill] sm:$0xff] %v15796_v54  ;;  %v17972_v35 = vshll.u32 %v15729_v20, 16  ;;  %v6635_v42 = vrot.slane %v15668_v36, 6  ;;  %v10446_v34 = vrot.slane %v15717_v61, 10 }
 0x2c0   :  { %v6441_v52 = vor.u32 %v6440_v49, %v6439_v57  ;;  %v6639_v14 = vrot.slane %v15729_v20, 6  ;;  %11924 = vmatpush3.bf16.msra.mxu0 %v13076_v10  ;;  %v15822_v43 = vpack.c.bf16 %v2159_v41, %v2159_v41  ;;  %v13078_v49 = vld [vmem:[%s17232_s3 + $0x1c8] sm:$0xff]  }
 0x2c1   :  { %v6432_v53 = vrot.slane %v6431_v51, 4  ;;  %v6446_v31 = vrot.slane %v17972_v35, 6  ;;  %v17503_v51 = vshll.u32 %v15753_v16, 16  ;;  %v15816_v47 = vsel %vm15075_vm9, %v10445_v7, %v6635_v42  ;;  %11941 = vmatprep.subr.bf16.mxu0 %v13077_v25  ;;  %v17978_v35 = vld [vmem:[#allocation56_spill] sm:$0xff]  ;;  %v13206_v10 = vld [vmem:[%s17232_s3 + $0x5c8] sm:$0xff]  }
 0x2c2   :  { %v6442_v57 = vrot.slane %v6441_v52, 4  ;;  %17973 = vst [vmem:[#allocation40_spill] sm:$0xff] %v15816_v47  ;;  %17975 = vst [vmem:[#allocation80_spill] sm:$0xff] %v15822_v43  ;;  %v4001_v52 = vrot.slane %v4000_v0, 4  ;;  %v7425_v42 = vshrl.u32 %v15788_v38, 16  ;;  %v7435_v7 = vshrl.u32 %v15822_v43, 16 }
 0x2c3   :  { %v15807_v28 = vsel %vm14522_vm6, %v6432_v53, %v6437_v23  ;;  %v6447_v21 = vor.u32 %v6446_v31, %v6445_v1  ;;  %v15820_v23 = vpack.c.bf16 %v15796_v54, %v15796_v54  ;;  %v15831_v1 = vsel %vm15075_vm9, %v10446_v34, %v6639_v14  ;;  %v17977_v53 = vld [vmem:[#allocation63_spill] sm:$0xff]  ;;  %11926 = vmatmul.mubr.bf16.vlgmr.msra.gmra.mrb[0].mxu0 %v17979_v50  ;;  %v17984_v54 = vld [vmem:[#allocation4_spill] sm:$0xff] }
 0x2c4   :  { %17976 = vst [vmem:[#allocation31_spill] sm:$0xff] %v15831_v1  ;;  %v15835_v31 = vcombine.low %v17978_v35, %v17977_v53  ;;  %11942 = vmatpush3.bf16.msra.mxu0 %v13077_v25  ;;  %v17980_v14 = vshll.u32 %v15326_v3, 16  ;;  %v13079_v35 = vld [vmem:[%s17232_s3 + $0x1d0] sm:$0xff]   ;;  %v17982_v25 = vshrl.u32 %v15753_v16, 16  ;;  %v7422_v53 = vrot.slane %v17503_v51, 6 }
 0x2c5   :  { %17974 = vst [vmem:[#allocation30_spill] sm:$0xff] %v15820_v23  ;;  %v15839_v41 = vsel %vm14522_vm6, %v6442_v57, %v6447_v21  ;;  %11943 = vmatprep.subr.bf16.mxu0 %v13078_v49  ;;  %v7427_v57 = vrot.slane %v7425_v42, 5  ;;  %v10085_v1 = vcombine.low %v17984_v54, %v17983_v60  ;;  %v17985_v47 = vshll.u32 %v15788_v38, 16 }
 0x2c6   :  { %11929 = vmatprep.mubr.bf16.mxu0 %v15835_v31  ;;  %v4005_v0 = vrot.slane %v17980_v14, 5  ;;  %v7421_v14 = vrot.slane %v17982_v25, 5  ;;  %v13080_v25 = vld [vmem:[%s17232_s3 + $0x1d8] sm:$0xff]   ;;  %v17987_v51 = vshrl.u32 %v15441_v4, 16  ;;  %v17989_v60 = vshll.u32 %v15820_v23, 16 }
 0x2c7   :  { %v7428_v5 = vrot.slane %v17985_v47, 6  ;;  %v17990_v47 = vshll.u32 %v15441_v4, 16  ;;  %v7437_v38 = vrot.slane %v7435_v7, 5  ;;  %v17991_v26 = vshll.u32 %v15822_v43, 16  ;;  %v18036_v43 = vld [vmem:[#allocation50_spill] sm:$0xff] }
 0x2c8   :  { %v15859_v34 = vsel %vm14469_vm3, %v4001_v52, %v4005_v0  ;;  %11944 = vmatpush3.bf16.msra.mxu0 %v13078_v49  ;;  %v7423_v59 = vor.u32 %v7422_v53, %v7421_v14  ;;  %v17986_v52 = vld [vmem:[#allocation65_spill] sm:$0xff]  ;;  %v4010_v42 = vrot.slane %v17987_v51, 4  ;;  %v17988_v49 = vshrl.u32 %v15820_v23, 16 }
 0x2c9   :  { %v15872_v0 = vcombine.low %v17986_v52, %v15859_v34  ;;  %11945 = vmatprep.subr.bf16.mxu0 %v13079_v35  ;;  %v7432_v54 = vrot.slane %v17989_v60, 6  ;;  %v4013_v53 = vrot.slane %v17990_v47, 5  ;;  %v7429_v52 = vor.u32 %v7428_v5, %v7427_v57  ;;  %v13082_v57 = vld [vmem:[%s17232_s3 + $0x1e8] sm:$0xff]   ;;  %v13084_v60 = vld [vmem:[%s17232_s3 + $0x1f8] sm:$0xff]   ;;  %v13085_v47 = vld [vmem:[%s17232_s3 + $0x200] sm:$0xff]  }
 0x2ca   :  { %v7431_v21 = vrot.slane %v17988_v49, 5  ;;  %v7424_v14 = vrot.slane %v7423_v59, 4  ;;  %v7438_v46 = vrot.slane %v17991_v26, 6  ;;  %v13081_v49 = vld [vmem:[%s17232_s3 + $0x1e0] sm:$0xff]   ;;  %v18034_v5 = vshrl.u32 %v15477_v8, 16 }
 0x2cb   :  { %11930 = vmatmul.mubr.bf16.gmra.mrb[4].mxu0 %v15872_v0 }
 0x2cc   :  { %v7433_v16 = vor.u32 %v7432_v54, %v7431_v21  ;;  %11933 = vmatprep.mubr.bf16.mxu0 %v10085_v1  ;;  %11946 = vmatpush3.bf16.msra.mxu0 %v13079_v35  ;;  %v15890_v51 = vsel %vm14522_vm6, %v7424_v14, %v7429_v52  ;;  %v7439_v7 = vor.u32 %v7438_v46, %v7437_v38  ;;  %v17994_v38 = vshll.u32 %v15443_v19, 16  ;;  %v13083_v46 = vld [vmem:[%s17232_s3 + $0x1f0] sm:$0xff]  }
 0x2cd   :  { %17992 = vst [vmem:[#allocation82_spill] sm:$0xff] %v15890_v51  ;;  %11947 = vmatprep.subr.bf16.mxu0 %v13080_v25  ;;  %v4014_v21 = vor.u32 %v4013_v53, %v4010_v42  ;;  %v17996_v54 = vcombine.low %v15424_v12, %v15260_v33  ;;  %v13086_v53 = vld [vmem:[%s17232_s3 + $0x208] sm:$0xff]   ;;  %v15936_v14 = vcombine.low %v15497_v27, %v15580_v6  ;;  %v4219_v52 = vrot.slane %v15326_v3, 5  ;;  %v13087_v12 = vld [vmem:[%s17232_s3 + $0x210] sm:$0xff]   ;;  %v13088_v27 = vld [vmem:[%s17232_s3 + $0x218] sm:$0xff]  }
 0x2ce   :  { %v7434_v59 = vrot.slane %v7433_v16, 4  ;;  %v4019_v62 = vrot.slane %v17994_v38, 5  ;;  %v10097_v33 = vrot.slane %v15174_v29, 9  ;;  %v17997_v29 = vld [vmem:[#allocation78_spill] sm:$0xff] }
 0x2cf   :  { %v4015_v35 = vrot.slane %v4014_v21, 4  ;;  %v17998_v6 = vcombine.low %v15462_v11, %v17997_v29  ;;  %v17999_v21 = vld [vmem:[#allocation25_spill] sm:$0xff]  ;;  %v10098_v11 = vrot.slane %v15441_v4, 9  ;;  %v18008_v29 = vld [vmem:[#allocation68_spill] sm:$0xff] }
 0x2d0   :  { %v15899_v26 = vsel %vm14522_vm6, %v7434_v59, %v7439_v7  ;;  %11948 = vmatpush3.bf16.msra.mxu0 %v13080_v25  ;;  %v17995_v25 = vld [vmem:[#allocation33_spill] sm:$0xff]  ;;  %v13089_v59 = vld [vmem:[%s17232_s3 + $0x220] sm:$0xff]   ;;  %v4223_v7 = vrot.slane %v15443_v19, 5 }
 0x2d1   :  { %17993 = vst [vmem:[#allocation53_spill] sm:$0xff] %v15899_v26  ;;  %11949 = vmatprep.subr.bf16.mxu0 %v13081_v49  ;;  %v15915_v16 = vsel %vm14469_vm3, %v4015_v35, %v4019_v62  ;;  %v13091_v35 = vld [vmem:[%s17232_s3 + $0x230] sm:$0xff]   ;;  %v18001_v62 = vld [vmem:[#allocation77_spill] sm:$0xff]  ;;  %v5036_v26 = vrot.slane %v18034_v5, 4  ;;  %v13118_v5 = vld [vmem:[%s17232_s3 + $0x308] sm:$0xff]  }
 0x2d2   :  { %v15919_v42 = vcombine.low %v17995_v25, %v15915_v16  ;;  %v15975_v38 = vsel %vm15242_vm12, %v10098_v11, %v4223_v7  ;;  %v18002_v4 = vld [vmem:[#allocation13_spill] sm:$0xff]  ;;  %v18003_v25 = vld [vmem:[#allocation14_spill] sm:$0xff]  ;;  %v18010_v7 = vld [vmem:[#allocation83_spill] sm:$0xff] }
 0x2d3   :  { %11934 = vmatmul.mubr.bf16.gmra.mrb[8].mxu0 %v15431_v15  ;;  %v15979_v19 = vcombine.low %v18001_v62, %v15975_v38  ;;  %v18012_v62 = vld [vmem:[#allocation86_spill] sm:$0xff] }
 0x2d4   :  { %11937 = vmatprep.mubr.bf16.mxu0 %v15435_v13  ;;  %11950 = vmatpush3.bf16.msra.mxu0 %v13081_v49  ;;  %v15947_v49 = vsel %vm15242_vm12, %v10097_v33, %v4219_v52  ;;  %v18006_v52 = vld [vmem:[#allocation60_spill] sm:$0xff] }
 0x2d5   :  { %11951 = vmatprep.subr.bf16.mxu0 %v13082_v57  ;;  %v15951_v3 = vcombine.low %v15584_v58, %v15947_v49  ;;  %v13090_v58 = vld [vmem:[%s17232_s3 + $0x228] sm:$0xff]  }
 0x2d8   :  { %11952 = vmatpush3.bf16.msra.mxu0 %v13082_v57  ;;  %v18000_v57 = vld [vmem:[#allocation19_spill] sm:$0xff] }
 0x2d9   :  { %11953 = vmatprep.subr.bf16.mxu0 %v13083_v46 }
 0x2db   :  { %11938 = vmatmul.mubr.bf16.gmra.mrb[12].mxu0 %v15919_v42 }
 0x2dc   :  { %11954 = vmatpush3.bf16.msra.mxu0 %v13083_v46  ;;  %11957 = vmatprep.mubr.bf16.mxu0 %v17996_v54  ;;  %v13092_v46 = vld [vmem:[%s17232_s3 + $0x238] sm:$0xff]   ;;  %v13093_v54 = vld [vmem:[%s17232_s3 + $0x240] sm:$0xff]  }
 0x2dd   :  { %11955 = vmatprep.subr.bf16.mxu0 %v13084_v60 }
 0x2e0   :  { %11956 = vmatpush3.bf16.msra.mxu0 %v13084_v60  ;;  %v18004_v60 = vcombine.low %v18002_v4, %v18003_v25  ;;  %v13098_v4 = vld [vmem:[%s17232_s3 + $0x268] sm:$0xff]   ;;  %v18013_v25 = vld [vmem:[#allocation89_spill] sm:$0xff] }
 0x2e1   :  { %11973 = vmatprep.subr.bf16.mxu0 %v13085_v47 }
 0x2e3   :  { %11958 = vmatmul.mubr.bf16.vlgmr.msra.gmra.mrb[0].mxu0 %v15309_v17 }
 0x2e4   :  { %11961 = vmatprep.mubr.bf16.mxu0 %v15936_v14  ;;  %11974 = vmatpush3.bf16.msra.mxu0 %v13085_v47  ;;  %v13094_v47 = vld [vmem:[%s17232_s3 + $0x248] sm:$0xff]  }
 0x2e5   :  { %11975 = vmatprep.subr.bf16.mxu0 %v13086_v53 }
 0x2e8   :  { %11976 = vmatpush3.bf16.msra.mxu0 %v13086_v53  ;;  %v18005_v53 = vld [vmem:[#allocation66_spill] sm:$0xff] }
 0x2e9   :  { %11977 = vmatprep.subr.bf16.mxu0 %v13087_v12  ;;  %v15996_v33 = vcombine.low %v18006_v52, %v18005_v53  ;;  %v13101_v53 = vld [vmem:[%s17232_s3 + $0x280] sm:$0xff]   ;;  %v13102_v52 = vld [vmem:[%s17232_s3 + $0x288] sm:$0xff]  }
 0x2eb   :  { %11962 = vmatmul.mubr.bf16.gmra.mrb[4].mxu0 %v15951_v3 }
 0x2ec   :  { %11965 = vmatprep.mubr.bf16.mxu0 %v17998_v6  ;;  %11978 = vmatpush3.bf16.msra.mxu0 %v13087_v12  ;;  %v18007_v12 = vld [vmem:[#allocation58_spill] sm:$0xff]  ;;  %v16005_v6 = vcombine.low %v18008_v29, %v15681_v24  ;;  %v18011_v24 = vld [vmem:[#allocation92_spill] sm:$0xff] }
 0x2ed   :  { %11979 = vmatprep.subr.bf16.mxu0 %v13088_v27  ;;  %v18016_v29 = vld [vmem:[#allocation26_spill] sm:$0xff] }
 0x2f0   :  { %11980 = vmatpush3.bf16.msra.mxu0 %v13088_v27  ;;  %v13095_v27 = vld [vmem:[%s17232_s3 + $0x250] sm:$0xff]  }
 0x2f1   :  { %11981 = vmatprep.subr.bf16.mxu0 %v13089_v59 }
 0x2f3   :  { %11966 = vmatmul.mubr.bf16.gmra.mrb[8].mxu0 %v17999_v21 }
 0x2f4   :  { %11969 = vmatprep.mubr.bf16.mxu0 %v18000_v57  ;;  %11982 = vmatpush3.bf16.msra.mxu0 %v13089_v59  ;;  %v13096_v59 = vld [vmem:[%s17232_s3 + $0x258] sm:$0xff]  }
 0x2f5   :  { %11983 = vmatprep.subr.bf16.mxu0 %v13090_v58 }
 0x2f8   :  { %11984 = vmatpush3.bf16.msra.mxu0 %v13090_v58  ;;  %v18009_v58 = vld [vmem:[#allocation27_spill] sm:$0xff] }
 0x2f9   :  { %11985 = vmatprep.subr.bf16.mxu0 %v13091_v35  ;;  %v10151_v11 = vcombine.low %v18010_v7, %v18009_v58  ;;  %v18018_v58 = vld [vmem:[#allocation16_spill] sm:$0xff] }
 0x2fa   :  { %v18019_v7 = vld [vmem:[#allocation64_spill] sm:$0xff] }
 0x2fb   :  { %11970 = vmatmul.mubr.bf16.gmra.mrb[12].mxu0 %v15979_v19 }
 0x2fc   :  { %11986 = vmatpush3.bf16.msra.mxu0 %v13091_v35  ;;  %11989 = vmatprep.mubr.bf16.mxu0 %v18004_v60  ;;  %v13097_v35 = vld [vmem:[%s17232_s3 + $0x260] sm:$0xff]   ;;  %v13099_v60 = vld [vmem:[%s17232_s3 + $0x270] sm:$0xff]  }
 0x2fd   :  { %11987 = vmatprep.subr.bf16.mxu0 %v13092_v46 }
 0x300   :  { %11988 = vmatpush3.bf16.msra.mxu0 %v13092_v46  ;;  %v16018_v46 = vcombine.low %v18012_v62, %v18011_v24  ;;  %v13106_v24 = vld [vmem:[%s17232_s3 + $0x2a8] sm:$0xff]   ;;  %v18021_v62 = vld [vmem:[#allocation90_spill] sm:$0xff] }
 0x301   :  { %12005 = vmatprep.subr.bf16.mxu0 %v13093_v54 }
 0x303   :  { %11990 = vmatmul.mubr.bf16.vlgmr.msra.gmra.mrb[0].mxu0 %v18007_v12 }
 0x304   :  { %11993 = vmatprep.mubr.bf16.mxu0 %v15996_v33  ;;  %12006 = vmatpush3.bf16.msra.mxu0 %v13093_v54  ;;  %v13100_v54 = vld [vmem:[%s17232_s3 + $0x278] sm:$0xff]  }
 0x305   :  { %12007 = vmatprep.subr.bf16.mxu0 %v13094_v47 }
 0x308   :  { %12008 = vmatpush3.bf16.msra.mxu0 %v13094_v47  ;;  %v18014_v47 = vcombine.low %v17901_v45, %v17900_v32  ;;  %v13103_v32 = vld [vmem:[%s17232_s3 + $0x290] sm:$0xff]   ;;  %v13104_v45 = vld [vmem:[%s17232_s3 + $0x298] sm:$0xff]  }
 0x309   :  { %12009 = vmatprep.subr.bf16.mxu0 %v13095_v27 }
 0x30b   :  { %11994 = vmatmul.mubr.bf16.gmra.mrb[4].mxu0 %v16005_v6 }
 0x30c   :  { %11997 = vmatprep.mubr.bf16.mxu0 %v10151_v11  ;;  %12010 = vmatpush3.bf16.msra.mxu0 %v13095_v27  ;;  %v18015_v27 = vld [vmem:[#allocation32_spill] sm:$0xff]  ;;  %v18020_v11 = vcombine.low %v18018_v58, %v18019_v7  ;;  %v18026_v58 = vld [vmem:[#allocation9_spill] sm:$0xff] }
 0x30d   :  { %12011 = vmatprep.subr.bf16.mxu0 %v13096_v59  ;;  %v13111_v7 = vld [vmem:[%s17232_s3 + $0x2d0] sm:$0xff]  }
 0x310   :  { %12012 = vmatpush3.bf16.msra.mxu0 %v13096_v59  ;;  %v18017_v59 = vld [vmem:[#allocation85_spill] sm:$0xff] }
 0x311   :  { %12013 = vmatprep.subr.bf16.mxu0 %v13097_v35 }
 0x313   :  { %11998 = vmatmul.mubr.bf16.gmra.mrb[8].mxu0 %v16018_v46 }
 0x314   :  { %12001 = vmatprep.mubr.bf16.mxu0 %v18013_v25  ;;  %12014 = vmatpush3.bf16.msra.mxu0 %v13097_v35  ;;  %v13105_v35 = vld [vmem:[%s17232_s3 + $0x2a0] sm:$0xff]  }
 0x315   :  { %12015 = vmatprep.subr.bf16.mxu0 %v13098_v4 }
 0x318   :  { %12016 = vmatpush3.bf16.msra.mxu0 %v13098_v4  ;;  %v18022_v4 = vld [vmem:[#allocation88_spill] sm:$0xff] }
 0x319   :  { %12017 = vmatprep.subr.bf16.mxu0 %v13099_v60 }
 0x31b   :  { %12002 = vmatmul.mubr.bf16.gmra.mrb[12].mxu0 %v15607_v2 }
 0x31c   :  { %12018 = vmatpush3.bf16.msra.mxu0 %v13099_v60  ;;  %12021 = vmatprep.mubr.bf16.mxu0 %v18014_v47  ;;  %v13107_v60 = vld [vmem:[%s17232_s3 + $0x2b0] sm:$0xff]   ;;  %v18023_v47 = vld [vmem:[#allocation21_spill] sm:$0xff] }
 0x31d   :  { %12019 = vmatprep.subr.bf16.mxu0 %v13100_v54 }
 0x320   :  { %12020 = vmatpush3.bf16.msra.mxu0 %v13100_v54  ;;  %v13108_v54 = vld [vmem:[%s17232_s3 + $0x2b8] sm:$0xff]  }
 0x321   :  { %12037 = vmatprep.subr.bf16.mxu0 %v13101_v53 }
 0x323   :  { %12022 = vmatmul.mubr.bf16.vlgmr.msra.gmra.mrb[0].mxu0 %v18015_v27 }
 0x324   :  { %12025 = vmatprep.mubr.bf16.mxu0 %v18016_v29  ;;  %12038 = vmatpush3.bf16.msra.mxu0 %v13101_v53  ;;  %v18024_v53 = vld [vmem:[#allocation44_spill] sm:$0xff] }
 0x325   :  { %12039 = vmatprep.subr.bf16.mxu0 %v13102_v52 }
 0x328   :  { %12040 = vmatpush3.bf16.msra.mxu0 %v13102_v52  ;;  %v13109_v52 = vld [vmem:[%s17232_s3 + $0x2c0] sm:$0xff]  }
 0x329   :  { %12041 = vmatprep.subr.bf16.mxu0 %v13103_v32 }
 0x32b   :  { %12026 = vmatmul.mubr.bf16.gmra.mrb[4].mxu0 %v18017_v59 }
 0x32c   :  { %12029 = vmatprep.mubr.bf16.mxu0 %v18020_v11  ;;  %12042 = vmatpush3.bf16.msra.mxu0 %v13103_v32  ;;  %v13110_v32 = vld [vmem:[%s17232_s3 + $0x2c8] sm:$0xff]  }
 0x32d   :  { %12043 = vmatprep.subr.bf16.mxu0 %v13104_v45  ;;  %v18027_v11 = vld [vmem:[#allocation7_spill] sm:$0xff] }
 0x330   :  { %12044 = vmatpush3.bf16.msra.mxu0 %v13104_v45  ;;  %v18025_v45 = vld [vmem:[#allocation17_spill] sm:$0xff] }
 0x331   :  { %12045 = vmatprep.subr.bf16.mxu0 %v13105_v35 }
 0x333   :  { %12030 = vmatmul.mubr.bf16.gmra.mrb[8].mxu0 %v18021_v62 }
 0x334   :  { %12033 = vmatprep.mubr.bf16.mxu0 %v18022_v4  ;;  %12046 = vmatpush3.bf16.msra.mxu0 %v13105_v35  ;;  %v18028_v35 = vld [vmem:[#allocation3_spill] sm:$0xff] }
 0x335   :  { %12047 = vmatprep.subr.bf16.mxu0 %v13106_v24 }
 0x338   :  { %12048 = vmatpush3.bf16.msra.mxu0 %v13106_v24  ;;  %v16082_v24 = vpack.c.bf16 %v18028_v35, %v18027_v11  ;;  %v18031_v11 = vld [vmem:[#allocation75_spill] sm:$0xff] }
 0x339   :  { %12049 = vmatprep.subr.bf16.mxu0 %v13107_v60 }
 0x33b   :  { %12034 = vmatmul.mubr.bf16.gmra.mrb[12].mxu0 %v18023_v47 }
 0x33c   :  { %12050 = vmatpush3.bf16.msra.mxu0 %v13107_v60  ;;  %12053 = vmatprep.mubr.bf16.mxu0 %v18024_v53  ;;  %v13112_v60 = vld [vmem:[%s17232_s3 + $0x2d8] sm:$0xff]   ;;  %v13113_v53 = vld [vmem:[%s17232_s3 + $0x2e0] sm:$0xff]  }
 0x33d   :  { %12051 = vmatprep.subr.bf16.mxu0 %v13108_v54 }
 0x340   :  { %12052 = vmatpush3.bf16.msra.mxu0 %v13108_v54  ;;  %v18029_v54 = vld [vmem:[#allocation71_spill] sm:$0xff] }
 0x341   :  { %12069 = vmatprep.subr.bf16.mxu0 %v13109_v52 }
 0x343   :  { %12054 = vmatmul.mubr.bf16.vlgmr.msra.gmra.mrb[0].mxu0 %v18025_v45 }
 0x344   :  { %12057 = vmatprep.mubr.bf16.mxu0 %v18026_v58  ;;  %12070 = vmatpush3.bf16.msra.mxu0 %v13109_v52  ;;  %v13114_v52 = vld [vmem:[%s17232_s3 + $0x2e8] sm:$0xff]  }
 0x345   :  { %12071 = vmatprep.subr.bf16.mxu0 %v13110_v32 }
 0x348   :  { %12072 = vmatpush3.bf16.msra.mxu0 %v13110_v32  ;;  %v18030_v32 = vld [vmem:[#allocation24_spill] sm:$0xff] }
 0x349   :  { %12073 = vmatprep.subr.bf16.mxu0 %v13111_v7 }
 0x34b   :  { %12058 = vmatmul.mubr.bf16.gmra.mrb[4].mxu0 %v16082_v24 }
 0x34c   :  { %12061 = vmatprep.mubr.bf16.mxu0 %v18029_v54  ;;  %12074 = vmatpush3.bf16.msra.mxu0 %v13111_v7  ;;  %v13115_v7 = vld [vmem:[%s17232_s3 + $0x2f0] sm:$0xff]   ;;  %v18032_v54 = vld [vmem:[#allocation22_spill] sm:$0xff] }
 0x34d   :  { %12075 = vmatprep.subr.bf16.mxu0 %v13112_v60  ;;  %v16102_v1 = vpack.c.bf16 %v18032_v54, %v15333_v37  ;;  %v13117_v37 = vld [vmem:[%s17232_s3 + $0x300] sm:$0xff]  }
 0x34f   :  { %18033 = vst [vmem:[#allocation73_spill] sm:$0xff] %v16102_v1 }
 0x350   :  { %12076 = vmatpush3.bf16.msra.mxu0 %v13112_v60  ;;  %v13116_v60 = vld [vmem:[%s17232_s3 + $0x2f8] sm:$0xff]  }
 0x351   :  { %12077 = vmatprep.subr.bf16.mxu0 %v13113_v53 }
 0x353   :  { %12062 = vmatmul.mubr.bf16.gmra.mrb[8].mxu0 %v18030_v32 }
 0x354   :  { %12065 = vmatprep.mubr.bf16.mxu0 %v18031_v11  ;;  %12078 = vmatpush3.bf16.msra.mxu0 %v13113_v53  ;;  %v18035_v53 = vshll.u32 %v15477_v8, 16  ;;  %v18037_v11 = vld [vmem:[#allocation57_spill] sm:$0xff] }
 0x355   :  { %12079 = vmatprep.subr.bf16.mxu0 %v13114_v52 }
 0x356   :  { %v5039_v51 = vrot.slane %v18035_v53, 5  ;;  %v18038_v53 = vld [vmem:[#allocation67_spill] sm:$0xff] }
 0x358   :  { %12080 = vmatpush3.bf16.msra.mxu0 %v13114_v52  ;;  %v5040_v52 = vor.u32 %v5039_v51, %v5036_v26  ;;  %v13119_v51 = vld [vmem:[%s17232_s3 + $0x310] sm:$0xff]  }
 0x359   :  { %12081 = vmatprep.subr.bf16.mxu0 %v13115_v7 }
 0x35a   :  { %v5041_v23 = vrot.slane %v5040_v52, 4  ;;  %v18041_v52 = vshrl.u32 %v15509_v18, 16 }
 0x35b   :  { %12066 = vmatmul.mubr.bf16.gmra.mrb[12].mxu0 %v16102_v1  ;;  %v18044_v1 = vld [vmem:[#allocation91_spill] sm:$0xff] }
 0x35c   :  { %12082 = vmatpush3.bf16.msra.mxu0 %v13115_v7  ;;  %12085 = vmatprep.mubr.bf16.mxu0 %v18036_v43  ;;  %v18039_v43 = vshll.u32 %v15301_v55, 16 }
 0x35d   :  { %12083 = vmatprep.subr.bf16.mxu0 %v13116_v60 }
 0x35e   :  { %v5045_v7 = vrot.slane %v18039_v43, 5  ;;  %v5050_v43 = vrot.slane %v18041_v52, 4 }
 0x360   :  { %12084 = vmatpush3.bf16.msra.mxu0 %v13116_v60  ;;  %v16128_v26 = vsel %vm14469_vm3, %v5041_v23, %v5045_v7  ;;  %v18043_v23 = vld [vmem:[#allocation28_spill] sm:$0xff]  ;;  %v13122_v7 = vld [vmem:[%s17232_s3 + $0x328] sm:$0xff]  }
 0x361   :  { %12101 = vmatprep.subr.bf16.mxu0 %v13117_v37  ;;  %v16132_v60 = vcombine.low %v15859_v34, %v16128_v26  ;;  %v13121_v34 = vld [vmem:[%s17232_s3 + $0x320] sm:$0xff]  }
 0x363   :  { %12086 = vmatmul.mubr.bf16.vlgmr.msra.gmra.mrb[0].mxu0 %v18037_v11  ;;  %18040 = vst [vmem:[#allocation2_spill] sm:$0xff] %v16132_v60 }
 0x364   :  { %12089 = vmatprep.mubr.bf16.mxu0 %v18038_v53  ;;  %12102 = vmatpush3.bf16.msra.mxu0 %v13117_v37  ;;  %v13120_v37 = vld [vmem:[%s17232_s3 + $0x318] sm:$0xff]   ;;  %v18042_v53 = vshll.u32 %v15509_v18, 16 }
 0x365   :  { %12103 = vmatprep.subr.bf16.mxu0 %v13118_v5 }
 0x366   :  { %v5053_v11 = vrot.slane %v18042_v53, 5  ;;  %v18045_v53 = vld [vmem:[#allocation95_spill] sm:$0xff] }
 0x368   :  { %12104 = vmatpush3.bf16.msra.mxu0 %v13118_v5  ;;  %v5054_v5 = vor.u32 %v5053_v11, %v5050_v43  ;;  %v13123_v11 = vld [vmem:[%s17232_s3 + $0x330] sm:$0xff]  }
 0x369   :  { %12105 = vmatprep.subr.bf16.mxu0 %v13119_v51 }
 0x36a   :  { %v5055_v52 = vrot.slane %v5054_v5, 4 }
 0x36b   :  { %12090 = vmatmul.mubr.bf16.gmra.mrb[4].mxu0 %v16132_v60 }
 0x36c   :  { %12093 = vmatprep.mubr.bf16.mxu0 %v18043_v23  ;;  %12106 = vmatpush3.bf16.msra.mxu0 %v13119_v51  ;;  %v18046_v51 = vshll.u32 %v15511_v39, 16 }
 0x36d   :  { %12107 = vmatprep.subr.bf16.mxu0 %v13120_v37 }
 0x36e   :  { %v5059_v23 = vrot.slane %v18046_v51, 5 }
 0x370   :  { %12108 = vmatpush3.bf16.msra.mxu0 %v13120_v37  ;;  %v16162_v43 = vsel %vm14469_vm3, %v5055_v52, %v5059_v23 }
 0x371   :  { %12109 = vmatprep.subr.bf16.mxu0 %v13121_v34  ;;  %v16170_v51 = vcombine.low %v15915_v16, %v16162_v43 }
 0x373   :  { %12094 = vmatmul.mubr.bf16.gmra.mrb[8].mxu0 %v18044_v1  ;;  %18051 = vst [vmem:[#allocation79_spill] sm:$0xff] %v16170_v51 }
 0x374   :  { %12097 = vmatprep.mubr.bf16.mxu0 %v18045_v53  ;;  %12110 = vmatpush3.bf16.msra.mxu0 %v13121_v34  ;;  %v16153_v60 = vpop.f32.mrb[192].mxu1 }
 0x375   :  { %18047 = vst [vmem:[#allocation45_spill] sm:$0xff] %v16153_v60  ;;  %12111 = vmatprep.subr.bf16.mxu0 %v13122_v7  ;;  %v16158_v37 = vpop.f32.mrb[193].mxu1  ;;  %v13124_v60 = vld [vmem:[%s17232_s3 + $0x338] sm:$0xff]  }
 0x376   :  { %18048 = vst [vmem:[#allocation20_spill] sm:$0xff] %v16158_v37  ;;  %v16164_v5 = vpop.f32.mrb[194].mxu1  ;;  %v18052_v37 = vld [vmem:[#allocation42_spill] sm:$0xff] }
 0x377   :  { %18049 = vst [vmem:[#allocation49_spill] sm:$0xff] %v16164_v5  ;;  %v16166_v34 = vpop.f32.mrb[195].mxu1  ;;  %v18058_v5 = vld [vmem:[#allocation51_spill] sm:$0xff] }
 0x378   :  { %12112 = vmatpush3.bf16.msra.mxu0 %v13122_v7  ;;  %18050 = vst [vmem:[#allocation29_spill] sm:$0xff] %v16166_v34  ;;  %v13125_v7 = vld [vmem:[%s17232_s3 + $0x340] sm:$0xff]  }
 0x379   :  { %12113 = vmatprep.subr.bf16.mxu0 %v13123_v11 }
 0x37b   :  { %12098 = vmatmul.mubr.bf16.gmra.mrb[12].mxu0 %v16170_v51  ;;  %v10253_v51 = vrot.slane %v15477_v8, 9 }
 0x37c   :  { %12114 = vmatpush3.bf16.msra.mxu0 %v13123_v11  ;;  %12117 = vmatprep.mubr.bf16.mxu0 %v18052_v37  ;;  %v16177_v52 = vpop.f32.mrb[196].mxu1  ;;  %v13126_v11 = vld [vmem:[%s17232_s3 + $0x348] sm:$0xff]   ;;  %v5247_v37 = vrot.slane %v15301_v55, 5 }
 0x37d   :  { %18053 = vst [vmem:[#allocation6_spill] sm:$0xff] %v16177_v52  ;;  %12115 = vmatprep.subr.bf16.mxu0 %v13124_v60  ;;  %v16182_v23 = vpop.f32.mrb[197].mxu1  ;;  %v18057_v52 = vld [vmem:[#allocation76_spill] sm:$0xff] }
 0x37e   :  { %18054 = vst [vmem:[#allocation81_spill] sm:$0xff] %v16182_v23  ;;  %v16184_v16 = vpop.f32.mrb[198].mxu1 }
 0x37f   :  { %18055 = vst [vmem:[#allocation15_spill] sm:$0xff] %v16184_v16  ;;  %v16186_v34 = vpop.f32.mrb[199].mxu1  ;;  %v16204_v16 = vsel %vm15242_vm12, %v10253_v51, %v5247_v37 }
 0x380   :  { %12116 = vmatpush3.bf16.msra.mxu0 %v13124_v60  ;;  %18056 = vst [vmem:[#allocation10_spill] sm:$0xff] %v16186_v34  ;;  %v13127_v60 = vld [vmem:[%s17232_s3 + $0x350] sm:$0xff]   ;;  %v16212_v8 = vcombine.low %v15947_v49, %v16204_v16 }
 0x381   :  { %12133 = vmatprep.subr.bf16.mxu0 %v13125_v7 }
 0x383   :  { %12118 = vmatmul.mubr.bf16.vlgmr.msra.gmra.mrb[0].mxu0 %v18057_v52 }
 0x384   :  { %12121 = vmatprep.mubr.bf16.mxu0 %v18058_v5  ;;  %12134 = vmatpush3.bf16.msra.mxu0 %v13125_v7  ;;  %v16195_v23 = vpop.f32.mrb[200].mxu1  ;;  %v13128_v7 = vld [vmem:[%s17232_s3 + $0x358] sm:$0xff]  }
 0x385   :  { %18059 = vst [vmem:[#allocation63_spill] sm:$0xff] %v16195_v23  ;;  %12135 = vmatprep.subr.bf16.mxu0 %v13126_v11  ;;  %v16200_v34 = vpop.f32.mrb[201].mxu1  ;;  %v18077_v23 = vld [vmem:[#allocation23_spill] sm:$0xff] }
 0x386   :  { %18060 = vst [vmem:[#allocation56_spill] sm:$0xff] %v16200_v34  ;;  %v16206_v55 = vpop.f32.mrb[202].mxu1  ;;  %v18075_v34 = vld [vmem:[#allocation39_spill] sm:$0xff] }
 0x387   :  { %18061 = vst [vmem:[#allocation55_spill] sm:$0xff] %v16206_v55  ;;  %v16208_v5 = vpop.f32.mrb[203].mxu1  ;;  %v18074_v55 = vld [vmem:[#allocation12_spill] sm:$0xff] }
 0x388   :  { %12136 = vmatpush3.bf16.msra.mxu0 %v13126_v11  ;;  %18062 = vst [vmem:[#allocation38_spill] sm:$0xff] %v16208_v5  ;;  %v13129_v11 = vld [vmem:[%s17232_s3 + $0x360] sm:$0xff]  }
 0x389   :  { %12137 = vmatprep.subr.bf16.mxu0 %v13127_v60 }
 0x38b   :  { %12122 = vmatmul.mubr.bf16.gmra.mrb[4].mxu0 %v16212_v8 }
 0x38c   :  { %12125 = vmatprep.mubr.bf16.mxu0 %v15382_v30  ;;  %12138 = vmatpush3.bf16.msra.mxu0 %v13127_v60  ;;  %v16219_v51 = vpop.f32.mrb[204].mxu1  ;;  %v13130_v30 = vld [vmem:[%s17232_s3 + $0x368] sm:$0xff]   ;;  %v5251_v60 = vrot.slane %v15511_v39, 5 }
 0x38d   :  { %18063 = vst [vmem:[#allocation84_spill] sm:$0xff] %v16219_v51  ;;  %12139 = vmatprep.subr.bf16.mxu0 %v13128_v7  ;;  %v16224_v37 = vpop.f32.mrb[205].mxu1  ;;  %v10254_v51 = vrot.slane %v15509_v18, 9  ;;  %v18067_v18 = vld [vmem:[#allocation52_spill] sm:$0xff] }
 0x38e   :  { %18064 = vst [vmem:[#allocation4_spill] sm:$0xff] %v16224_v37  ;;  %v16226_v49 = vpop.f32.mrb[206].mxu1  ;;  %v18072_v37 = vld [vmem:[#allocation98_spill] sm:$0xff] }
 0x38f   :  { %18065 = vst [vmem:[#allocation65_spill] sm:$0xff] %v16226_v49  ;;  %v16228_v5 = vpop.f32.mrb[207].mxu1  ;;  %v18071_v49 = vld [vmem:[#allocation94_spill] sm:$0xff] }
 0x390   :  { %12140 = vmatpush3.bf16.msra.mxu0 %v13128_v7  ;;  %18066 = vst [vmem:[#allocation33_spill] sm:$0xff] %v16228_v5  ;;  %v13131_v7 = vld [vmem:[%s17232_s3 + $0x370] sm:$0xff]   ;;  %v16242_v5 = vsel %vm15242_vm12, %v10254_v51, %v5251_v60  ;;  %v13133_v51 = vld [vmem:[%s17232_s3 + $0x380] sm:$0xff]  }
 0x391   :  { %12141 = vmatprep.subr.bf16.mxu0 %v13129_v11  ;;  %v16246_v39 = vcombine.low %v15975_v38, %v16242_v5  ;;  %v13134_v38 = vld [vmem:[%s17232_s3 + $0x388] sm:$0xff]   ;;  %v18069_v60 = vld [vmem:[#allocation70_spill] sm:$0xff] }
 0x393   :  { %12126 = vmatmul.mubr.bf16.gmra.mrb[8].mxu0 %v15401_v22 }
 0x394   :  { %12129 = vmatprep.mubr.bf16.mxu0 %v15427_v56  ;;  %12142 = vmatpush3.bf16.msra.mxu0 %v13129_v11  ;;  %v13132_v11 = vld [vmem:[%s17232_s3 + $0x378] sm:$0xff]  }
 0x395   :  { %12143 = vmatprep.subr.bf16.mxu0 %v13130_v30 }
 0x398   :  { %12144 = vmatpush3.bf16.msra.mxu0 %v13130_v30  ;;  %v18068_v30 = vld [vmem:[#allocation62_spill] sm:$0xff] }
 0x399   :  { %12145 = vmatprep.subr.bf16.mxu0 %v13131_v7 }
 0x39b   :  { %12130 = vmatmul.mubr.bf16.gmra.mrb[12].mxu0 %v16246_v39 }
 0x39c   :  { %12146 = vmatpush3.bf16.msra.mxu0 %v13131_v7  ;;  %12149 = vmatprep.mubr.bf16.mxu0 %v18067_v18  ;;  %v13135_v7 = vld [vmem:[%s17232_s3 + $0x390] sm:$0xff]   ;;  %v18070_v18 = vld [vmem:[#allocation87_spill] sm:$0xff] }
 0x39d   :  { %12147 = vmatprep.subr.bf16.mxu0 %v13132_v11 }
 0x3a0   :  { %12148 = vmatpush3.bf16.msra.mxu0 %v13132_v11  ;;  %v13136_v11 = vld [vmem:[%s17232_s3 + $0x398] sm:$0xff]  }
 0x3a1   :  { %12165 = vmatprep.subr.bf16.mxu0 %v13133_v51 }
 0x3a3   :  { %12150 = vmatmul.mubr.bf16.vlgmr.msra.gmra.mrb[0].mxu0 %v18068_v30 }
 0x3a4   :  { %12153 = vmatprep.mubr.bf16.mxu0 %v18069_v60  ;;  %12166 = vmatpush3.bf16.msra.mxu0 %v13133_v51  ;;  %v13137_v51 = vld [vmem:[%s17232_s3 + $0x3a0] sm:$0xff]  }
 0x3a5   :  { %12167 = vmatprep.subr.bf16.mxu0 %v13134_v38 }
 0x3a8   :  { %12168 = vmatpush3.bf16.msra.mxu0 %v13134_v38  ;;  %v13138_v38 = vld [vmem:[%s17232_s3 + $0x3a8] sm:$0xff]  }
 0x3a9   :  { %12169 = vmatprep.subr.bf16.mxu0 %v13135_v7 }
 0x3ab   :  { %12154 = vmatmul.mubr.bf16.gmra.mrb[4].mxu0 %v15707_v48 }
 0x3ac   :  { %12157 = vmatprep.mubr.bf16.mxu0 %v18070_v18  ;;  %12170 = vmatpush3.bf16.msra.mxu0 %v13135_v7  ;;  %v13139_v7 = vld [vmem:[%s17232_s3 + $0x3b0] sm:$0xff]   ;;  %v18073_v18 = vld [vmem:[#allocation97_spill] sm:$0xff] }
 0x3ad   :  { %12171 = vmatprep.subr.bf16.mxu0 %v13136_v11 }
 0x3b0   :  { %12172 = vmatpush3.bf16.msra.mxu0 %v13136_v11  ;;  %v13140_v11 = vld [vmem:[%s17232_s3 + $0x3b8] sm:$0xff]  }
 0x3b1   :  { %12173 = vmatprep.subr.bf16.mxu0 %v13137_v51 }
 0x3b3   :  { %12158 = vmatmul.mubr.bf16.gmra.mrb[8].mxu0 %v18071_v49 }
 0x3b4   :  { %12161 = vmatprep.mubr.bf16.mxu0 %v18072_v37  ;;  %12174 = vmatpush3.bf16.msra.mxu0 %v13137_v51  ;;  %v13141_v51 = vld [vmem:[%s17232_s3 + $0x3c0] sm:$0xff]  }
 0x3b5   :  { %12175 = vmatprep.subr.bf16.mxu0 %v13138_v38 }
 0x3b8   :  { %12176 = vmatpush3.bf16.msra.mxu0 %v13138_v38  ;;  %v13142_v38 = vld [vmem:[%s17232_s3 + $0x3c8] sm:$0xff]  }
 0x3b9   :  { %12177 = vmatprep.subr.bf16.mxu0 %v13139_v7 }
 0x3bb   :  { %12162 = vmatmul.mubr.bf16.gmra.mrb[12].mxu0 %v15747_v44  ;;  %v18085_v44 = vld [vmem:[#allocation61_spill] sm:$0xff] }
 0x3bc   :  { %12178 = vmatpush3.bf16.msra.mxu0 %v13139_v7  ;;  %12181 = vmatprep.mubr.bf16.mxu0 %v18073_v18  ;;  %v13143_v7 = vld [vmem:[%s17232_s3 + $0x3d0] sm:$0xff]  }
 0x3bd   :  { %12179 = vmatprep.subr.bf16.mxu0 %v13140_v11  ;;  %v18076_v18 = vld [vmem:[#allocation36_spill] sm:$0xff] }
 0x3c0   :  { %12180 = vmatpush3.bf16.msra.mxu0 %v13140_v11  ;;  %v13144_v11 = vld [vmem:[%s17232_s3 + $0x3d8] sm:$0xff]  }
 0x3c1   :  { %12197 = vmatprep.subr.bf16.mxu0 %v13141_v51 }
 0x3c3   :  { %12182 = vmatmul.mubr.bf16.vlgmr.msra.gmra.mrb[0].mxu0 %v18074_v55  ;;  %v18079_v55 = vld [vmem:[#allocation18_spill] sm:$0xff] }
 0x3c4   :  { %12185 = vmatprep.mubr.bf16.mxu0 %v18075_v34  ;;  %12198 = vmatpush3.bf16.msra.mxu0 %v13141_v51  ;;  %v13145_v51 = vld [vmem:[%s17232_s3 + $0x3e0] sm:$0xff]   ;;  %v18078_v34 = vld [vmem:[#allocation69_spill] sm:$0xff] }
 0x3c5   :  { %12199 = vmatprep.subr.bf16.mxu0 %v13142_v38 }
 0x3c8   :  { %12200 = vmatpush3.bf16.msra.mxu0 %v13142_v38  ;;  %v13146_v38 = vld [vmem:[%s17232_s3 + $0x3e8] sm:$0xff]  }
 0x3c9   :  { %12201 = vmatprep.subr.bf16.mxu0 %v13143_v7 }
 0x3cb   :  { %12186 = vmatmul.mubr.bf16.gmra.mrb[4].mxu0 %v18076_v18  ;;  %v18081_v18 = vld [vmem:[#allocation48_spill] sm:$0xff] }
 0x3cc   :  { %12189 = vmatprep.mubr.bf16.mxu0 %v18077_v23  ;;  %12202 = vmatpush3.bf16.msra.mxu0 %v13143_v7  ;;  %v13147_v23 = vld [vmem:[%s17232_s3 + $0x3f0] sm:$0xff]   ;;  %v13148_v7 = vld [vmem:[%s17232_s3 + $0x3f8] sm:$0xff]  }
 0x3cd   :  { %12203 = vmatprep.subr.bf16.mxu0 %v13144_v11 }
 0x3d0   :  { %12204 = vmatpush3.bf16.msra.mxu0 %v13144_v11  ;;  %v18080_v11 = vld [vmem:[#allocation72_spill] sm:$0xff] }
 0x3d1   :  { %12205 = vmatprep.subr.bf16.mxu0 %v13145_v51 }
 0x3d3   :  { %12190 = vmatmul.mubr.bf16.gmra.mrb[8].mxu0 %v18078_v34  ;;  %v18083_v34 = vld [vmem:[#allocation54_spill] sm:$0xff] }
 0x3d4   :  { %12193 = vmatprep.mubr.bf16.mxu0 %v18079_v55  ;;  %12206 = vmatpush3.bf16.msra.mxu0 %v13145_v51  ;;  %v13149_v51 = vld [vmem:[%s17232_s3 + $0x400] sm:$0xff]   ;;  %v18082_v55 = vld [vmem:[#allocation5_spill] sm:$0xff] }
 0x3d5   :  { %12207 = vmatprep.subr.bf16.mxu0 %v13146_v38 }
 0x3d8   :  { %12208 = vmatpush3.bf16.msra.mxu0 %v13146_v38  ;;  %v13150_v38 = vld [vmem:[%s17232_s3 + $0x408] sm:$0xff]  }
 0x3d9   :  { %12209 = vmatprep.subr.bf16.mxu0 %v13147_v23 }
 0x3db   :  { %12194 = vmatmul.mubr.bf16.gmra.mrb[12].mxu0 %v18080_v11 }
 0x3dc   :  { %12210 = vmatpush3.bf16.msra.mxu0 %v13147_v23  ;;  %12213 = vmatprep.mubr.bf16.mxu0 %v18081_v18  ;;  %v13151_v18 = vld [vmem:[%s17232_s3 + $0x410] sm:$0xff]   ;;  %v18084_v23 = vld [vmem:[#allocation47_spill] sm:$0xff] }
 0x3dd   :  { %12211 = vmatprep.subr.bf16.mxu0 %v13148_v7  ;;  %v10808_v11 = vpack.c.bf16 %v18084_v23, %v18028_v35  ;;  %v13154_v35 = vld [vmem:[%s17232_s3 + $0x428] sm:$0xff]  }
 0x3e0   :  { %12212 = vmatpush3.bf16.msra.mxu0 %v13148_v7  ;;  %v13152_v7 = vld [vmem:[%s17232_s3 + $0x418] sm:$0xff]  }
 0x3e1   :  { %12229 = vmatprep.subr.bf16.mxu0 %v13149_v51 }
 0x3e3   :  { %12214 = vmatmul.mubr.bf16.vlgmr.msra.gmra.mrb[0].mxu0 %v18082_v55  ;;  %v18086_v55 = vld [vmem:[#allocation93_spill] sm:$0xff] }
 0x3e4   :  { %12217 = vmatprep.mubr.bf16.mxu0 %v18083_v34  ;;  %12230 = vmatpush3.bf16.msra.mxu0 %v13149_v51  ;;  %v13153_v34 = vld [vmem:[%s17232_s3 + $0x420] sm:$0xff]  }
 0x3e5   :  { %12231 = vmatprep.subr.bf16.mxu0 %v13150_v38 }
 0x3e8   :  { %12232 = vmatpush3.bf16.msra.mxu0 %v13150_v38  ;;  %v13156_v38 = vld [vmem:[%s17232_s3 + $0x438] sm:$0xff]  }
 0x3e9   :  { %12233 = vmatprep.subr.bf16.mxu0 %v13151_v18 }
 0x3eb   :  { %12218 = vmatmul.mubr.bf16.gmra.mrb[4].mxu0 %v10808_v11  ;;  %v18087_v11 = vld [vmem:[#allocation59_spill] sm:$0xff] }
 0x3ec   :  { %12221 = vmatprep.mubr.bf16.mxu0 %v18085_v44  ;;  %12234 = vmatpush3.bf16.msra.mxu0 %v13151_v18  ;;  %v13155_v44 = vld [vmem:[%s17232_s3 + $0x430] sm:$0xff]   ;;  %v10809_v51 = vpack.c.bf16 %v18087_v11, %v18032_v54  ;;  %v18088_v18 = vshrl.u32 %v15666_v40, 16  ;;  %v13157_v54 = vld [vmem:[%s17232_s3 + $0x440] sm:$0xff]  }
 0x3ed   :  { %12235 = vmatprep.subr.bf16.mxu0 %v13152_v7 }
 0x3f0   :  { %12236 = vmatpush3.bf16.msra.mxu0 %v13152_v7  ;;  %v6028_v7 = vrot.slane %v18088_v18, 4 }
 0x3f1   :  { %12237 = vmatprep.subr.bf16.mxu0 %v13153_v34 }
 0x3f3   :  { %12222 = vmatmul.mubr.bf16.gmra.mrb[8].mxu0 %v18086_v55  ;;  %v13158_v55 = vld [vmem:[%s17232_s3 + $0x448] sm:$0xff]  }
 0x3f4   :  { %12225 = vmatprep.mubr.bf16.mxu0 %v15771_v63  ;;  %12238 = vmatpush3.bf16.msra.mxu0 %v13153_v34  ;;  %v18089_v63 = vshll.u32 %v15666_v40, 16 }
 0x3f5   :  { %12239 = vmatprep.subr.bf16.mxu0 %v13154_v35 }
 0x3f6   :  { %v6031_v34 = vrot.slane %v18089_v63, 5 }
 0x3f8   :  { %12240 = vmatpush3.bf16.msra.mxu0 %v13154_v35  ;;  %v6032_v35 = vor.u32 %v6031_v34, %v6028_v7  ;;  %v18092_v34 = vshll.u32 %v15717_v61, 16 }
 0x3f9   :  { %12241 = vmatprep.subr.bf16.mxu0 %v13155_v44 }
 0x3fa   :  { %v6033_v18 = vrot.slane %v6032_v35, 4 }
 0x3fb   :  { %12226 = vmatmul.mubr.bf16.gmra.mrb[12].mxu0 %v10809_v51  ;;  %v13159_v51 = vld [vmem:[%s17232_s3 + $0x450] sm:$0xff]  }
 0x3fc   :  { %12242 = vmatpush3.bf16.msra.mxu0 %v13155_v44  ;;  %12245 = vmatprep.mubr.bf16.mxu0 %v17979_v50  ;;  %v18090_v50 = vshll.u32 %v15668_v36, 16 }
 0x3fd   :  { %12243 = vmatprep.subr.bf16.mxu0 %v13156_v38 }
 0x3fe   :  { %v6037_v44 = vrot.slane %v18090_v50, 5 }
 0x400   :  { %12244 = vmatpush3.bf16.msra.mxu0 %v13156_v38  ;;  %v16370_v38 = vsel %vm14469_vm3, %v6033_v18, %v6037_v44  ;;  %v13163_v44 = vld [vmem:[%s17232_s3 + $0x470] sm:$0xff]  }
 0x401   :  { %12261 = vmatprep.subr.bf16.mxu0 %v13157_v54  ;;  %v10381_v7 = vcombine.low %v16128_v26, %v16370_v38  ;;  %v13161_v26 = vld [vmem:[%s17232_s3 + $0x460] sm:$0xff]  }
 0x403   :  { %12246 = vmatmul.mubr.bf16.vlgmr.msra.gmra.mrb[0].mxu0 %v15835_v31  ;;  %v13160_v31 = vld [vmem:[%s17232_s3 + $0x458] sm:$0xff]  }
 0x404   :  { %12249 = vmatprep.mubr.bf16.mxu0 %v15872_v0  ;;  %12262 = vmatpush3.bf16.msra.mxu0 %v13157_v54  ;;  %v18091_v0 = vshrl.u32 %v15717_v61, 16  ;;  %v6045_v54 = vrot.slane %v18092_v34, 5  ;;  %v13171_v34 = vld [vmem:[%s17232_s3 + $0x4b0] sm:$0xff]  }
 0x405   :  { %12263 = vmatprep.subr.bf16.mxu0 %v13158_v55 }
 0x406   :  { %v6042_v63 = vrot.slane %v18091_v0, 4  ;;  %v13167_v0 = vld [vmem:[%s17232_s3 + $0x490] sm:$0xff]  }
 0x408   :  { %12264 = vmatpush3.bf16.msra.mxu0 %v13158_v55  ;;  %v6046_v35 = vor.u32 %v6045_v54, %v6042_v63  ;;  %v13162_v55 = vld [vmem:[%s17232_s3 + $0x468] sm:$0xff]  }
 0x409   :  { %12265 = vmatprep.subr.bf16.mxu0 %v13159_v51 }
 0x40a   :  { %v6047_v18 = vrot.slane %v6046_v35, 4 }
 0x40b   :  { %12250 = vmatmul.mubr.bf16.gmra.mrb[4].mxu0 %v10381_v7 }
 0x40c   :  { %12253 = vmatprep.mubr.bf16.mxu0 %v15431_v15  ;;  %12266 = vmatpush3.bf16.msra.mxu0 %v13159_v51  ;;  %v18093_v15 = vshll.u32 %v15729_v20, 16 }
 0x40d   :  { %12267 = vmatprep.subr.bf16.mxu0 %v13160_v31 }
 0x40e   :  { %v6051_v50 = vrot.slane %v18093_v15, 5 }
 0x410   :  { %12268 = vmatpush3.bf16.msra.mxu0 %v13160_v31  ;;  %v16397_v51 = vsel %vm14469_vm3, %v6047_v18, %v6051_v50  ;;  %v6239_v31 = vrot.slane %v15668_v36, 5  ;;  %v18096_v18 = vld [vmem:[#allocation46_spill] sm:$0xff]  ;;  %v13184_v50 = vld [vmem:[%s17232_s3 + $0x518] sm:$0xff]  }
 0x411   :  { %12269 = vmatprep.subr.bf16.mxu0 %v13161_v26  ;;  %v10382_v7 = vcombine.low %v16162_v43, %v16397_v51  ;;  %v13166_v43 = vld [vmem:[%s17232_s3 + $0x488] sm:$0xff]   ;;  %v18097_v15 = vcombine.low %v18096_v18, %v15839_v41 }
 0x413   :  { %12254 = vmatmul.mubr.bf16.gmra.mrb[8].mxu0 %v15435_v13  ;;  %v13164_v13 = vld [vmem:[%s17232_s3 + $0x478] sm:$0xff]  }
 0x414   :  { %12257 = vmatprep.mubr.bf16.mxu0 %v15919_v42  ;;  %12270 = vmatpush3.bf16.msra.mxu0 %v13161_v26  ;;  %v13165_v42 = vld [vmem:[%s17232_s3 + $0x480] sm:$0xff]   ;;  %v18094_v26 = vld [vmem:[#allocation8_spill] sm:$0xff] }
 0x415   :  { %12271 = vmatprep.subr.bf16.mxu0 %v13162_v55  ;;  %v18095_v35 = vcombine.low %v18094_v26, %v15807_v28  ;;  %v13198_v26 = vld [vmem:[%s17232_s3 + $0x588] sm:$0xff]  }
 0x418   :  { %12272 = vmatpush3.bf16.msra.mxu0 %v13162_v55  ;;  %v13180_v55 = vld [vmem:[%s17232_s3 + $0x4f8] sm:$0xff]  }
 0x419   :  { %12273 = vmatprep.subr.bf16.mxu0 %v13163_v44 }
 0x41b   :  { %12258 = vmatmul.mubr.bf16.gmra.mrb[12].mxu0 %v10382_v7  ;;  %v18099_v7 = vld [vmem:[#allocation40_spill] sm:$0xff] }
 0x41c   :  { %12274 = vmatpush3.bf16.msra.mxu0 %v13163_v44  ;;  %12277 = vmatprep.mubr.bf16.mxu0 %v15309_v17  ;;  %v10391_v17 = vrot.slane %v15666_v40, 9  ;;  %v13169_v40 = vld [vmem:[%s17232_s3 + $0x4a0] sm:$0xff]  }
 0x41d   :  { %12275 = vmatprep.subr.bf16.mxu0 %v13164_v13  ;;  %v18098_v44 = vld [vmem:[#allocation74_spill] sm:$0xff] }
 0x41e   :  { %v16420_v63 = vsel %vm15242_vm12, %v10391_v17, %v6239_v31  ;;  %v18102_v31 = vld [vmem:[#allocation31_spill] sm:$0xff] }
 0x41f   :  { %v10409_v36 = vcombine.low %v16204_v16, %v16420_v63  ;;  %v6243_v16 = vrot.slane %v15729_v20, 5 }
 0x420   :  { %12276 = vmatpush3.bf16.msra.mxu0 %v13164_v13  ;;  %v18100_v13 = vcombine.low %v18098_v44, %v18099_v7 }
 0x421   :  { %12293 = vmatprep.subr.bf16.mxu0 %v13165_v42 }
 0x423   :  { %12278 = vmatmul.mubr.bf16.vlgmr.msra.gmra.mrb[0].mxu0 %v15936_v14  ;;  %v13168_v14 = vld [vmem:[%s17232_s3 + $0x498] sm:$0xff]  }
 0x424   :  { %12281 = vmatprep.mubr.bf16.mxu0 %v15951_v3  ;;  %12294 = vmatpush3.bf16.msra.mxu0 %v13165_v42  ;;  %v13170_v3 = vld [vmem:[%s17232_s3 + $0x4a8] sm:$0xff]   ;;  %v13188_v42 = vld [vmem:[%s17232_s3 + $0x538] sm:$0xff]  }
 0x425   :  { %12295 = vmatprep.subr.bf16.mxu0 %v13166_v43 }
 0x428   :  { %12296 = vmatpush3.bf16.msra.mxu0 %v13166_v43  ;;  %v18101_v43 = vld [vmem:[#allocation35_spill] sm:$0xff] }
 0x429   :  { %12297 = vmatprep.subr.bf16.mxu0 %v13167_v0  ;;  %v18103_v17 = vcombine.low %v18101_v43, %v18102_v31 }
 0x42b   :  { %12282 = vmatmul.mubr.bf16.gmra.mrb[4].mxu0 %v10409_v36 }
 0x42c   :  { %12285 = vmatprep.mubr.bf16.mxu0 %v17999_v21  ;;  %12298 = vmatpush3.bf16.msra.mxu0 %v13167_v0  ;;  %v10392_v21 = vrot.slane %v15717_v61, 9  ;;  %v13173_v61 = vld [vmem:[%s17232_s3 + $0x4c0] sm:$0xff]  }
 0x42d   :  { %12299 = vmatprep.subr.bf16.mxu0 %v13168_v14  ;;  %v18104_v0 = vld [vmem:[#allocation34_spill] sm:$0xff] }
 0x42e   :  { %v16443_v54 = vsel %vm15242_vm12, %v10392_v21, %v6243_v16  ;;  %v10814_v36 = vpack.c.bf16 %v18104_v0, %v18084_v23  ;;  %v18105_v23 = vld [vmem:[#allocation75_spill] sm:$0xff]  ;;  %v13196_v21 = vld [vmem:[%s17232_s3 + $0x578] sm:$0xff]  }
 0x42f   :  { %v10410_v20 = vcombine.low %v16242_v5, %v16443_v54  ;;  %v13176_v5 = vld [vmem:[%s17232_s3 + $0x4d8] sm:$0xff]  }
 0x430   :  { %12300 = vmatpush3.bf16.msra.mxu0 %v13168_v14  ;;  %v13192_v14 = vld [vmem:[%s17232_s3 + $0x558] sm:$0xff]  }
 0x431   :  { %12301 = vmatprep.subr.bf16.mxu0 %v13169_v40 }
 0x433   :  { %12286 = vmatmul.mubr.bf16.gmra.mrb[8].mxu0 %v18000_v57  ;;  %v13172_v57 = vld [vmem:[%s17232_s3 + $0x4b8] sm:$0xff]  }
 0x434   :  { %12289 = vmatprep.mubr.bf16.mxu0 %v15979_v19  ;;  %12302 = vmatpush3.bf16.msra.mxu0 %v13169_v40  ;;  %v13174_v19 = vld [vmem:[%s17232_s3 + $0x4c8] sm:$0xff]   ;;  %v18106_v40 = vld [vmem:[#allocation73_spill] sm:$0xff] }
 0x435   :  { %12303 = vmatprep.subr.bf16.mxu0 %v13170_v3 }
 0x438   :  { %12304 = vmatpush3.bf16.msra.mxu0 %v13170_v3  ;;  %v18107_v3 = vld [vmem:[#allocation96_spill] sm:$0xff] }
 0x439   :  { %12305 = vmatprep.subr.bf16.mxu0 %v13171_v34  ;;  %v10815_v16 = vpack.c.bf16 %v18107_v3, %v18087_v11  ;;  %v13197_v11 = vld [vmem:[%s17232_s3 + $0x580] sm:$0xff]  }
 0x43b   :  { %12290 = vmatmul.mubr.bf16.gmra.mrb[12].mxu0 %v10410_v20 }
 0x43c   :  { %12306 = vmatpush3.bf16.msra.mxu0 %v13171_v34  ;;  %12309 = vmatprep.mubr.bf16.mxu0 %v18007_v12  ;;  %v13175_v12 = vld [vmem:[%s17232_s3 + $0x4d0] sm:$0xff]   ;;  %v18108_v34 = vld [vmem:[#allocation41_spill] sm:$0xff] }
 0x43d   :  { %12307 = vmatprep.subr.bf16.mxu0 %v13172_v57  ;;  %v18109_v20 = vshrl.u32 %v18108_v34, 16 }
 0x440   :  { %12308 = vmatpush3.bf16.msra.mxu0 %v13172_v57  ;;  %v7020_v57 = vrot.slane %v18109_v20, 4 }
 0x441   :  { %12325 = vmatprep.subr.bf16.mxu0 %v13173_v61 }
 0x443   :  { %12310 = vmatmul.mubr.bf16.vlgmr.msra.gmra.mrb[0].mxu0 %v15996_v33  ;;  %v13177_v33 = vld [vmem:[%s17232_s3 + $0x4e0] sm:$0xff]  }
 0x444   :  { %12313 = vmatprep.mubr.bf16.mxu0 %v16005_v6  ;;  %12326 = vmatpush3.bf16.msra.mxu0 %v13173_v61  ;;  %v13178_v6 = vld [vmem:[%s17232_s3 + $0x4e8] sm:$0xff]   ;;  %v18110_v61 = vshll.u32 %v18108_v34, 16 }
 0x445   :  { %12327 = vmatprep.subr.bf16.mxu0 %v13174_v19 }
 0x448   :  { %12328 = vmatpush3.bf16.msra.mxu0 %v13174_v19  ;;  %v7023_v19 = vrot.slane %v18110_v61, 5 }
 0x449   :  { %12329 = vmatprep.subr.bf16.mxu0 %v13175_v12 }
 0x44b   :  { %12314 = vmatmul.mubr.bf16.gmra.mrb[4].mxu0 %v18095_v35 }
 0x44c   :  { %12317 = vmatprep.mubr.bf16.mxu0 %v16018_v46  ;;  %12330 = vmatpush3.bf16.msra.mxu0 %v13175_v12  ;;  %v13179_v46 = vld [vmem:[%s17232_s3 + $0x4f0] sm:$0xff]   ;;  %v18111_v12 = vld [vmem:[#allocation57_spill] sm:$0xff] }
 0x44d   :  { %12331 = vmatprep.subr.bf16.mxu0 %v13176_v5 }
 0x450   :  { %12332 = vmatpush3.bf16.msra.mxu0 %v13176_v5  ;;  %v7024_v5 = vor.u32 %v7023_v19, %v7020_v57  ;;  %v18123_v57 = vld [vmem:[#allocation82_spill] sm:$0xff]  ;;  %v18125_v19 = vld [vmem:[#allocation43_spill] sm:$0xff] }
 0x451   :  { %12333 = vmatprep.subr.bf16.mxu0 %v13177_v33  ;;  %v18124_v61 = vcombine.low %v15807_v28, %v18123_v57  ;;  %v13219_v28 = vld [vmem:[%s17232_s3 + $0x630] sm:$0xff]  }
 0x452   :  { %v7025_v35 = vrot.slane %v7024_v5, 4 }
 0x453   :  { %12318 = vmatmul.mubr.bf16.gmra.mrb[8].mxu0 %v18013_v25  ;;  %v13182_v25 = vld [vmem:[%s17232_s3 + $0x508] sm:$0xff]  }
 0x454   :  { %12321 = vmatprep.mubr.bf16.mxu0 %v15607_v2  ;;  %12334 = vmatpush3.bf16.msra.mxu0 %v13177_v33  ;;  %v13181_v2 = vld [vmem:[%s17232_s3 + $0x500] sm:$0xff]   ;;  %v18112_v33 = vld [vmem:[#allocation67_spill] sm:$0xff] }
 0x455   :  { %12335 = vmatprep.subr.bf16.mxu0 %v13178_v6 }
 0x458   :  { %12336 = vmatpush3.bf16.msra.mxu0 %v13178_v6  ;;  %v18113_v6 = vld [vmem:[#allocation2_spill] sm:$0xff] }
 0x459   :  { %12337 = vmatprep.subr.bf16.mxu0 %v13179_v46 }
 0x45b   :  { %12322 = vmatmul.mubr.bf16.gmra.mrb[12].mxu0 %v18097_v15  ;;  %v13199_v15 = vld [vmem:[%s17232_s3 + $0x590] sm:$0xff]  }
 0x45c   :  { %12338 = vmatpush3.bf16.msra.mxu0 %v13179_v46  ;;  %12341 = vmatprep.mubr.bf16.mxu0 %v18015_v27  ;;  %v13183_v27 = vld [vmem:[%s17232_s3 + $0x510] sm:$0xff]   ;;  %v18114_v46 = vld [vmem:[#allocation11_spill] sm:$0xff] }
 0x45d   :  { %12339 = vmatprep.subr.bf16.mxu0 %v13180_v55  ;;  %v7627_v5 = vrot.slane %v18114_v46, 6 }
 0x460   :  { %12340 = vmatpush3.bf16.msra.mxu0 %v13180_v55  ;;  %v18115_v55 = vshll.u32 %v18114_v46, 16 }
 0x461   :  { %12357 = vmatprep.subr.bf16.mxu0 %v13181_v2 }
 0x462   :  { %v7029_v18 = vrot.slane %v18115_v55, 5 }
 0x463   :  { %12342 = vmatmul.mubr.bf16.vlgmr.msra.gmra.mrb[0].mxu0 %v18016_v29  ;;  %v13185_v29 = vld [vmem:[%s17232_s3 + $0x520] sm:$0xff]  }
 0x464   :  { %12345 = vmatprep.mubr.bf16.mxu0 %v18017_v59  ;;  %12358 = vmatpush3.bf16.msra.mxu0 %v13181_v2  ;;  %v13186_v59 = vld [vmem:[%s17232_s3 + $0x528] sm:$0xff]   ;;  %v7030_v2 = vsel %vm14469_vm3, %v7025_v35, %v7029_v18  ;;  %v18130_v35 = vld [vmem:[#allocation36_spill] sm:$0xff] }
 0x465   :  { %12359 = vmatprep.subr.bf16.mxu0 %v13182_v25 }
 0x468   :  { %12360 = vmatpush3.bf16.msra.mxu0 %v13182_v25  ;;  %v10519_v25 = vcombine.low %v16370_v38, %v7030_v2  ;;  %v13201_v38 = vld [vmem:[%s17232_s3 + $0x5a0] sm:$0xff]  }
 0x469   :  { %12361 = vmatprep.subr.bf16.mxu0 %v13183_v27  ;;  %v18133_v2 = vld [vmem:[#allocation18_spill] sm:$0xff] }
 0x46b   :  { %12346 = vmatmul.mubr.bf16.gmra.mrb[4].mxu0 %v18100_v13 }
 0x46c   :  { %12349 = vmatprep.mubr.bf16.mxu0 %v18021_v62  ;;  %12362 = vmatpush3.bf16.msra.mxu0 %v13183_v27  ;;  %v13187_v62 = vld [vmem:[%s17232_s3 + $0x530] sm:$0xff]   ;;  %v13200_v27 = vld [vmem:[%s17232_s3 + $0x598] sm:$0xff]  }
 0x46d   :  { %12363 = vmatprep.subr.bf16.mxu0 %v13184_v50 }
 0x470   :  { %12364 = vmatpush3.bf16.msra.mxu0 %v13184_v50  ;;  %v18116_v50 = vld [vmem:[#allocation30_spill] sm:$0xff] }
 0x471   :  { %12365 = vmatprep.subr.bf16.mxu0 %v13185_v29  ;;  %v18117_v44 = vshrl.u32 %v18116_v50, 16 }
 0x473   :  { %12350 = vmatmul.mubr.bf16.gmra.mrb[8].mxu0 %v18022_v4  ;;  %v13189_v4 = vld [vmem:[%s17232_s3 + $0x540] sm:$0xff]   ;;  %v7034_v13 = vrot.slane %v18117_v44, 4 }
 0x474   :  { %12353 = vmatprep.mubr.bf16.mxu0 %v18023_v47  ;;  %12366 = vmatpush3.bf16.msra.mxu0 %v13185_v29  ;;  %v13190_v47 = vld [vmem:[%s17232_s3 + $0x548] sm:$0xff]   ;;  %v18118_v29 = vshll.u32 %v18116_v50, 16  ;;  %v13222_v44 = vld [vmem:[%s17234_s5 + $0x40] sm:$0xff]  }
 0x475   :  { %12367 = vmatprep.subr.bf16.mxu0 %v13186_v59 }
 0x478   :  { %12368 = vmatpush3.bf16.msra.mxu0 %v13186_v59  ;;  %v7037_v59 = vrot.slane %v18118_v29, 5  ;;  %v13226_v29 = vld [vmem:[%s17234_s5 + $0x48] sm:$0xff]  }
 0x479   :  { %12369 = vmatprep.subr.bf16.mxu0 %v13187_v62 }
 0x47b   :  { %12354 = vmatmul.mubr.bf16.gmra.mrb[12].mxu0 %v18103_v17  ;;  %v18119_v17 = vld [vmem:[#allocation79_spill] sm:$0xff] }
 0x47c   :  { %12370 = vmatpush3.bf16.msra.mxu0 %v13187_v62  ;;  %12373 = vmatprep.mubr.bf16.mxu0 %v18025_v45  ;;  %v13191_v45 = vld [vmem:[%s17232_s3 + $0x550] sm:$0xff]   ;;  %v7038_v62 = vor.u32 %v7037_v59, %v7034_v13  ;;  %v13223_v13 = vld [vmem:[%s17234_s5 + $0x80] sm:$0xff]   ;;  %v13227_v59 = vld [vmem:[%s17234_s5 + $0x88] sm:$0xff]  }
 0x47d   :  { %12371 = vmatprep.subr.bf16.mxu0 %v13188_v42 }
 0x47e   :  { %v7039_v43 = vrot.slane %v7038_v62, 4  ;;  %v13229_v62 = vld [vmem:[%s17234_s5 + $0xd0] sm:$0xff]  }
 0x480   :  { %12372 = vmatpush3.bf16.msra.mxu0 %v13188_v42  ;;  %v13202_v42 = vld [vmem:[%s17232_s3 + $0x5a8] sm:$0xff]  }
 0x481   :  { %12389 = vmatprep.subr.bf16.mxu0 %v13189_v4 }
 0x483   :  { %12374 = vmatmul.mubr.bf16.vlgmr.msra.gmra.mrb[0].mxu0 %v18026_v58  ;;  %v13193_v58 = vld [vmem:[%s17232_s3 + $0x560] sm:$0xff]  }
 0x484   :  { %12377 = vmatprep.mubr.bf16.mxu0 %v16082_v24  ;;  %12390 = vmatpush3.bf16.msra.mxu0 %v13189_v4  ;;  %v13194_v24 = vld [vmem:[%s17232_s3 + $0x568] sm:$0xff]  }
 0x485   :  { %12391 = vmatprep.subr.bf16.mxu0 %v13190_v47 }
 0x488   :  { %12392 = vmatpush3.bf16.msra.mxu0 %v13190_v47 }
 0x489   :  { %12393 = vmatprep.subr.bf16.mxu0 %v13191_v45 }
 0x48b   :  { %12378 = vmatmul.mubr.bf16.gmra.mrb[4].mxu0 %v10814_v36 }
 0x48c   :  { %12381 = vmatprep.mubr.bf16.mxu0 %v18030_v32  ;;  %12394 = vmatpush3.bf16.msra.mxu0 %v13191_v45  ;;  %v13195_v32 = vld [vmem:[%s17232_s3 + $0x570] sm:$0xff]  }
 0x48d   :  { %12395 = vmatprep.subr.bf16.mxu0 %v13192_v14  ;;  %v13203_v45 = vld [vmem:[%s17232_s3 + $0x5b0] sm:$0xff]  }
 0x490   :  { %12396 = vmatpush3.bf16.msra.mxu0 %v13192_v14  ;;  %v13205_v14 = vld [vmem:[%s17232_s3 + $0x5c0] sm:$0xff]  }
 0x491   :  { %12397 = vmatprep.subr.bf16.mxu0 %v13193_v58 }
 0x493   :  { %12382 = vmatmul.mubr.bf16.gmra.mrb[8].mxu0 %v18105_v23 }
 0x494   :  { %12385 = vmatprep.mubr.bf16.mxu0 %v18106_v40  ;;  %12398 = vmatpush3.bf16.msra.mxu0 %v13193_v58  ;;  %v18122_v58 = vld [vmem:[#allocation51_spill] sm:$0xff] }
 0x495   :  { %12399 = vmatprep.subr.bf16.mxu0 %v13194_v24 }
 0x498   :  { %12400 = vmatpush3.bf16.msra.mxu0 %v13194_v24  ;;  %v13207_v24 = vld [vmem:[%s17232_s3 + $0x5d0] sm:$0xff]  }
 0x499   :  { %12401 = vmatprep.subr.bf16.mxu0 %v13195_v32 }
 0x49b   :  { %12386 = vmatmul.mubr.bf16.gmra.mrb[12].mxu0 %v10815_v16  ;;  %v13211_v16 = vld [vmem:[%s17232_s3 + $0x5f0] sm:$0xff]  }
 0x49c   :  { %12402 = vmatpush3.bf16.msra.mxu0 %v13195_v32  ;;  %12405 = vmatprep.mubr.bf16.mxu0 %v18111_v12  ;;  %v13208_v32 = vld [vmem:[%s17232_s3 + $0x5d8] sm:$0xff]  }
 0x49d   :  { %12403 = vmatprep.subr.bf16.mxu0 %v13196_v21  ;;  %v18126_v12 = vld [vmem:[#allocation53_spill] sm:$0xff] }
 0x4a0   :  { %12404 = vmatpush3.bf16.msra.mxu0 %v13196_v21 }
 0x4a1   :  { %12421 = vmatprep.subr.bf16.mxu0 %v13197_v11 }
 0x4a3   :  { %12406 = vmatmul.mubr.bf16.vlgmr.msra.gmra.mrb[0].mxu0 %v18112_v33  ;;  %v10583_v33 = vrot.slane %v18108_v34, 10 }
 0x4a4   :  { %12409 = vmatprep.mubr.bf16.mxu0 %v18113_v6  ;;  %12422 = vmatpush3.bf16.msra.mxu0 %v13197_v11  ;;  %v18127_v11 = vcombine.low %v15839_v41, %v18126_v12  ;;  %v18132_v41 = vld [vmem:[#allocation69_spill] sm:$0xff] }
 0x4a5   :  { %12423 = vmatprep.subr.bf16.mxu0 %v13198_v26  ;;  %v7628_v55 = vsel %vm15075_vm9, %v10583_v33, %v7627_v5 }
 0x4a6   :  { %v10601_v18 = vcombine.low %v18099_v7, %v7628_v55  ;;  %v13221_v7 = vld [vmem:[%s17234_s5 + $0xc0] sm:$0xff]  }
 0x4a7   :  { %11346 = vmatprep.subr.bf16.mxu1 %v13221_v7 }
 0x4a8   :  { %12424 = vmatpush3.bf16.msra.mxu0 %v13198_v26  ;;  %v18129_v26 = vld [vmem:[#allocation39_spill] sm:$0xff]  ;;  %11347 = vmatpush3.bf16.msra.mxu1 %v13223_v13 }
 0x4a9   :  { %12425 = vmatprep.subr.bf16.mxu0 %v13199_v15 }
 0x4ab   :  { %12410 = vmatmul.mubr.bf16.gmra.mrb[4].mxu0 %v10519_v25  ;;  %v18134_v25 = vld [vmem:[#allocation72_spill] sm:$0xff] }
 0x4ac   :  { %12413 = vmatprep.mubr.bf16.mxu0 %v18044_v1  ;;  %12426 = vmatpush3.bf16.msra.mxu0 %v13199_v15  ;;  %v18120_v1 = vld [vmem:[#allocation80_spill] sm:$0xff] }
 0x4ad   :  { %12427 = vmatprep.subr.bf16.mxu0 %v13200_v27  ;;  %v18121_v4 = vshll.u32 %v18120_v1, 16  ;;  %v7235_v3 = vrot.slane %v18120_v1, 5  ;;  %v7631_v15 = vrot.slane %v18120_v1, 6  ;;  %v13233_v1 = vld [vmem:[%s17234_s5 + $0xd8] sm:$0xff]  }
 0x4af   :  { %v7043_v47 = vrot.slane %v18121_v4, 5  ;;  %v13234_v4 = vld [vmem:[%s17234_s5 + $0x58] sm:$0xff]  }
 0x4b0   :  { %12428 = vmatpush3.bf16.msra.mxu0 %v13200_v27 }
 0x4b1   :  { %12429 = vmatprep.subr.bf16.mxu0 %v13201_v38  ;;  %v7044_v0 = vsel %vm14469_vm3, %v7039_v43, %v7043_v47  ;;  %v13231_v43 = vld [vmem:[%s17234_s5 + $0x90] sm:$0xff]   ;;  %v13235_v47 = vld [vmem:[%s17234_s5 + $0x98] sm:$0xff]  }
 0x4b2   :  { %v10520_v36 = vcombine.low %v16397_v51, %v7044_v0  ;;  %v7231_v51 = vrot.slane %v18114_v46, 5  ;;  %v10584_v46 = vrot.slane %v18116_v50, 10  ;;  %v13237_v0 = vld [vmem:[%s17234_s5 + $0xe0] sm:$0xff]  }
 0x4b3   :  { %12414 = vmatmul.mubr.bf16.gmra.mrb[8].mxu0 %v18045_v53  ;;  %v13204_v53 = vld [vmem:[%s17232_s3 + $0x5b8] sm:$0xff]  }
 0x4b4   :  { %12417 = vmatprep.mubr.bf16.mxu0 %v18119_v17  ;;  %12430 = vmatpush3.bf16.msra.mxu0 %v13201_v38  ;;  %v7632_v27 = vsel %vm15075_vm9, %v10584_v46, %v7631_v15  ;;  %v13228_v38 = vld [vmem:[%s17234_s5 + $0x8] sm:$0xff]   ;;  %v13232_v17 = vld [vmem:[%s17234_s5 + $0x10] sm:$0xff]  }
 0x4b5   :  { %12431 = vmatprep.subr.bf16.mxu0 %v13202_v42 }
 0x4b8   :  { %12432 = vmatpush3.bf16.msra.mxu0 %v13202_v42  ;;  %v13230_v42 = vld [vmem:[%s17234_s5 + $0x50] sm:$0xff]  }
 0x4b9   :  { %12433 = vmatprep.subr.bf16.mxu0 %v13203_v45 }
 0x4bb   :  { %12418 = vmatmul.mubr.bf16.gmra.mrb[12].mxu0 %v10520_v36  ;;  %v13238_v36 = vld [vmem:[%s17234_s5 + $0x60] sm:$0xff]  }
 0x4bc   :  { %12434 = vmatpush3.bf16.msra.mxu0 %v13203_v45  ;;  %12437 = vmatprep.mubr.bf16.mxu0 %v18057_v52  ;;  %v10529_v52 = vrot.slane %v18108_v34, 9  ;;  %v10602_v34 = vcombine.low %v18102_v31, %v7632_v27  ;;  %v13225_v31 = vld [vmem:[%s17234_s5 + $0xc8] sm:$0xff]   ;;  %v13236_v45 = vld [vmem:[%s17234_s5 + $0x18] sm:$0xff]  }
 0x4bd   :  { %12435 = vmatprep.subr.bf16.mxu0 %v13204_v53  ;;  %11348 = vmatprep.subr.bf16.mxu1 %v13225_v31  ;;  %v18140_v27 = vld [vmem:[#allocation81_spill] sm:$0xff] }
 0x4be   :  { %v7232_v23 = vsel %vm15242_vm12, %v10529_v52, %v7231_v51  ;;  %11349 = vmatpush3.bf16.msra.mxu1 %v13227_v59  ;;  %v13242_v51 = vld [vmem:[%s17234_s5 + $0x68] sm:$0xff]  }
 0x4bf   :  { %v10547_v40 = vcombine.low %v16420_v63, %v7232_v23  ;;  %v13210_v63 = vld [vmem:[%s17232_s3 + $0x5e8] sm:$0xff]   ;;  %11350 = vmatprep.subr.bf16.mxu1 %v13229_v62  ;;  %v13246_v23 = vld [vmem:[%s17234_s5 + $0x70] sm:$0xff]   ;;  %v18142_v62 = vld [vmem:[#allocation10_spill] sm:$0xff] }
 0x4c0   :  { %12436 = vmatpush3.bf16.msra.mxu0 %v13204_v53  ;;  %v13239_v53 = vld [vmem:[%s17234_s5 + $0xa0] sm:$0xff]   ;;  %v13244_v52 = vld [vmem:[%s17234_s5 + $0x28] sm:$0xff]  }
 0x4c1   :  { %12453 = vmatprep.subr.bf16.mxu0 %v13205_v14 }
 0x4c2   :  { %11351 = vmatpush3.bf16.msra.mxu1 %v13231_v43 }
 0x4c3   :  { %12438 = vmatmul.mubr.bf16.vlgmr.msra.gmra.mrb[0].mxu0 %v18122_v58  ;;  %11352 = vmatprep.subr.bf16.mxu1 %v13233_v1  ;;  %v13243_v58 = vld [vmem:[%s17234_s5 + $0xa8] sm:$0xff]  }
 0x4c4   :  { %12441 = vmatprep.mubr.bf16.mxu0 %v16212_v8  ;;  %12454 = vmatpush3.bf16.msra.mxu0 %v13205_v14  ;;  %v13209_v8 = vld [vmem:[%s17232_s3 + $0x5e0] sm:$0xff]  }
 0x4c5   :  { %12455 = vmatprep.subr.bf16.mxu0 %v13206_v10  ;;  %v13240_v14 = vld [vmem:[%s17234_s5 + $0x20] sm:$0xff]  }
 0x4c6   :  { %11353 = vmatpush3.bf16.msra.mxu1 %v13235_v47 }
 0x4c7   :  { %11354 = vmatprep.subr.bf16.mxu1 %v13237_v0 }
 0x4c8   :  { %12456 = vmatpush3.bf16.msra.mxu0 %v13206_v10  ;;  %v13241_v10 = vld [vmem:[%s17234_s5 + $0xe8] sm:$0xff]  }
 0x4c9   :  { %12457 = vmatprep.subr.bf16.mxu0 %v13207_v24 }
 0x4ca   :  { %11355 = vmatpush3.bf16.msra.mxu1 %v13239_v53 }
 0x4cb   :  { %12442 = vmatmul.mubr.bf16.gmra.mrb[4].mxu0 %v10547_v40  ;;  %11356 = vmatprep.subr.bf16.mxu1 %v13241_v10  ;;  %v13247_v40 = vld [vmem:[%s17234_s5 + $0xb0] sm:$0xff]  }
 0x4cc   :  { %12445 = vmatprep.mubr.bf16.mxu0 %v15401_v22  ;;  %12458 = vmatpush3.bf16.msra.mxu0 %v13207_v24  ;;  %v10530_v22 = vrot.slane %v18116_v50, 9  ;;  %v13224_v50 = vld [vmem:[%s17234_s5] sm:$0xff]   ;;  %v13245_v24 = vld [vmem:[%s17234_s5 + $0xf0] sm:$0xff]  }
 0x4cd   :  { %12459 = vmatprep.subr.bf16.mxu0 %v13208_v32 }
 0x4ce   :  { %v7236_v21 = vsel %vm15242_vm12, %v10530_v22, %v7235_v3  ;;  %11357 = vmatpush3.bf16.msra.mxu1 %v13243_v58  ;;  %v13251_v3 = vld [vmem:[%s17234_s5 + $0xb8] sm:$0xff]  }
 0x4cf   :  { %v10548_v20 = vcombine.low %v16443_v54, %v7236_v21  ;;  %v13216_v54 = vld [vmem:[%s17232_s3 + $0x618] sm:$0xff]   ;;  %11358 = vmatprep.subr.bf16.mxu1 %v13245_v24  ;;  %v18144_v24 = vld [vmem:[#allocation56_spill] sm:$0xff] }
 0x4d0   :  { %12460 = vmatpush3.bf16.msra.mxu0 %v13208_v32  ;;  %v13248_v32 = vld [vmem:[%s17234_s5 + $0x30] sm:$0xff]   ;;  %v13252_v22 = vld [vmem:[%s17234_s5 + $0x38] sm:$0xff]  }
 0x4d1   :  { %12461 = vmatprep.subr.bf16.mxu0 %v13209_v8 }
 0x4d2   :  { %11359 = vmatpush3.bf16.msra.mxu1 %v13247_v40 }
 0x4d3   :  { %12446 = vmatmul.mubr.bf16.gmra.mrb[8].mxu0 %v15427_v56  ;;  %v13212_v56 = vld [vmem:[%s17232_s3 + $0x5f8] sm:$0xff]  }
 0x4d4   :  { %12449 = vmatprep.mubr.bf16.mxu0 %v16246_v39  ;;  %12462 = vmatpush3.bf16.msra.mxu0 %v13209_v8  ;;  %v13213_v39 = vld [vmem:[%s17232_s3 + $0x600] sm:$0xff]   ;;  %v13249_v8 = vld [vmem:[%s17234_s5 + $0xf8] sm:$0xff]  }
 0x4d5   :  { %12463 = vmatprep.subr.bf16.mxu0 %v13210_v63  ;;  %11360 = vmatprep.subr.bf16.mxu1 %v13249_v8 }
 0x4d6   :  { %11361 = vmatpush3.bf16.msra.mxu1 %v13251_v3 }
 0x4d8   :  { %12464 = vmatpush3.bf16.msra.mxu0 %v13210_v63  ;;  %v13250_v63 = vld [vmem:[%s17234_s5 + $0x78] sm:$0xff]  }
 0x4d9   :  { %12465 = vmatprep.subr.bf16.mxu0 %v13211_v16 }
 0x4db   :  { %12450 = vmatmul.mubr.bf16.gmra.mrb[12].mxu0 %v10548_v20  ;;  %v16798_v20 = vld [vmem:[%s17235_s4] ss:$0 sm:$0xff] }
 0x4dc   :  { %12466 = vmatpush3.bf16.msra.mxu0 %v13211_v16  ;;  %12469 = vmatprep.mubr.bf16.mxu0 %v18068_v30  ;;  %v13215_v30 = vld [vmem:[%s17232_s3 + $0x610] sm:$0xff]   ;;  %v13253_v16 = vld [vmem:[%s17234_s5 + $0x140] sm:$0xff]  }
 0x4dd   :  { %12467 = vmatprep.subr.bf16.mxu0 %v13212_v56  ;;  %11368 = vmatprep.subr.bf16.mxu1 %v13253_v16 }
 0x4e0   :  { %12468 = vmatpush3.bf16.msra.mxu0 %v13212_v56  ;;  %v18135_v56 = vld [vmem:[#allocation45_spill] sm:$0xff] }
 0x4e1   :  { %12485 = vmatprep.subr.bf16.mxu0 %v13213_v39 }
 0x4e3   :  { %12470 = vmatmul.mubr.bf16.vlgmr.msra.gmra.mrb[0].mxu0 %v18069_v60  ;;  %v13218_v60 = vld [vmem:[%s17232_s3 + $0x628] sm:$0xff]  }
 0x4e4   :  { %12473 = vmatprep.mubr.bf16.mxu0 %v15707_v48  ;;  %12486 = vmatpush3.bf16.msra.mxu0 %v13213_v39  ;;  %v13217_v48 = vld [vmem:[%s17232_s3 + $0x620] sm:$0xff]  }
 0x4e5   :  { %12487 = vmatprep.subr.bf16.mxu0 %v13214_v9 }
 0x4e8   :  { %12488 = vmatpush3.bf16.msra.mxu0 %v13214_v9 }
 0x4e9   :  { %12489 = vmatprep.subr.bf16.mxu0 %v13215_v30 }
 0x4eb   :  { %12474 = vmatmul.mubr.bf16.gmra.mrb[4].mxu0 %v18124_v61 }
 0x4ec   :  { %12477 = vmatprep.mubr.bf16.mxu0 %v18071_v49  ;;  %12490 = vmatpush3.bf16.msra.mxu0 %v13215_v30  ;;  %v13220_v49 = vld [vmem:[%s17232_s3 + $0x638] sm:$0xff]   ;;  %v18136_v30 = vld [vmem:[#allocation20_spill] sm:$0xff] }
 0x4ed   :  { %12491 = vmatprep.subr.bf16.mxu0 %v13216_v54 }
 0x4f0   :  { %12492 = vmatpush3.bf16.msra.mxu0 %v13216_v54 }
 0x4f1   :  { %12493 = vmatprep.subr.bf16.mxu0 %v13217_v48 }
 0x4f3   :  { %12478 = vmatmul.mubr.bf16.gmra.mrb[8].mxu0 %v18072_v37  ;;  %v18128_v37 = vld [vmem:[#allocation12_spill] sm:$0xff] }
 0x4f4   :  { %12481 = vmatprep.mubr.bf16.mxu0 %v18125_v19  ;;  %12494 = vmatpush3.bf16.msra.mxu0 %v13217_v48  ;;  %v18137_v48 = vld [vmem:[#allocation49_spill] sm:$0xff] }
 0x4f5   :  { %12495 = vmatprep.subr.bf16.mxu0 %v13218_v60 }
 0x4f8   :  { %12496 = vmatpush3.bf16.msra.mxu0 %v13218_v60 }
 0x4f9   :  { %12497 = vmatprep.subr.bf16.mxu0 %v13219_v28 }
 0x4fb   :  { %12482 = vmatmul.mubr.bf16.gmra.mrb[12].mxu0 %v18127_v11 }
 0x4fc   :  { %12498 = vmatpush3.bf16.msra.mxu0 %v13219_v28  ;;  %12501 = vmatprep.mubr.bf16.mxu0 %v18128_v37 }
 0x4fd   :  { %12499 = vmatprep.subr.bf16.mxu0 %v13220_v49 }
 0x500   :  { %12500 = vmatpush3.bf16.msra.mxu0 %v13220_v49  ;;  %v18138_v49 = vld [vmem:[#allocation29_spill] sm:$0xff] }
 0x501   :  { %11324 = vmatprep.subr.bf16.mxu0 %v13222_v44 }
 0x503   :  { %12502 = vmatmul.mubr.bf16.vlgmr.msra.gmra.mrb[0].mxu0 %v18129_v26 }
 0x504   :  { %12505 = vmatprep.mubr.bf16.mxu0 %v18130_v35  ;;  %11325 = vmatpush3.bf16.msra.mxu0 %v13224_v50  ;;  %v18141_v50 = vld [vmem:[#allocation15_spill] sm:$0xff] }
 0x505   :  { %11326 = vmatprep.subr.bf16.mxu0 %v13226_v29 }
 0x508   :  { %11327 = vmatpush3.bf16.msra.mxu0 %v13228_v38 }
 0x509   :  { %11328 = vmatprep.subr.bf16.mxu0 %v13230_v42 }
 0x50b   :  { %12506 = vmatmul.mubr.bf16.gmra.mrb[4].mxu0 %v10601_v18 }
 0x50c   :  { %12509 = vmatprep.mubr.bf16.mxu0 %v18132_v41  ;;  %11329 = vmatpush3.bf16.msra.mxu0 %v13232_v17  ;;  %v18139_v41 = vld [vmem:[#allocation6_spill] sm:$0xff] }
 0x50d   :  { %11330 = vmatprep.subr.bf16.mxu0 %v13234_v4 }
 0x510   :  { %11331 = vmatpush3.bf16.msra.mxu0 %v13236_v45 }
 0x511   :  { %11332 = vmatprep.subr.bf16.mxu0 %v13238_v36 }
 0x513   :  { %12510 = vmatmul.mubr.bf16.gmra.mrb[8].mxu0 %v18133_v2 }
 0x514   :  { %12513 = vmatprep.mubr.bf16.mxu0 %v18134_v25  ;;  %11333 = vmatpush3.bf16.msra.mxu0 %v13240_v14  ;;  %v18143_v14 = vld [vmem:[#allocation63_spill] sm:$0xff] }
 0x515   :  { %11334 = vmatprep.subr.bf16.mxu0 %v13242_v51 }
 0x518   :  { %11335 = vmatpush3.bf16.msra.mxu0 %v13244_v52 }
 0x519   :  { %11336 = vmatprep.subr.bf16.mxu0 %v13246_v23 }
 0x51b   :  { %12514 = vmatmul.mubr.bf16.gmra.mrb[12].mxu0 %v10602_v34 }
 0x51c   :  { %11337 = vmatpush3.bf16.msra.mxu0 %v13248_v32 }
 0x51d   :  { %11338 = vmatprep.subr.bf16.mxu0 %v13250_v63  ;;  %v18145_v63 = vld [vmem:[#allocation55_spill] sm:$0xff] }
 0x520   :  { %11339 = vmatpush3.bf16.msra.mxu0 %v13252_v22 }
 0x5d6   :  { %v12503_v21 = vpop.f32.mrb[0].mxu0 }
 0x5d7   :  { %v12537_v39 = vadd.f32 %v12503_v21, %v18135_v56  ;;  %v7738_v9 = vpop.f32.mrb[1].mxu0  ;;  %v18146_v56 = vld [vmem:[#allocation38_spill] sm:$0xff] }
 0x5d8   :  { %v12538_v54 = vadd.f32 %v7738_v9, %v18136_v30  ;;  %v12504_v57 = vpop.f32.mrb[2].mxu0 }
 0x5d9   :  { %v7826_v61 = vadd.f32 %v12537_v39, %v16798_v20  ;;  %v12539_v60 = vadd.f32 %v12504_v57, %v18137_v48  ;;  %v7741_v19 = vpop.f32.mrb[3].mxu0 }
 0x5da   :  { %v7824_v28 = vadd.f32 %v12538_v54, %v16798_v20  ;;  %v12540_v12 = vadd.f32 %v7741_v19, %v18138_v49 }
 0x5db   :  { %v7860_v11 = vrot.slane %v7826_v61, 1  ;;  %v7827_v37 = vadd.f32 %v12539_v60, %v16798_v20 }
 0x5dc   :  { %v7842_v5 = vrot.slane %v7824_v28, 1  ;;  %v7825_v26 = vadd.f32 %v12540_v12, %v16798_v20 }
 0x5dd   :  { %v7864_v35 = vmax.f32 %v7826_v61, %v7860_v11  ;;  %v7870_v18 = vrot.slane %v7827_v37, 1 }
 0x5de   :  { %v7846_v33 = vmax.f32 %v7824_v28, %v7842_v5  ;;  %v12507_v6 = vpop.f32.mrb[4].mxu0  ;;  %v7852_v46 = vrot.slane %v7825_v26, 1 }
 0x5df   :  { %v7866_v55 = vmax.f32 %v7864_v35, %v7827_v37  ;;  %v12541_v15 = vadd.f32 %v12507_v6, %v18139_v41  ;;  %v7754_v2 = vpop.f32.mrb[5].mxu0  ;;  %v18147_v37 = vld [vmem:[#allocation84_spill] sm:$0xff] }
 0x5e0   :  { %v7848_v25 = vmax.f32 %v7846_v33, %v7825_v26  ;;  %v12542_v34 = vadd.f32 %v7754_v2, %v18140_v27  ;;  %v12508_v7 = vpop.f32.mrb[6].mxu0 }
 0x5e1   :  { %v16810_v44 = vmax.f32 %v7866_v55, %v7870_v18  ;;  %v7830_v13 = vadd.f32 %v12541_v15, %v16798_v20  ;;  %v12543_v31 = vadd.f32 %v12508_v7, %v18141_v50  ;;  %v7757_v29 = vpop.f32.mrb[7].mxu0  ;;  %v18148_v55 = vld [vmem:[#allocation4_spill] sm:$0xff] }
 0x5e2   :  { %v16814_v59 = vmax.f32 %v7848_v25, %v7852_v46  ;;  %v7828_v38 = vadd.f32 %v12542_v34, %v16798_v20  ;;  %v12544_v42 = vadd.f32 %v7757_v29, %v18142_v62  ;;  %v18149_v46 = vld [vmem:[#allocation65_spill] sm:$0xff] }
 0x5e3   :  { %v7896_v43 = vrot.slane %v7830_v13, 1  ;;  %v7831_v17 = vadd.f32 %v12543_v31, %v16798_v20  ;;  %v7935_v28 = vrot.slane %v16810_v44, 2  ;;  %v7943_v49 = vrot.slane %v16810_v44, 6  ;;  %v18150_v31 = vld [vmem:[#allocation33_spill] sm:$0xff] }
 0x5e4   :  { %v7878_v1 = vrot.slane %v7828_v38, 1  ;;  %v7829_v4 = vadd.f32 %v12544_v42, %v16798_v20  ;;  %v7922_v48 = vrot.slane %v16814_v59, 4  ;;  %v7918_v35 = vrot.slane %v16814_v59, 2 }
 0x5e5   :  { %v7900_v47 = vmax.f32 %v7830_v13, %v7896_v43  ;;  %v7906_v53 = vrot.slane %v7831_v17, 1  ;;  %v7926_v15 = vrot.slane %v16814_v59, 6  ;;  %v7939_v7 = vrot.slane %v16810_v44, 4 }
 0x5e6   :  { %v7882_v45 = vmax.f32 %v7828_v38, %v7878_v1  ;;  %v12511_v0 = vpop.f32.mrb[8].mxu0  ;;  %v7888_v52 = vrot.slane %v7829_v4, 1 }
 0x5e7   :  { %v7902_v36 = vmax.f32 %v7900_v47, %v7831_v17  ;;  %v12545_v10 = vadd.f32 %v12511_v0, %v18143_v14  ;;  %v7770_v51 = vpop.f32.mrb[9].mxu0 }
 0x5e8   :  { %v7884_v58 = vmax.f32 %v7882_v45, %v7829_v4  ;;  %v12546_v23 = vadd.f32 %v7770_v51, %v18144_v24  ;;  %v12512_v40 = vpop.f32.mrb[10].mxu0 }
 0x5e9   :  { %v16822_v32 = vmax.f32 %v7902_v36, %v7906_v53  ;;  %v7834_v8 = vadd.f32 %v12545_v10, %v16798_v20  ;;  %v12547_v3 = vadd.f32 %v12512_v40, %v18145_v63  ;;  %v7773_v22 = vpop.f32.mrb[11].mxu0 }
 0x5ea   :  { %v16826_v16 = vmax.f32 %v7884_v58, %v7888_v52  ;;  %v7832_v21 = vadd.f32 %v12546_v23, %v16798_v20  ;;  %v12548_v39 = vadd.f32 %v7773_v22, %v18146_v56 }
 0x5eb   :  { %v7861_v9 = vrot.slane %v7834_v8, 1  ;;  %v7835_v30 = vadd.f32 %v12547_v3, %v16798_v20  ;;  %v7969_v38 = vrot.slane %v16822_v32, 2 }
 0x5ec   :  { %v7843_v54 = vrot.slane %v7832_v21, 1  ;;  %v7833_v57 = vadd.f32 %v12548_v39, %v16798_v20 }
 0x5ed   :  { %v7865_v61 = vmax.f32 %v7834_v8, %v7861_v9  ;;  %v7871_v11 = vrot.slane %v7835_v30, 1 }
 0x5ee   :  { %v7847_v60 = vmax.f32 %v7832_v21, %v7843_v54  ;;  %v12515_v19 = vpop.f32.mrb[12].mxu0  ;;  %v7853_v6 = vrot.slane %v7833_v57, 1 }
 0x5ef   :  { %v7867_v12 = vmax.f32 %v7865_v61, %v7835_v30  ;;  %v12549_v5 = vadd.f32 %v12515_v19, %v18147_v37  ;;  %v7786_v26 = vpop.f32.mrb[13].mxu0  ;;  %v13254_v61 = vld [vmem:[%s17234_s5 + $0x100] sm:$0xff]  }
 0x5f0   :  { %v7849_v33 = vmax.f32 %v7847_v60, %v7833_v57  ;;  %v12550_v18 = vadd.f32 %v7786_v26, %v18148_v55  ;;  %v12516_v41 = vpop.f32.mrb[14].mxu0  ;;  %v13255_v60 = vld [vmem:[%s17234_s5 + $0x148] sm:$0xff]  }
 0x5f1   :  { %v16839_v2 = vmax.f32 %v7867_v12, %v7871_v11  ;;  %v7838_v25 = vadd.f32 %v12549_v5, %v16798_v20  ;;  %v12551_v27 = vadd.f32 %v12516_v41, %v18149_v46  ;;  %v7789_v34 = vpop.f32.mrb[15].mxu0  ;;  %v7952_v12 = vrot.slane %v16826_v16, 2 }
 0x5f2   :  { %v7857_v13 = vmax.f32 %v7849_v33, %v7853_v6  ;;  %v7836_v50 = vadd.f32 %v12550_v18, %v16798_v20  ;;  %v12552_v29 = vadd.f32 %v7789_v34, %v18150_v31  ;;  %v7960_v6 = vrot.slane %v16826_v16, 6  ;;  %v13256_v18 = vld [vmem:[%s17234_s5 + $0x108] sm:$0xff]  }
 0x5f3   :  { %v7897_v62 = vrot.slane %v7838_v25, 1  ;;  %v7839_v42 = vadd.f32 %v12551_v27, %v16798_v20  ;;  %v7936_v43 = vrot.slane %v16839_v2, 1  ;;  %v7932_v17 = vrot.slane %v16839_v2, 7 }
 0x5f4   :  { %v7914_v1 = vrot.slane %v7857_v13, 7  ;;  %v7923_v4 = vrot.slane %v7857_v13, 3  ;;  %v7879_v47 = vrot.slane %v7836_v50, 1  ;;  %v7837_v45 = vadd.f32 %v12552_v29, %v16798_v20 }
 0x5f5   :  { %v7901_v0 = vmax.f32 %v7838_v25, %v7897_v62  ;;  %v7907_v36 = vrot.slane %v7839_v42, 1  ;;  %v7919_v53 = vrot.slane %v7857_v13, 1  ;;  %v7927_v14 = vrot.slane %v7857_v13, 5 }
 0x5f6   :  { %v7883_v10 = vmax.f32 %v7836_v50, %v7879_v47  ;;  %v7889_v51 = vrot.slane %v7837_v45, 1  ;;  %v7916_v58 = vsel %vm7915_vm13, %v7914_v1, %v16814_v59  ;;  %v7924_v52 = vsel %vm7915_vm13, %v7923_v4, %v7922_v48  ;;  %v13259_v50 = vld [vmem:[%s17234_s5 + $0x158] sm:$0xff]   ;;  %v13263_v1 = vld [vmem:[%s17234_s5 + $0x168] sm:$0xff]   ;;  %v13265_v47 = vld [vmem:[%s17234_s5 + $0x170] sm:$0xff]  }
 0x5f7   :  { %v7903_v24 = vmax.f32 %v7901_v0, %v7839_v42  ;;  %v7920_v23 = vsel %vm7915_vm13, %v7919_v53, %v7918_v35  ;;  %v7928_v40 = vsel %vm7915_vm13, %v7927_v14, %v7926_v15  ;;  %v7981_v8 = vmax.f32 %v7916_v58, 0.0  ;;  %v13264_v4 = vld [vmem:[%s17234_s5 + $0x128] sm:$0xff]   ;;  %v13267_v0 = vld [vmem:[%s17234_s5 + $0x178] sm:$0xff]   ;;  %v13269_v14 = vld [vmem:[%s17234_s5 + $0x1c0] sm:$0xff]  }
 0x5f8   :  { %v7885_v63 = vmax.f32 %v7883_v10, %v7837_v45  ;;  %v7982_v3 = vmax.f32 %v7920_v23, 0.0  ;;  %v7984_v20 = vmax.f32 %v7928_v40, 0.0  ;;  %v7983_v22 = vmax.f32 %v7924_v52, 0.0  ;;  %v13266_v45 = vld [vmem:[%s17234_s5 + $0x130] sm:$0xff]   ;;  %v13271_v52 = vld [vmem:[%s17234_s5 + $0x1c8] sm:$0xff]  }
 0x5f9   :  { %v7911_v21 = vmax.f32 %v7903_v24, %v7907_v36  ;;  %v7997_v56 = vpack.c.bf16 %v7981_v8, %v7981_v8  ;;  %v7937_v39 = vsel %vm7915_vm13, %v7936_v43, %v7935_v28  ;;  %v16859_v9 = vsel %vm7915_vm13, %v7932_v17, %v16810_v44  ;;  %v13260_v43 = vld [vmem:[%s17234_s5 + $0x118] sm:$0xff]   ;;  %v13261_v17 = vld [vmem:[%s17234_s5 + $0x160] sm:$0xff]   ;;  %v13272_v23 = vld [vmem:[%s17234_s5 + $0x188] sm:$0xff]  }
 0x5fa   :  { %v7893_v59 = vmax.f32 %v7885_v63, %v7889_v51  ;;  %v7998_v30 = vpack.c.bf16 %v7982_v3, %v7982_v3  ;;  %v8000_v54 = vpack.c.bf16 %v7984_v20, %v7984_v20  ;;  %v7999_v57 = vpack.c.bf16 %v7983_v22, %v7983_v22  ;;  %v13268_v36 = vld [vmem:[%s17234_s5 + $0x138] sm:$0xff]   ;;  %v13270_v51 = vld [vmem:[%s17234_s5 + $0x180] sm:$0xff]   ;;  %v13273_v40 = vld [vmem:[%s17234_s5 + $0x1d0] sm:$0xff]  }
 0x5fb   :  { %v7986_v48 = vmax.f32 %v7937_v39, 0.0  ;;  %v7944_v19 = vrot.slane %v16839_v2, 5  ;;  %v7940_v28 = vrot.slane %v16839_v2, 3  ;;  %v7970_v55 = vrot.slane %v7911_v21, 1  ;;  %v13274_v8 = vld [vmem:[%s17234_s5 + $0x190] sm:$0xff]   ;;  %v13275_v63 = vld [vmem:[%s17234_s5 + $0x1d8] sm:$0xff]  }
 0x5fc   :  { %9076 = vmatprep.mubr.bf16.mxu0 %v7998_v30  ;;  %9116 = vmatprep.mubr.bf16.mxu1 %v8000_v54  ;;  %v7953_v11 = vrot.slane %v7893_v59, 1  ;;  %v7949_v37 = vrot.slane %v7893_v59, 7  ;;  %v7961_v5 = vrot.slane %v7893_v59, 5  ;;  %v7957_v26 = vrot.slane %v7893_v59, 3  ;;  %v13276_v3 = vld [vmem:[%s17234_s5 + $0x198] sm:$0xff]   ;;  %v13277_v20 = vld [vmem:[%s17234_s5 + $0x1e0] sm:$0xff]  }
 0x5fd   :  { %9077 = vmatmul.mubr.bf16.vlgmr.msra.gmra.mrb[16].mxu0 %v7997_v56  ;;  %9117 = vmatmul.mubr.bf16.vlgmr.msra.gmra.mrb[208].mxu1 %v7999_v57  ;;  %v8002_v35 = vpack.c.bf16 %v7986_v48, %v7986_v48  ;;  %v7945_v33 = vsel %vm7915_vm13, %v7944_v19, %v7943_v49  ;;  %v16878_v41 = vsel %vm7915_vm13, %v7940_v28, %v7939_v7  ;;  %v7956_v44 = vrot.slane %v16826_v16, 4  ;;  %v13257_v49 = vld [vmem:[%s17234_s5 + $0x150] sm:$0xff]   ;;  %v13278_v22 = vld [vmem:[%s17234_s5 + $0x1a0] sm:$0xff]   ;;  %v13280_v56 = vld [vmem:[%s17234_s5 + $0x1a8] sm:$0xff]  }
 0x5fe   :  { %11369 = vmatpush3.bf16.msra.mxu1 %v13254_v61  ;;  %v16881_v15 = vsel %vm7915_vm13, %v7953_v11, %v7952_v12  ;;  %v16885_v2 = vsel %vm7915_vm13, %v7949_v37, %v16826_v16  ;;  %v16892_v25 = vsel %vm7915_vm13, %v7961_v5, %v7960_v6  ;;  %v16900_v27 = vsel %vm7915_vm13, %v7970_v55, %v7969_v38  ;;  %v13258_v16 = vld [vmem:[%s17234_s5 + $0x110] sm:$0xff]   ;;  %v13283_v59 = vld [vmem:[%s17234_s5 + $0x1f8] sm:$0xff]   ;;  %v13285_v57 = vld [vmem:[%s17234_s5 + $0x240] sm:$0xff]  }
 0x5ff   :  { %9156 = vmatprep.mubr.bf16.mxu1 %v8002_v35  ;;  %11370 = vmatprep.subr.bf16.mxu1 %v13255_v60  ;;  %v16895_v46 = vsel %vm7915_vm13, %v7957_v26, %v7956_v44  ;;  %v7966_v34 = vrot.slane %v7911_v21, 7  ;;  %v7977_v7 = vrot.slane %v16822_v32, 6  ;;  %v7978_v13 = vrot.slane %v7911_v21, 5  ;;  %v13281_v39 = vld [vmem:[%s17234_s5 + $0x1f0] sm:$0xff]   ;;  %v13284_v30 = vld [vmem:[%s17234_s5 + $0x1b8] sm:$0xff]   ;;  %v13286_v48 = vld [vmem:[%s17234_s5 + $0x200] sm:$0xff]  }
 0x600   :  { %v7973_v31 = vrot.slane %v16822_v32, 4  ;;  %v7974_v29 = vrot.slane %v7911_v21, 3  ;;  %v7985_v53 = vmax.f32 %v16859_v9, 0.0  ;;  %v7988_v10 = vmax.f32 %v7945_v33, 0.0  ;;  %v13279_v21 = vld [vmem:[%s17234_s5 + $0x1e8] sm:$0xff]   ;;  %v13282_v9 = vld [vmem:[%s17234_s5 + $0x1b0] sm:$0xff]  }
 0x601   :  { %v16912_v38 = vsel %vm7915_vm13, %v7966_v34, %v16822_v32  ;;  %v16915_v62 = vsel %vm7915_vm13, %v7978_v13, %v7977_v7  ;;  %v13262_v32 = vld [vmem:[%s17234_s5 + $0x120] sm:$0xff]   ;;  %v7987_v54 = vmax.f32 %v16878_v41, 0.0  ;;  %v7990_v61 = vmax.f32 %v16881_v15, 0.0  ;;  %v13287_v19 = vld [vmem:[%s17234_s5 + $0x248] sm:$0xff]   ;;  %v13289_v11 = vld [vmem:[%s17234_s5 + $0x250] sm:$0xff]  }
 0x602   :  { %11371 = vmatpush3.bf16.msra.mxu1 %v13256_v18  ;;  %v16918_v42 = vsel %vm7915_vm13, %v7974_v29, %v7973_v31  ;;  %v8001_v58 = vpack.c.bf16 %v7985_v53, %v7985_v53  ;;  %v8004_v24 = vpack.c.bf16 %v7988_v10, %v7988_v10  ;;  %v13288_v12 = vld [vmem:[%s17234_s5 + $0x208] sm:$0xff]   ;;  %v13290_v37 = vld [vmem:[%s17234_s5 + $0x210] sm:$0xff]   ;;  %v13291_v5 = vld [vmem:[%s17234_s5 + $0x258] sm:$0xff]   ;;  %v7992_v34 = vmax.f32 %v16892_v25, 0.0 }
 0x603   :  { %11372 = vmatprep.subr.bf16.mxu1 %v13257_v49  ;;  %v8003_v60 = vpack.c.bf16 %v7987_v54, %v7987_v54  ;;  %v8006_v28 = vpack.c.bf16 %v7990_v61, %v7990_v61  ;;  %v13292_v26 = vld [vmem:[%s17234_s5 + $0x218] sm:$0xff]   ;;  %v13293_v35 = vld [vmem:[%s17234_s5 + $0x260] sm:$0xff]   ;;  %v13295_v6 = vld [vmem:[%s17234_s5 + $0x268] sm:$0xff]   ;;  %v7989_v49 = vmax.f32 %v16885_v2, 0.0 }
 0x604   :  { %v13294_v33 = vld [vmem:[%s17234_s5 + $0x220] sm:$0xff]   ;;  %v13296_v55 = vld [vmem:[%s17234_s5 + $0x228] sm:$0xff]   ;;  %v13297_v18 = vld [vmem:[%s17234_s5 + $0x270] sm:$0xff]   ;;  %v8008_v31 = vpack.c.bf16 %v7992_v34, %v7992_v34 }
 0x605   :  { %v13298_v41 = vld [vmem:[%s17234_s5 + $0x230] sm:$0xff]   ;;  %v13299_v15 = vld [vmem:[%s17234_s5 + $0x278] sm:$0xff]   ;;  %v13302_v7 = vld [vmem:[%s17234_s5 + $0x280] sm:$0xff]   ;;  %v8005_v13 = vpack.c.bf16 %v7989_v49, %v7989_v49 }
 0x606   :  { %11373 = vmatpush3.bf16.msra.mxu1 %v13258_v16  ;;  %v13300_v44 = vld [vmem:[%s17234_s5 + $0x238] sm:$0xff]   ;;  %v13301_v16 = vld [vmem:[%s17234_s5 + $0x2c0] sm:$0xff]   ;;  %v13304_v2 = vld [vmem:[%s17234_s5 + $0x288] sm:$0xff]  }
 0x607   :  { %11374 = vmatprep.subr.bf16.mxu1 %v13259_v50  ;;  %v13303_v50 = vld [vmem:[%s17234_s5 + $0x2c8] sm:$0xff]   ;;  %v13305_v25 = vld [vmem:[%s17234_s5 + $0x2d0] sm:$0xff]   ;;  %v13316_v53 = vld [vmem:[%s17234_s5 + $0x2b8] sm:$0xff]  }
 0x608   :  { %v13306_v29 = vld [vmem:[%s17234_s5 + $0x290] sm:$0xff]   ;;  %v13317_v10 = vld [vmem:[%s17234_s5 + $0x340] sm:$0xff]  }
 0x609   :  { %v13333_v54 = vld [vmem:[%s17234_s5 + $0x3c0] sm:$0xff]  }
 0x60a   :  { %11375 = vmatpush3.bf16.msra.mxu1 %v13260_v43  ;;  %v13307_v43 = vld [vmem:[%s17234_s5 + $0x2d8] sm:$0xff]   ;;  %v13334_v61 = vld [vmem:[%s17234_s5 + $0x380] sm:$0xff]  }
 0x60b   :  { %11376 = vmatprep.subr.bf16.mxu1 %v13261_v17  ;;  %v13308_v17 = vld [vmem:[%s17234_s5 + $0x298] sm:$0xff]  }
 0x60e   :  { %11377 = vmatpush3.bf16.msra.mxu1 %v13262_v32  ;;  %v13309_v32 = vld [vmem:[%s17234_s5 + $0x2e0] sm:$0xff]  }
 0x60f   :  { %11378 = vmatprep.subr.bf16.mxu1 %v13263_v1  ;;  %v13310_v1 = vld [vmem:[%s17234_s5 + $0x2a0] sm:$0xff]  }
 0x612   :  { %11379 = vmatpush3.bf16.msra.mxu1 %v13264_v4  ;;  %v13311_v4 = vld [vmem:[%s17234_s5 + $0x2e8] sm:$0xff]  }
 0x613   :  { %11380 = vmatprep.subr.bf16.mxu1 %v13265_v47  ;;  %v13312_v47 = vld [vmem:[%s17234_s5 + $0x2a8] sm:$0xff]  }
 0x616   :  { %11381 = vmatpush3.bf16.msra.mxu1 %v13266_v45  ;;  %v13313_v45 = vld [vmem:[%s17234_s5 + $0x2f0] sm:$0xff]  }
 0x617   :  { %11382 = vmatprep.subr.bf16.mxu1 %v13267_v0  ;;  %v13314_v0 = vld [vmem:[%s17234_s5 + $0x2b0] sm:$0xff]  }
 0x61a   :  { %11383 = vmatpush3.bf16.msra.mxu1 %v13268_v36  ;;  %v13315_v36 = vld [vmem:[%s17234_s5 + $0x2f8] sm:$0xff]  }
 0x61b   :  { %11390 = vmatprep.subr.bf16.mxu1 %v13269_v14  ;;  %v7991_v14 = vmax.f32 %v16895_v46, 0.0  ;;  %v13320_v46 = vld [vmem:[%s17234_s5 + $0x308] sm:$0xff]  }
 0x61d   :  { %9157 = vmatmul.mubr.bf16.vlgmr.msra.gmra.mrb[212].mxu1 %v8001_v58  ;;  %v13318_v58 = vld [vmem:[%s17234_s5 + $0x300] sm:$0xff]  }
 0x61e   :  { %11391 = vmatpush3.bf16.msra.mxu1 %v13270_v51  ;;  %9196 = vmatprep.mubr.bf16.mxu1 %v8004_v24  ;;  %v7994_v51 = vmax.f32 %v16900_v27, 0.0  ;;  %v13319_v24 = vld [vmem:[%s17234_s5 + $0x348] sm:$0xff]   ;;  %v13321_v27 = vld [vmem:[%s17234_s5 + $0x350] sm:$0xff]  }
 0x61f   :  { %11392 = vmatprep.subr.bf16.mxu1 %v13271_v52  ;;  %v8007_v52 = vpack.c.bf16 %v7991_v14, %v7991_v14  ;;  %v13351_v14 = vld [vmem:[%s17237_s7 + $0x10] sm:$0xff]  }
 0x622   :  { %11393 = vmatpush3.bf16.msra.mxu1 %v13272_v23  ;;  %v8010_v23 = vpack.c.bf16 %v7994_v51, %v7994_v51  ;;  %v13353_v51 = vld [vmem:[%s17237_s7 + $0x20] sm:$0xff]  }
 0x623   :  { %11394 = vmatprep.subr.bf16.mxu1 %v13273_v40  ;;  %v13322_v40 = vld [vmem:[%s17234_s5 + $0x310] sm:$0xff]  }
 0x626   :  { %11395 = vmatpush3.bf16.msra.mxu1 %v13274_v8  ;;  %v13323_v8 = vld [vmem:[%s17234_s5 + $0x358] sm:$0xff]  }
 0x627   :  { %11396 = vmatprep.subr.bf16.mxu1 %v13275_v63  ;;  %v13324_v63 = vld [vmem:[%s17234_s5 + $0x318] sm:$0xff]  }
 0x62a   :  { %11397 = vmatpush3.bf16.msra.mxu1 %v13276_v3  ;;  %v13325_v3 = vld [vmem:[%s17234_s5 + $0x360] sm:$0xff]  }
 0x62b   :  { %11398 = vmatprep.subr.bf16.mxu1 %v13277_v20  ;;  %v13326_v20 = vld [vmem:[%s17234_s5 + $0x320] sm:$0xff]  }
 0x62e   :  { %11399 = vmatpush3.bf16.msra.mxu1 %v13278_v22  ;;  %v13327_v22 = vld [vmem:[%s17234_s5 + $0x368] sm:$0xff]  }
 0x62f   :  { %11400 = vmatprep.subr.bf16.mxu1 %v13279_v21  ;;  %v13328_v21 = vld [vmem:[%s17234_s5 + $0x328] sm:$0xff]  }
 0x632   :  { %11401 = vmatpush3.bf16.msra.mxu1 %v13280_v56  ;;  %v13329_v56 = vld [vmem:[%s17234_s5 + $0x370] sm:$0xff]  }
 0x633   :  { %11402 = vmatprep.subr.bf16.mxu1 %v13281_v39  ;;  %v13330_v39 = vld [vmem:[%s17234_s5 + $0x330] sm:$0xff]  }
 0x636   :  { %11403 = vmatpush3.bf16.msra.mxu1 %v13282_v9  ;;  %v13331_v9 = vld [vmem:[%s17234_s5 + $0x378] sm:$0xff]  }
 0x637   :  { %11404 = vmatprep.subr.bf16.mxu1 %v13283_v59  ;;  %v13332_v59 = vld [vmem:[%s17234_s5 + $0x338] sm:$0xff]  }
 0x63a   :  { %11405 = vmatpush3.bf16.msra.mxu1 %v13284_v30  ;;  %v7993_v30 = vmax.f32 %v16912_v38, 0.0  ;;  %v13336_v38 = vld [vmem:[%s17234_s5 + $0x388] sm:$0xff]  }
 0x63b   :  { %11412 = vmatprep.subr.bf16.mxu1 %v13285_v57  ;;  %v7996_v57 = vmax.f32 %v16915_v62, 0.0  ;;  %v13337_v62 = vld [vmem:[%s17234_s5 + $0x3d0] sm:$0xff]  }
 0x63d   :  { %9197 = vmatmul.mubr.bf16.vlgmr.msra.gmra.mrb[216].mxu1 %v8003_v60  ;;  %v13335_v60 = vld [vmem:[%s17234_s5 + $0x3c8] sm:$0xff]  }
 0x63e   :  { %11413 = vmatpush3.bf16.msra.mxu1 %v13286_v48  ;;  %9236 = vmatprep.mubr.bf16.mxu1 %v8006_v28  ;;  %v8009_v48 = vpack.c.bf16 %v7993_v30, %v7993_v30  ;;  %v13338_v28 = vld [vmem:[%s17234_s5 + $0x390] sm:$0xff]  }
 0x63f   :  { %11414 = vmatprep.subr.bf16.mxu1 %v13287_v19  ;;  %v8012_v19 = vpack.c.bf16 %v7996_v57, %v7996_v57 }
 0x642   :  { %11415 = vmatpush3.bf16.msra.mxu1 %v13288_v12  ;;  %v13339_v12 = vld [vmem:[%s17234_s5 + $0x3d8] sm:$0xff]  }
 0x643   :  { %11416 = vmatprep.subr.bf16.mxu1 %v13289_v11  ;;  %v13340_v11 = vld [vmem:[%s17234_s5 + $0x398] sm:$0xff]  }
 0x646   :  { %11417 = vmatpush3.bf16.msra.mxu1 %v13290_v37  ;;  %v13341_v37 = vld [vmem:[%s17234_s5 + $0x3e0] sm:$0xff]  }
 0x647   :  { %11418 = vmatprep.subr.bf16.mxu1 %v13291_v5  ;;  %v13342_v5 = vld [vmem:[%s17234_s5 + $0x3a0] sm:$0xff]  }
 0x64a   :  { %11419 = vmatpush3.bf16.msra.mxu1 %v13292_v26  ;;  %v13343_v26 = vld [vmem:[%s17234_s5 + $0x3e8] sm:$0xff]  }
 0x64b   :  { %11420 = vmatprep.subr.bf16.mxu1 %v13293_v35  ;;  %v13344_v35 = vld [vmem:[%s17234_s5 + $0x3a8] sm:$0xff]  }
 0x64e   :  { %11421 = vmatpush3.bf16.msra.mxu1 %v13294_v33  ;;  %v13345_v33 = vld [vmem:[%s17234_s5 + $0x3f0] sm:$0xff]  }
 0x64f   :  { %11422 = vmatprep.subr.bf16.mxu1 %v13295_v6  ;;  %v13346_v6 = vld [vmem:[%s17234_s5 + $0x3b0] sm:$0xff]  }
 0x652   :  { %11423 = vmatpush3.bf16.msra.mxu1 %v13296_v55  ;;  %v13347_v55 = vld [vmem:[%s17234_s5 + $0x3f8] sm:$0xff]  }
 0x653   :  { %11424 = vmatprep.subr.bf16.mxu1 %v13297_v18  ;;  %v13348_v18 = vld [vmem:[%s17234_s5 + $0x3b8] sm:$0xff]  }
 0x656   :  { %11425 = vmatpush3.bf16.msra.mxu1 %v13298_v41  ;;  %v7995_v41 = vmax.f32 %v16918_v42, 0.0 }
 0x657   :  { %11426 = vmatprep.subr.bf16.mxu1 %v13299_v15 }
 0x658   :  { %v8011_v15 = vpack.c.bf16 %v7995_v41, %v7995_v41 }
 0x65a   :  { %11427 = vmatpush3.bf16.msra.mxu1 %v13300_v44 }
 0x65b   :  { %11434 = vmatprep.subr.bf16.mxu1 %v13301_v16  ;;  %v10612_v16 = vld [vmem:[%s17236_s6] ss:$0 sm:$0xff] }
 0x65d   :  { %9237 = vmatmul.mubr.bf16.vlgmr.msra.gmra.mrb[220].mxu1 %v8005_v13 }
 0x65e   :  { %11435 = vmatpush3.bf16.msra.mxu1 %v13302_v7  ;;  %9276 = vmatprep.mubr.bf16.mxu1 %v8008_v31 }
 0x65f   :  { %11436 = vmatprep.subr.bf16.mxu1 %v13303_v50 }
 0x662   :  { %11437 = vmatpush3.bf16.msra.mxu1 %v13304_v2 }
 0x663   :  { %11438 = vmatprep.subr.bf16.mxu1 %v13305_v25 }
 0x666   :  { %11439 = vmatpush3.bf16.msra.mxu1 %v13306_v29 }
 0x667   :  { %11440 = vmatprep.subr.bf16.mxu1 %v13307_v43 }
 0x66a   :  { %11441 = vmatpush3.bf16.msra.mxu1 %v13308_v17 }
 0x66b   :  { %11442 = vmatprep.subr.bf16.mxu1 %v13309_v32 }
 0x66e   :  { %11443 = vmatpush3.bf16.msra.mxu1 %v13310_v1 }
 0x66f   :  { %11444 = vmatprep.subr.bf16.mxu1 %v13311_v4 }
 0x672   :  { %11445 = vmatpush3.bf16.msra.mxu1 %v13312_v47 }
 0x673   :  { %11446 = vmatprep.subr.bf16.mxu1 %v13313_v45 }
 0x676   :  { %11447 = vmatpush3.bf16.msra.mxu1 %v13314_v0  ;;  %v13358_v0 = vmov 0.0  }
 0x677   :  { %11448 = vmatprep.subr.bf16.mxu1 %v13315_v36  ;;  %v13349_v36 = vld [vmem:[%s17237_s7] sm:$0xff]  }
 0x67a   :  { %11449 = vmatpush3.bf16.msra.mxu1 %v13316_v53  ;;  %v13350_v53 = vld [vmem:[%s17237_s7 + $0x8] sm:$0xff]  }
 0x67b   :  { %11456 = vmatprep.subr.bf16.mxu1 %v13317_v10  ;;  %v13352_v10 = vld [vmem:[%s17237_s7 + $0x18] sm:$0xff]  }
 0x67d   :  { %9277 = vmatmul.mubr.bf16.vlgmr.msra.gmra.mrb[224].mxu1 %v8007_v52 }
 0x67e   :  { %11457 = vmatpush3.bf16.msra.mxu1 %v13318_v58  ;;  %9316 = vmatprep.mubr.bf16.mxu1 %v8010_v23  ;;  %v13354_v58 = vld [vmem:[%s17237_s7 + $0x28] sm:$0xff]  }
 0x67f   :  { %11458 = vmatprep.subr.bf16.mxu1 %v13319_v24 }
 0x682   :  { %11459 = vmatpush3.bf16.msra.mxu1 %v13320_v46 }
 0x683   :  { %11460 = vmatprep.subr.bf16.mxu1 %v13321_v27 }
 0x686   :  { %11461 = vmatpush3.bf16.msra.mxu1 %v13322_v40 }
 0x687   :  { %11462 = vmatprep.subr.bf16.mxu1 %v13323_v8  ;;  %v13355_v8 = vld [vmem:[%s17237_s7 + $0x30] sm:$0xff]  }
 0x68a   :  { %11463 = vmatpush3.bf16.msra.mxu1 %v13324_v63  ;;  %v13356_v63 = vld [vmem:[%s17237_s7 + $0x38] sm:$0xff]  }
 0x68b   :  { %11464 = vmatprep.subr.bf16.mxu1 %v13325_v3 }
 0x68e   :  { %11465 = vmatpush3.bf16.msra.mxu1 %v13326_v20 }
 0x68f   :  { %11466 = vmatprep.subr.bf16.mxu1 %v13327_v22 }
 0x692   :  { %11467 = vmatpush3.bf16.msra.mxu1 %v13328_v21 }
 0x693   :  { %11468 = vmatprep.subr.bf16.mxu1 %v13329_v56 }
 0x696   :  { %11469 = vmatpush3.bf16.msra.mxu1 %v13330_v39 }
 0x697   :  { %11470 = vmatprep.subr.bf16.mxu1 %v13331_v9 }
 0x69a   :  { %11471 = vmatpush3.bf16.msra.mxu1 %v13332_v59 }
 0x69b   :  { %11478 = vmatprep.subr.bf16.mxu1 %v13333_v54 }
 0x69d   :  { %9317 = vmatmul.mubr.bf16.vlgmr.msra.gmra.mrb[228].mxu1 %v8009_v48 }
 0x69e   :  { %11479 = vmatpush3.bf16.msra.mxu1 %v13334_v61  ;;  %9356 = vmatprep.mubr.bf16.mxu1 %v8012_v19 }
 0x69f   :  { %11480 = vmatprep.subr.bf16.mxu1 %v13335_v60 }
 0x6a2   :  { %11481 = vmatpush3.bf16.msra.mxu1 %v13336_v38 }
 0x6a3   :  { %11482 = vmatprep.subr.bf16.mxu1 %v13337_v62 }
 0x6a6   :  { %11483 = vmatpush3.bf16.msra.mxu1 %v13338_v28 }
 0x6a7   :  { %11484 = vmatprep.subr.bf16.mxu1 %v13339_v12 }
 0x6aa   :  { %11485 = vmatpush3.bf16.msra.mxu1 %v13340_v11 }
 0x6ab   :  { %11486 = vmatprep.subr.bf16.mxu1 %v13341_v37 }
 0x6ae   :  { %11487 = vmatpush3.bf16.msra.mxu1 %v13342_v5 }
 0x6af   :  { %11488 = vmatprep.subr.bf16.mxu1 %v13343_v26 }
 0x6b2   :  { %11489 = vmatpush3.bf16.msra.mxu1 %v13344_v35 }
 0x6b3   :  { %11490 = vmatprep.subr.bf16.mxu1 %v13345_v33 }
 0x6b6   :  { %11491 = vmatpush3.bf16.msra.mxu1 %v13346_v6 }
 0x6b7   :  { %11492 = vmatprep.subr.bf16.mxu1 %v13347_v55  ;;  %v10741_v55 = vld [vmem:[%s17238_s8] ss:$0 sm:$0xff] }
 0x6ba   :  { %11493 = vmatpush3.bf16.msra.mxu1 %v13348_v18 }
 0x6bb   :  { %12517 = vmatprep.subr.bf16.mxu1 %v13358_v0 }
 0x6bd   :  { %9357 = vmatmul.mubr.bf16.vlgmr.msra.gmra.mrb[232].mxu1 %v8011_v15 }
 0x6be   :  { %12518 = vmatpush3.bf16.msra.mxu1 %v13349_v36  ;;  %12533 = vmatprep.mubr.msk.bf16.mxu1 %vm13359_vm14, %v13358_v0 }
 0x6bf   :  { %12519 = vmatprep.subr.bf16.mxu1 %v13358_v0 }
 0x6c2   :  { %12520 = vmatpush3.bf16.msra.mxu1 %v13350_v53 }
 0x6c3   :  { %12521 = vmatprep.subr.bf16.mxu1 %v13358_v0 }
 0x6c6   :  { %12522 = vmatpush3.bf16.msra.mxu1 %v13351_v14 }
 0x6c7   :  { %12523 = vmatprep.subr.bf16.mxu1 %v13358_v0 }
 0x6ca   :  { %12524 = vmatpush3.bf16.msra.mxu1 %v13352_v10 }
 0x6cb   :  { %12525 = vmatprep.subr.bf16.mxu1 %v13358_v0 }
 0x6ce   :  { %12526 = vmatpush3.bf16.msra.mxu1 %v13353_v51 }
 0x6cf   :  { %12527 = vmatprep.subr.bf16.mxu1 %v13358_v0 }
 0x6d0   :  { %v11340_v44 = vpop.f32.mrb[16].mxu0  ;;  %v11362_v49 = vpop.f32.mrb[208].mxu1 }
 0x6d1   :  { %v11341_v34 = vpop.f32.mrb[17].mxu0  ;;  %v11363_v7 = vpop.f32.mrb[209].mxu1 }
 0x6d2   :  { %v11342_v13 = vadd.f32 %v11341_v34, %v11340_v44  ;;  %v11364_v50 = vadd.f32 %v11363_v7, %v11362_v49  ;;  %v11343_v31 = vpop.f32.mrb[18].mxu0  ;;  %v11365_v2 = vpop.f32.mrb[210].mxu1  ;;  %12528 = vmatpush3.bf16.msra.mxu1 %v13354_v58 }
 0x6d3   :  { %v11344_v25 = vpop.f32.mrb[19].mxu0  ;;  %v11366_v29 = vpop.f32.mrb[211].mxu1  ;;  %12529 = vmatprep.subr.bf16.mxu1 %v13358_v0 }
 0x6d4   :  { %v9079_v43 = vadd.f32 %v11342_v13, %v10612_v16 }
 0x6d6   :  { %v9119_v17 = vadd.f32 %v11364_v50, %v9079_v43  ;;  %12530 = vmatpush3.bf16.msra.mxu1 %v13355_v8 }
 0x6d7   :  { %12531 = vmatprep.subr.bf16.mxu1 %v13358_v0 }
 0x6da   :  { %12532 = vmatpush3.bf16.msra.mxu1 %v13356_v63 }
 0x6f0   :  { %v11384_v42 = vpop.f32.mrb[212].mxu1 }
 0x6f1   :  { %v11385_v32 = vpop.f32.mrb[213].mxu1 }
 0x6f2   :  { %v11386_v1 = vadd.f32 %v11385_v32, %v11384_v42  ;;  %v11387_v4 = vpop.f32.mrb[214].mxu1 }
 0x6f3   :  { %v11388_v47 = vpop.f32.mrb[215].mxu1 }
 0x6f4   :  { %v9159_v45 = vadd.f32 %v11386_v1, %v9119_v17 }
 0x710   :  { %v11406_v52 = vpop.f32.mrb[216].mxu1 }
 0x711   :  { %v11407_v24 = vpop.f32.mrb[217].mxu1 }
 0x712   :  { %v11408_v23 = vadd.f32 %v11407_v24, %v11406_v52  ;;  %v11409_v46 = vpop.f32.mrb[218].mxu1 }
 0x713   :  { %v11410_v27 = vpop.f32.mrb[219].mxu1 }
 0x714   :  { %v9199_v40 = vadd.f32 %v11408_v23, %v9159_v45 }
 0x730   :  { %v11428_v3 = vpop.f32.mrb[220].mxu1 }
 0x731   :  { %v11429_v20 = vpop.f32.mrb[221].mxu1 }
 0x732   :  { %v11430_v22 = vadd.f32 %v11429_v20, %v11428_v3  ;;  %v11431_v21 = vpop.f32.mrb[222].mxu1 }
 0x733   :  { %v11432_v56 = vpop.f32.mrb[223].mxu1 }
 0x734   :  { %v9239_v39 = vadd.f32 %v11430_v22, %v9199_v40 }
 0x750   :  { %v11450_v9 = vpop.f32.mrb[224].mxu1 }
 0x751   :  { %v11451_v59 = vpop.f32.mrb[225].mxu1 }
 0x752   :  { %v11452_v30 = vadd.f32 %v11451_v59, %v11450_v9  ;;  %v11453_v54 = vpop.f32.mrb[226].mxu1 }
 0x753   :  { %v11454_v57 = vpop.f32.mrb[227].mxu1 }
 0x754   :  { %v9279_v61 = vadd.f32 %v11452_v30, %v9239_v39 }
 0x770   :  { %v11472_v48 = vpop.f32.mrb[228].mxu1 }
 0x771   :  { %v11473_v60 = vpop.f32.mrb[229].mxu1 }
 0x772   :  { %v11474_v19 = vadd.f32 %v11473_v60, %v11472_v48  ;;  %v11475_v38 = vpop.f32.mrb[230].mxu1 }
 0x773   :  { %v11476_v62 = vpop.f32.mrb[231].mxu1 }
 0x774   :  { %v9319_v28 = vadd.f32 %v11474_v19, %v9279_v61 }
 0x790   :  { %v11494_v12 = vpop.f32.mrb[232].mxu1 }
 0x791   :  { %v11495_v11 = vpop.f32.mrb[233].mxu1 }
 0x792   :  { %v11496_v37 = vadd.f32 %v11495_v11, %v11494_v12  ;;  %v11497_v5 = vpop.f32.mrb[234].mxu1 }
 0x793   :  { %v11498_v26 = vpop.f32.mrb[235].mxu1 }
 0x794   :  { %v9359_v35 = vadd.f32 %v11496_v37, %v9319_v28 }
 0x796   :  { %v9364_v33 = vmax.f32 %v9359_v35, 0.0 }
 0x798   :  { %v9365_v6 = vpack.c.bf16 %v9364_v33, %v9364_v33 }
 0x79a   :  { %12534 = vmatmul.mubr.bf16.vlgmr.msra.gmra.mrb[236].mxu1 %v9365_v6 }
 0x86d   :  { %v9471_v18 = vpop.f32.mrb[236].mxu1 }
 0x86e   :  { %v9472_v41 = vadd.f32 %v10741_v55, %v9471_v18  ;;  %v12535_v15 = vpop.f32.mrb[237].mxu1 }
 0x86f   :  { %v9474_v44 = vpop.f32.mrb[238].mxu1 }
 0x870   :  { %9477 = vst [vmem:[%s17239_s9] sm:$0x3] %v9472_v41  ;;  %v12536_v49 = vpop.f32.mrb[239].mxu1 }

</bundles_post_ra>
